<compile_context>
chip_gen: v7x
topology: tpu7x:2x2x1
jax: 0.10.0
libtpu: 0.0.40
codegen_flags: <defaults>
</compile_context>

<pallas_src>
import functools

import numpy as np
import jax
import jax.numpy as jnp
from jax.experimental import pallas as pl
from jax.experimental.pallas import tpu as pltpu


# On v6e / v7x this may be set to jnp.bfloat16 to halve matmul operand bytes
# (accumulation stays f32). Kept f32 to preserve the module's numerics exactly
# and because v5e has no bf16 VPU path for the epilogue.
MATMUL_INPUT_DTYPE = jnp.float32


# ----------------------------- Pallas kernels ------------------------------ #

def _conv_mm_t_kernel(w_ref, x_ref, b_ref, o_ref, *, scale):
    """o = relu(scale * (W @ X) + b) for one whole conv layer.

    W: (OC, K) flattened conv kernel, X: (K, M) transposed patch matrix with
    M = B*OH*OW on the lane axis, b: (OC, 1). Output (OC, M) is lane-dense
    along M (the wide axis) rather than the narrow channel axis.
    """
    acc = jnp.dot(w_ref[...].astype(MATMUL_INPUT_DTYPE),
                  x_ref[...].astype(MATMUL_INPUT_DTYPE),
                  preferred_element_type=jnp.float32)
    if scale != 1.0:
        acc = acc * scale
    o_ref[...] = jnp.maximum(acc + b_ref[...], 0.0).astype(o_ref.dtype)


def _head_kernel(x_ref, wfc_ref, bfc_ref, wc_ref, bc_ref, feat_ref, val_ref):
    """Fused Linear(1568->512)+ReLU and critic Linear(512->1).

    Features stay in VMEM between the two matmuls; both outputs are written
    from the same kernel (one launch, no HBM round trip of the features).
    """
    h = jnp.dot(x_ref[...].astype(MATMUL_INPUT_DTYPE),
                wfc_ref[...].astype(MATMUL_INPUT_DTYPE),
                preferred_element_type=jnp.float32)
    h = jnp.maximum(h + bfc_ref[...], 0.0)
    feat_ref[...] = h.astype(feat_ref.dtype)
    v = jnp.dot(h.astype(MATMUL_INPUT_DTYPE),
                wc_ref[...].astype(MATMUL_INPUT_DTYPE),
                preferred_element_type=jnp.float32) + bc_ref[...]
    val_ref[...] = v.astype(val_ref.dtype)


# ------------------------------- wrappers ---------------------------------- #

def _full_spec(shape):
    """Whole-array block (single grid step); exempt from (8,128) tiling rule."""
    return pl.BlockSpec(shape, lambda i: (0,) * len(shape))


def conv_matmul_t(w_mat, patches_t, bias_col, *, scale=1.0):
    """relu(scale * (w_mat @ patches_t) + bias_col) as one pallas_call."""
    OC, K = w_mat.shape
    K2, M = patches_t.shape
    assert K == K2
    return pl.pallas_call(
        functools.partial(_conv_mm_t_kernel, scale=scale),
        out_shape=jax.ShapeDtypeStruct((OC, M), jnp.float32),
        grid=(1,),
        in_specs=[_full_spec((OC, K)),
                  _full_spec((K, M)),
                  _full_spec((OC, 1))],
        out_specs=_full_spec((OC, M)),
        compiler_params=pltpu.CompilerParams(
            dimension_semantics=("arbitrary",)),
    )(w_mat, patches_t, bias_col)


def mlp_head(x_flat, w_fc_kn, b_fc_row, w_c_kn, b_c_row):
    """Fused FC+ReLU and critic head; returns (features, value)."""
    B, K = x_flat.shape
    K2, Hd = w_fc_kn.shape
    Hd2, O = w_c_kn.shape
    assert K == K2 and Hd == Hd2
    feats, value = pl.pallas_call(
        _head_kernel,
        out_shape=(jax.ShapeDtypeStruct((B, Hd), jnp.float32),
                   jax.ShapeDtypeStruct((B, O), jnp.float32)),
        grid=(1,),
        in_specs=[_full_spec((B, K)),
                  _full_spec((K, Hd)),
                  _full_spec((1, Hd)),
                  _full_spec((Hd, O)),
                  _full_spec((1, O))],
        out_specs=(_full_spec((B, Hd)), _full_spec((B, O))),
        compiler_params=pltpu.CompilerParams(
            dimension_semantics=("arbitrary",)),
    )(x_flat, w_fc_kn, b_fc_row, w_c_kn, b_c_row)
    return feats, value


# ----------------------------- im2col (XLA glue) ---------------------------- #

def im2col_t(x_cbhw, kh, kw, stride):
    """Transposed patch matrix (C*KH*KW, B*OH*OW).

    Row (K) order is (c, kh, kw) to match PyTorch's w.reshape(OC, IC*KH*KW);
    column order is (b, oh, ow). Input layout is (C, B, H, W), which is exactly
    what the previous conv layer's (OC, B*OH*OW) output reshapes to — so no
    transposes are needed between layers.
    """
    C, B, H, W = x_cbhw.shape
    oh = (H - kh) // stride + 1
    ow = (W - kw) // stride + 1
    cols = []
    for i in range(kh):
        for j in range(kw):
            cols.append(x_cbhw[:, :, i:i + oh * stride:stride,
                               j:j + ow * stride:stride])
    p = jnp.stack(cols, axis=1)                      # (C, KH*KW, B, OH, OW)
    return p.reshape(C * kh * kw, B * oh * ow), (oh, ow)


# --------------------------- weight pre-layout ------------------------------ #

def prepare_params(params):
    """One-time re-layout of PyTorch-shaped params (runs once, outside jit)."""
    def conv_mat(w):  # (OC, IC, KH, KW) -> (OC, IC*KH*KW); K order (c, kh, kw)
        return jnp.asarray(w.reshape(w.shape[0], -1), jnp.float32)
    return {
        "w1m": conv_mat(params["w1"]), "b1c": params["b1"].reshape(-1, 1),
        "w2m": conv_mat(params["w2"]), "b2c": params["b2"].reshape(-1, 1),
        "w3m": conv_mat(params["w3"]), "b3c": params["b3"].reshape(-1, 1),
        "w_fc_kn": jnp.asarray(params["w_fc"].T),        # (1568, 512)
        "b_fc_r": params["b_fc"].reshape(1, -1),
        "w_c_kn": jnp.asarray(params["w_critic"].T),     # (512, 1)
        "b_c_r": params["b_critic"].reshape(1, -1),
    }


# ------------------------------- CNNBase forward ---------------------------- #

def cnn_base_forward(prep, inputs, rnn_hxs, masks):
    """Equivalent of CNNBase.forward: returns (critic_value, features, rnn_hxs).

    `masks` is unused (module is non-recurrent), matching the reference.
    """
    B = inputs.shape[0]
    x = inputs.transpose(1, 0, 2, 3)                      # NCHW -> CBHW (once)

    # conv1 (8x8, stride 4) with /255 folded into the epilogue scale.
    p1, (oh1, ow1) = im2col_t(x, 8, 8, 4)                 # (256, B*400)
    y1 = conv_matmul_t(prep["w1m"], p1, prep["b1c"],
                       scale=1.0 / 255.0)                 # (32, B*400)

    # conv2 (4x4, stride 2)
    p2, (oh2, ow2) = im2col_t(y1.reshape(32, B, oh1, ow1), 4, 4, 2)   # (512, B*81)
    y2 = conv_matmul_t(prep["w2m"], p2, prep["b2c"])                  # (64, B*81)

    # conv3 (3x3, stride 1)
    p3, (oh3, ow3) = im2col_t(y2.reshape(64, B, oh2, ow2), 3, 3, 1)   # (576, B*49)
    y3 = conv_matmul_t(prep["w3m"], p3, prep["b3c"])                  # (32, B*49)

    # Flatten exactly like PyTorch Flatten on NCHW: column order (c, h, w).
    x_flat = (y3.reshape(32, B, oh3 * ow3)
                .transpose(1, 0, 2)
                .reshape(B, 32 * oh3 * ow3))                          # (B, 1568)

    # Fused FC+ReLU and critic head.
    feats, value = mlp_head(x_flat, prep["w_fc_kn"], prep["b_fc_r"],
                            prep["w_c_kn"], prep["b_c_r"])
    return value, feats, rnn_hxs


# ------------------------- pure-XLA reference (check) ------------------------ #

def _ref_forward(params, inputs, rnn_hxs, masks):
    x = inputs / 255.0

    def conv(x, w, b, stride):
        y = jax.lax.conv_general_dilated(
            x, w, window_strides=(stride, stride), padding="VALID",
            dimension_numbers=("NCHW", "OIHW", "NCHW"))
        return jax.nn.relu(y + b[None, :, None, None])

    x = conv(x, params["w1"], params["b1"], 4)
    x = conv(x, params["w2"], params["b2"], 2)
    x = conv(x, params["w3"], params["b3"], 1)
    x = x.reshape(x.shape[0], -1)
    x = jax.nn.relu(x @ params["w_fc"].T + params["b_fc"])
    v = x @ params["w_critic"].T + params["b_critic"]
    return v, x, rnn_hxs


# --------------------------- deterministic init ------------------------------ #

def orthogonal(key, shape, gain=1.0):
    """Orthogonal init matching nn.init.orthogonal_ (flatten dim 0 vs rest)."""
    rows = shape[0]
    cols = int(np.prod(shape[1:]))
    n, m = max(rows, cols), min(rows, cols)
    a = jax.random.normal(key, (n, m), dtype=jnp.float32)
    q, r = jnp.linalg.qr(a)
    q = q * jnp.sign(jnp.diagonal(r))
    if rows < cols:
        q = q.T
    return (gain * q[:rows, :cols]).reshape(shape).astype(jnp.float32)


if __name__ == "__main__":
    num_inputs = 4          # input channels
    hidden_size = 512
    B = 2
    H = W = 84              # 84x84 required: Linear expects 32*7*7 after convs

    key = jax.random.PRNGKey(0)
    keys = jax.random.split(key, 8)
    gain_relu = float(np.sqrt(2.0))

    params = {
        "w1": orthogonal(keys[0], (32, num_inputs, 8, 8), gain_relu),
        "b1": jnp.zeros((32,), jnp.float32),
        "w2": orthogonal(keys[1], (64, 32, 4, 4), gain_relu),
        "b2": jnp.zeros((64,), jnp.float32),
        "w3": orthogonal(keys[2], (32, 64, 3, 3), gain_relu),
        "b3": jnp.zeros((32,), jnp.float32),
        "w_fc": orthogonal(keys[3], (hidden_size, 32 * 7 * 7), gain_relu),
        "b_fc": jnp.zeros((hidden_size,), jnp.float32),
        "w_critic": orthogonal(keys[4], (1, hidden_size), 1.0),
        "b_critic": jnp.zeros((1,), jnp.float32),
    }
    prep = prepare_params(params)   # one-time weight re-layout (outside jit)

    inputs = jax.random.uniform(keys[5], (B, num_inputs, H, W),
                                jnp.float32, 0.0, 255.0)    # NCHW, pixel range
    rnn_hxs = jnp.zeros((B, 1), jnp.float32)  # recurrent_hidden_state_size == 1
    masks = jnp.ones((B, 1), jnp.float32)

    fwd = jax.jit(cnn_base_forward)
    value, feats, hxs = fwd(prep, inputs, rnn_hxs, masks)
    jax.block_until_ready((value, feats, hxs))

    assert value.shape == (B, 1)
    assert feats.shape == (B, hidden_size)
    assert hxs.shape == rnn_hxs.shape

    # Numerical check vs. pure-XLA reference of the PyTorch module. Tolerance
    # is generous to cover default-precision (bf16-pass) MXU matmuls; a layout
    # or flatten-order bug would produce O(1) errors and still be caught.
    v_ref, f_ref, _ = jax.jit(_ref_forward)(params, inputs, rnn_hxs, masks)
    jax.block_until_ready((v_ref, f_ref))
    assert np.allclose(np.asarray(value), np.asarray(v_ref), rtol=5e-2, atol=5e-2)
    assert np.allclose(np.asarray(feats), np.asarray(f_ref), rtol=5e-2, atol=5e-2)

    print("KERNEL_OK")
</pallas_src>

<mosaic_0001>
module attributes {stable_mosaic.version = 11 : i64} {
  func.func @_conv_mm_t_kernel(%arg0: i32, %arg1: memref<32x256xf32, #tpu.memory_space<vmem>>, %arg2: memref<256x800xf32, #tpu.memory_space<vmem>>, %arg3: memref<32x1xf32, #tpu.memory_space<vmem>>, %arg4: memref<32x800xf32, #tpu.memory_space<vmem>>) attributes {dimension_semantics = [#tpu.dimension_semantics<arbitrary>], iteration_bounds = array<i64: 1>, scalar_prefetch = 0 : i64, scratch_operands = 0 : i64, tpu.core_type = #tpu.core_type<tc>, window_params = [{pipeline_mode = #tpu.pipeline_mode<synchronous>, transform_indices = @transform_0, window_bounds = array<i64: 32, 256>}, {pipeline_mode = #tpu.pipeline_mode<synchronous>, transform_indices = @transform_1, window_bounds = array<i64: 256, 800>}, {pipeline_mode = #tpu.pipeline_mode<synchronous>, transform_indices = @transform_2, window_bounds = array<i64: 32, 1>}, {pipeline_mode = #tpu.pipeline_mode<synchronous>, transform_indices = @transform_3, window_bounds = array<i64: 32, 800>}]} {
    %c0 = arith.constant 0 : index
    %c0_0 = arith.constant 0 : index
    %0 = vector.load %arg1[%c0, %c0_0] : memref<32x256xf32, #tpu.memory_space<vmem>>, vector<32x256xf32>
    %c0_1 = arith.constant 0 : index
    %c0_2 = arith.constant 0 : index
    %1 = vector.load %arg2[%c0_1, %c0_2] : memref<256x800xf32, #tpu.memory_space<vmem>>, vector<256x800xf32>
    %cst = arith.constant dense<0.000000e+00> : vector<32x800xf32>
    %2 = tpu.matmul %0, %1, %cst {dimension_numbers = #tpu.dot_dimension_numbers<[1], [0], [0], [1], [0, 0, 1, 1], [], []>} : vector<32x256xf32>, vector<256x800xf32>, vector<32x800xf32> -> vector<32x800xf32>
    %cst_3 = arith.constant 0.00392156886 : f32
    %3 = vector.broadcast %cst_3 : f32 to vector<32x800xf32>
    %4 = arith.mulf %2, %3 : vector<32x800xf32>
    %c0_4 = arith.constant 0 : index
    %c0_5 = arith.constant 0 : index
    %5 = vector.load %arg3[%c0_4, %c0_5] : memref<32x1xf32, #tpu.memory_space<vmem>>, vector<32x1xf32>
    %6 = vector.broadcast %5 : vector<32x1xf32> to vector<32x800xf32>
    %7 = arith.addf %4, %6 : vector<32x800xf32>
    %cst_6 = arith.constant 0.000000e+00 : f32
    %8 = vector.broadcast %cst_6 : f32 to vector<32x800xf32>
    %9 = arith.maximumf %7, %8 : vector<32x800xf32>
    %c0_7 = arith.constant 0 : index
    %c0_8 = arith.constant 0 : index
    %10 = vector.load %arg4[%c0_7, %c0_8] : memref<32x800xf32, #tpu.memory_space<vmem>>, vector<32x800xf32>
    tpu.vector_store %arg4[%c0_7, %c0_8], %9 {strides = array<i32>} : memref<32x800xf32, #tpu.memory_space<vmem>>, vector<32x800xf32>,
    return
  }
  func.func @transform_0(%arg0: i32) -> (i32, i32) {
    %c0_i32 = arith.constant 0 : i32
    %c0_i32_0 = arith.constant 0 : i32
    %c0_i32_1 = arith.constant 0 : i32
    return %c0_i32, %c0_i32_0 : i32, i32
  }
  func.func @transform_1(%arg0: i32) -> (i32, i32) {
    %c0_i32 = arith.constant 0 : i32
    %c0_i32_0 = arith.constant 0 : i32
    %c0_i32_1 = arith.constant 0 : i32
    return %c0_i32, %c0_i32_0 : i32, i32
  }
  func.func @transform_2(%arg0: i32) -> (i32, i32) {
    %c0_i32 = arith.constant 0 : i32
    %c0_i32_0 = arith.constant 0 : i32
    %c0_i32_1 = arith.constant 0 : i32
    return %c0_i32, %c0_i32_0 : i32, i32
  }
  func.func @transform_3(%arg0: i32) -> (i32, i32) {
    %c0_i32 = arith.constant 0 : i32
    %c0_i32_0 = arith.constant 0 : i32
    %c0_i32_1 = arith.constant 0 : i32
    return %c0_i32, %c0_i32_0 : i32, i32
  }
}

module attributes {stable_mosaic.version = 11 : i64} {
  func.func @_conv_mm_t_kernel(%arg0: i32, %arg1: memref<64x512xf32, #tpu.memory_space<vmem>>, %arg2: memref<512x162xf32, #tpu.memory_space<vmem>>, %arg3: memref<64x1xf32, #tpu.memory_space<vmem>>, %arg4: memref<64x162xf32, #tpu.memory_space<vmem>>) attributes {dimension_semantics = [#tpu.dimension_semantics<arbitrary>], iteration_bounds = array<i64: 1>, scalar_prefetch = 0 : i64, scratch_operands = 0 : i64, tpu.core_type = #tpu.core_type<tc>, window_params = [{pipeline_mode = #tpu.pipeline_mode<synchronous>, transform_indices = @transform_0, window_bounds = array<i64: 64, 512>}, {pipeline_mode = #tpu.pipeline_mode<synchronous>, transform_indices = @transform_1, window_bounds = array<i64: 512, 162>}, {pipeline_mode = #tpu.pipeline_mode<synchronous>, transform_indices = @transform_2, window_bounds = array<i64: 64, 1>}, {pipeline_mode = #tpu.pipeline_mode<synchronous>, transform_indices = @transform_3, window_bounds = array<i64: 64, 162>}]} {
    %c0 = arith.constant 0 : index
    %c0_0 = arith.constant 0 : index
    %0 = vector.load %arg1[%c0, %c0_0] : memref<64x512xf32, #tpu.memory_space<vmem>>, vector<64x512xf32>
    %c0_1 = arith.constant 0 : index
    %c0_2 = arith.constant 0 : index
    %1 = vector.load %arg2[%c0_1, %c0_2] : memref<512x162xf32, #tpu.memory_space<vmem>>, vector<512x162xf32>
    %cst = arith.constant dense<0.000000e+00> : vector<64x162xf32>
    %2 = tpu.matmul %0, %1, %cst {dimension_numbers = #tpu.dot_dimension_numbers<[1], [0], [0], [1], [0, 0, 1, 1], [], []>} : vector<64x512xf32>, vector<512x162xf32>, vector<64x162xf32> -> vector<64x162xf32>
    %c0_3 = arith.constant 0 : index
    %c0_4 = arith.constant 0 : index
    %3 = vector.load %arg3[%c0_3, %c0_4] : memref<64x1xf32, #tpu.memory_space<vmem>>, vector<64x1xf32>
    %4 = vector.broadcast %3 : vector<64x1xf32> to vector<64x162xf32>
    %5 = arith.addf %2, %4 : vector<64x162xf32>
    %cst_5 = arith.constant 0.000000e+00 : f32
    %6 = vector.broadcast %cst_5 : f32 to vector<64x162xf32>
    %7 = arith.maximumf %5, %6 : vector<64x162xf32>
    %c0_6 = arith.constant 0 : index
    %c0_7 = arith.constant 0 : index
    %8 = vector.load %arg4[%c0_6, %c0_7] : memref<64x162xf32, #tpu.memory_space<vmem>>, vector<64x162xf32>
    tpu.vector_store %arg4[%c0_6, %c0_7], %7 {strides = array<i32>} : memref<64x162xf32, #tpu.memory_space<vmem>>, vector<64x162xf32>,
    return
  }
  func.func @transform_0(%arg0: i32) -> (i32, i32) {
    %c0_i32 = arith.constant 0 : i32
    %c0_i32_0 = arith.constant 0 : i32
    %c0_i32_1 = arith.constant 0 : i32
    return %c0_i32, %c0_i32_0 : i32, i32
  }
  func.func @transform_1(%arg0: i32) -> (i32, i32) {
    %c0_i32 = arith.constant 0 : i32
    %c0_i32_0 = arith.constant 0 : i32
    %c0_i32_1 = arith.constant 0 : i32
    return %c0_i32, %c0_i32_0 : i32, i32
  }
  func.func @transform_2(%arg0: i32) -> (i32, i32) {
    %c0_i32 = arith.constant 0 : i32
    %c0_i32_0 = arith.constant 0 : i32
    %c0_i32_1 = arith.constant 0 : i32
    return %c0_i32, %c0_i32_0 : i32, i32
  }
  func.func @transform_3(%arg0: i32) -> (i32, i32) {
    %c0_i32 = arith.constant 0 : i32
    %c0_i32_0 = arith.constant 0 : i32
    %c0_i32_1 = arith.constant 0 : i32
    return %c0_i32, %c0_i32_0 : i32, i32
  }
}

module attributes {stable_mosaic.version = 11 : i64} {
  func.func @_conv_mm_t_kernel(%arg0: i32, %arg1: memref<32x576xf32, #tpu.memory_space<vmem>>, %arg2: memref<576x98xf32, #tpu.memory_space<vmem>>, %arg3: memref<32x1xf32, #tpu.memory_space<vmem>>, %arg4: memref<32x98xf32, #tpu.memory_space<vmem>>) attributes {dimension_semantics = [#tpu.dimension_semantics<arbitrary>], iteration_bounds = array<i64: 1>, scalar_prefetch = 0 : i64, scratch_operands = 0 : i64, tpu.core_type = #tpu.core_type<tc>, window_params = [{pipeline_mode = #tpu.pipeline_mode<synchronous>, transform_indices = @transform_0, window_bounds = array<i64: 32, 576>}, {pipeline_mode = #tpu.pipeline_mode<synchronous>, transform_indices = @transform_1, window_bounds = array<i64: 576, 98>}, {pipeline_mode = #tpu.pipeline_mode<synchronous>, transform_indices = @transform_2, window_bounds = array<i64: 32, 1>}, {pipeline_mode = #tpu.pipeline_mode<synchronous>, transform_indices = @transform_3, window_bounds = array<i64: 32, 98>}]} {
    %c0 = arith.constant 0 : index
    %c0_0 = arith.constant 0 : index
    %0 = vector.load %arg1[%c0, %c0_0] : memref<32x576xf32, #tpu.memory_space<vmem>>, vector<32x576xf32>
    %c0_1 = arith.constant 0 : index
    %c0_2 = arith.constant 0 : index
    %1 = vector.load %arg2[%c0_1, %c0_2] : memref<576x98xf32, #tpu.memory_space<vmem>>, vector<576x98xf32>
    %cst = arith.constant dense<0.000000e+00> : vector<32x98xf32>
    %2 = tpu.matmul %0, %1, %cst {dimension_numbers = #tpu.dot_dimension_numbers<[1], [0], [0], [1], [0, 0, 1, 1], [], []>} : vector<32x576xf32>, vector<576x98xf32>, vector<32x98xf32> -> vector<32x98xf32>
    %c0_3 = arith.constant 0 : index
    %c0_4 = arith.constant 0 : index
    %3 = vector.load %arg3[%c0_3, %c0_4] : memref<32x1xf32, #tpu.memory_space<vmem>>, vector<32x1xf32>
    %4 = vector.broadcast %3 : vector<32x1xf32> to vector<32x98xf32>
    %5 = arith.addf %2, %4 : vector<32x98xf32>
    %cst_5 = arith.constant 0.000000e+00 : f32
    %6 = vector.broadcast %cst_5 : f32 to vector<32x98xf32>
    %7 = arith.maximumf %5, %6 : vector<32x98xf32>
    %c0_6 = arith.constant 0 : index
    %c0_7 = arith.constant 0 : index
    %8 = vector.load %arg4[%c0_6, %c0_7] : memref<32x98xf32, #tpu.memory_space<vmem>>, vector<32x98xf32>
    tpu.vector_store %arg4[%c0_6, %c0_7], %7 {strides = array<i32>} : memref<32x98xf32, #tpu.memory_space<vmem>>, vector<32x98xf32>,
    return
  }
  func.func @transform_0(%arg0: i32) -> (i32, i32) {
    %c0_i32 = arith.constant 0 : i32
    %c0_i32_0 = arith.constant 0 : i32
    %c0_i32_1 = arith.constant 0 : i32
    return %c0_i32, %c0_i32_0 : i32, i32
  }
  func.func @transform_1(%arg0: i32) -> (i32, i32) {
    %c0_i32 = arith.constant 0 : i32
    %c0_i32_0 = arith.constant 0 : i32
    %c0_i32_1 = arith.constant 0 : i32
    return %c0_i32, %c0_i32_0 : i32, i32
  }
  func.func @transform_2(%arg0: i32) -> (i32, i32) {
    %c0_i32 = arith.constant 0 : i32
    %c0_i32_0 = arith.constant 0 : i32
    %c0_i32_1 = arith.constant 0 : i32
    return %c0_i32, %c0_i32_0 : i32, i32
  }
  func.func @transform_3(%arg0: i32) -> (i32, i32) {
    %c0_i32 = arith.constant 0 : i32
    %c0_i32_0 = arith.constant 0 : i32
    %c0_i32_1 = arith.constant 0 : i32
    return %c0_i32, %c0_i32_0 : i32, i32
  }
}

module attributes {stable_mosaic.version = 11 : i64} {
  func.func @_head_kernel(%arg0: i32, %arg1: memref<2x1568xf32, #tpu.memory_space<vmem>>, %arg2: memref<1568x512xf32, #tpu.memory_space<vmem>>, %arg3: memref<1x512xf32, #tpu.memory_space<vmem>>, %arg4: memref<512x1xf32, #tpu.memory_space<vmem>>, %arg5: memref<1x1xf32, #tpu.memory_space<vmem>>, %arg6: memref<2x512xf32, #tpu.memory_space<vmem>>, %arg7: memref<2x1xf32, #tpu.memory_space<vmem>>) attributes {dimension_semantics = [#tpu.dimension_semantics<arbitrary>], iteration_bounds = array<i64: 1>, scalar_prefetch = 0 : i64, scratch_operands = 0 : i64, tpu.core_type = #tpu.core_type<tc>, window_params = [{pipeline_mode = #tpu.pipeline_mode<synchronous>, transform_indices = @transform_0, window_bounds = array<i64: 2, 1568>}, {pipeline_mode = #tpu.pipeline_mode<synchronous>, transform_indices = @transform_1, window_bounds = array<i64: 1568, 512>}, {pipeline_mode = #tpu.pipeline_mode<synchronous>, transform_indices = @transform_2, window_bounds = array<i64: 1, 512>}, {pipeline_mode = #tpu.pipeline_mode<synchronous>, transform_indices = @transform_3, window_bounds = array<i64: 512, 1>}, {pipeline_mode = #tpu.pipeline_mode<synchronous>, transform_indices = @transform_4, window_bounds = array<i64: 1, 1>}, {pipeline_mode = #tpu.pipeline_mode<synchronous>, transform_indices = @transform_5, window_bounds = array<i64: 2, 512>}, {pipeline_mode = #tpu.pipeline_mode<synchronous>, transform_indices = @transform_6, window_bounds = array<i64: 2, 1>}]} {
    %c0 = arith.constant 0 : index
    %c0_0 = arith.constant 0 : index
    %0 = vector.load %arg1[%c0, %c0_0] : memref<2x1568xf32, #tpu.memory_space<vmem>>, vector<2x1568xf32>
    %c0_1 = arith.constant 0 : index
    %c0_2 = arith.constant 0 : index
    %1 = vector.load %arg2[%c0_1, %c0_2] : memref<1568x512xf32, #tpu.memory_space<vmem>>, vector<1568x512xf32>
    %cst = arith.constant dense<0.000000e+00> : vector<2x512xf32>
    %2 = tpu.matmul %0, %1, %cst {dimension_numbers = #tpu.dot_dimension_numbers<[1], [0], [0], [1], [0, 0, 1, 1], [], []>} : vector<2x1568xf32>, vector<1568x512xf32>, vector<2x512xf32> -> vector<2x512xf32>
    %c0_3 = arith.constant 0 : index
    %c0_4 = arith.constant 0 : index
    %3 = vector.load %arg3[%c0_3, %c0_4] : memref<1x512xf32, #tpu.memory_space<vmem>>, vector<1x512xf32>
    %4 = vector.broadcast %3 : vector<1x512xf32> to vector<2x512xf32>
    %5 = arith.addf %2, %4 : vector<2x512xf32>
    %cst_5 = arith.constant 0.000000e+00 : f32
    %6 = vector.broadcast %cst_5 : f32 to vector<2x512xf32>
    %7 = arith.maximumf %5, %6 : vector<2x512xf32>
    %c0_6 = arith.constant 0 : index
    %c0_7 = arith.constant 0 : index
    %8 = vector.load %arg6[%c0_6, %c0_7] : memref<2x512xf32, #tpu.memory_space<vmem>>, vector<2x512xf32>
    tpu.vector_store %arg6[%c0_6, %c0_7], %7 {strides = array<i32>} : memref<2x512xf32, #tpu.memory_space<vmem>>, vector<2x512xf32>,
    %c0_8 = arith.constant 0 : index
    %c0_9 = arith.constant 0 : index
    %9 = vector.load %arg4[%c0_8, %c0_9] : memref<512x1xf32, #tpu.memory_space<vmem>>, vector<512x1xf32>
    %cst_10 = arith.constant dense<0.000000e+00> : vector<2x1xf32>
    %10 = tpu.matmul %7, %9, %cst_10 {dimension_numbers = #tpu.dot_dimension_numbers<[1], [0], [0], [1], [0, 0, 1, 1], [], []>} : vector<2x512xf32>, vector<512x1xf32>, vector<2x1xf32> -> vector<2x1xf32>
    %c0_11 = arith.constant 0 : index
    %c0_12 = arith.constant 0 : index
    %11 = vector.load %arg5[%c0_11, %c0_12] : memref<1x1xf32, #tpu.memory_space<vmem>>, vector<1x1xf32>
    %12 = vector.broadcast %11 : vector<1x1xf32> to vector<2x1xf32>
    %13 = arith.addf %10, %12 : vector<2x1xf32>
    %c0_13 = arith.constant 0 : index
    %c0_14 = arith.constant 0 : index
    %14 = vector.load %arg7[%c0_13, %c0_14] : memref<2x1xf32, #tpu.memory_space<vmem>>, vector<2x1xf32>
    tpu.vector_store %arg7[%c0_13, %c0_14], %13 {strides = array<i32>} : memref<2x1xf32, #tpu.memory_space<vmem>>, vector<2x1xf32>,
    return
  }
  func.func @transform_0(%arg0: i32) -> (i32, i32) {
    %c0_i32 = arith.constant 0 : i32
    %c0_i32_0 = arith.constant 0 : i32
    %c0_i32_1 = arith.constant 0 : i32
    return %c0_i32, %c0_i32_0 : i32, i32
  }
  func.func @transform_1(%arg0: i32) -> (i32, i32) {
    %c0_i32 = arith.constant 0 : i32
    %c0_i32_0 = arith.constant 0 : i32
    %c0_i32_1 = arith.constant 0 : i32
    return %c0_i32, %c0_i32_0 : i32, i32
  }
  func.func @transform_2(%arg0: i32) -> (i32, i32) {
    %c0_i32 = arith.constant 0 : i32
    %c0_i32_0 = arith.constant 0 : i32
    %c0_i32_1 = arith.constant 0 : i32
    return %c0_i32, %c0_i32_0 : i32, i32
  }
  func.func @transform_3(%arg0: i32) -> (i32, i32) {
    %c0_i32 = arith.constant 0 : i32
    %c0_i32_0 = arith.constant 0 : i32
    %c0_i32_1 = arith.constant 0 : i32
    return %c0_i32, %c0_i32_0 : i32, i32
  }
  func.func @transform_4(%arg0: i32) -> (i32, i32) {
    %c0_i32 = arith.constant 0 : i32
    %c0_i32_0 = arith.constant 0 : i32
    %c0_i32_1 = arith.constant 0 : i32
    return %c0_i32, %c0_i32_0 : i32, i32
  }
  func.func @transform_5(%arg0: i32) -> (i32, i32) {
    %c0_i32 = arith.constant 0 : i32
    %c0_i32_0 = arith.constant 0 : i32
    %c0_i32_1 = arith.constant 0 : i32
    return %c0_i32, %c0_i32_0 : i32, i32
  }
  func.func @transform_6(%arg0: i32) -> (i32, i32) {
    %c0_i32 = arith.constant 0 : i32
    %c0_i32_0 = arith.constant 0 : i32
    %c0_i32_1 = arith.constant 0 : i32
    return %c0_i32, %c0_i32_0 : i32, i32
  }
}

</mosaic_0001>

<bundles_post_ra>
// kernel: cnn_base_forward.4
= control target key start
LH: loop header
LB: loop body
LE: loop exit
PB: predicated region body
PF: predicated region fallthrough
CT: control target
= control target key end

     0   :  { %v1010_v51 = vmov 0   ;;  %vm712_vm0 = vcmask 261120   ;;  %s1911_s1 = inlined_call_operand.vmem [shape: f32[256,800], index: 1, kind: input, shape index: {}]   ;;  %s1912_s0 = inlined_call_operand.vmem [shape: f32[32,256], index: 0, kind: input, shape index: {}]   ;;  %s1913_s2 = inlined_call_operand.vmem [shape: f32[32,1], index: 2, kind: input, shape index: {}]   ;;  %s1914_s3 = inlined_call_operand.vmem [shape: f32[32,800], index: 3, kind: output, shape index: {}]  }
   0x1   :  { %v23_v0 = vld [vmem:[%s1911_s1 + $0x8] sm:$0xff]  ;;  %v30_v1 = vld [vmem:[%s1911_s1 + $0x40] sm:$0xff]  ;;  %v29_v4 = vld [vmem:[%s1911_s1 + $0x38] sm:$0xff]  ;;  %1008 = vset.pattern.permute.xlu0 %v1010_v51  ;;  %1009 = vset.pattern.permute.xlu1 %v1010_v51 }
   0x2   :  { %v22_v2 = vld [vmem:[%s1911_s1] sm:$0xff]  ;;  %v783_v3 = vpack.c.bf16 %v30_v1, %v23_v0  ;;  %v37_v5 = vld [vmem:[%s1911_s1 + $0x78] sm:$0xff]  ;;  %v44_v6 = vld [vmem:[%s1911_s1 + $0xb0] sm:$0xff] }
   0x3   :  { %v785_v7 = vpack.c.bf16 %v29_v4, %v22_v2  ;;  %v787_v8 = vpack.c.bf16 %v44_v6, %v37_v5  ;;  %v36_v9 = vld [vmem:[%s1911_s1 + $0x70] sm:$0xff]  ;;  %v43_v10 = vld [vmem:[%s1911_s1 + $0xa8] sm:$0xff]  ;;  %v58_v12 = vld [vmem:[%s1911_s1 + $0x120] sm:$0xff] }
   0x4   :  { %v51_v11 = vld [vmem:[%s1911_s1 + $0xe8] sm:$0xff]  ;;  %784 = vmatprep.subr.bf16.mxu0 %v783_v3  ;;  %v789_v13 = vpack.c.bf16 %v43_v10, %v36_v9  ;;  %v50_v15 = vld [vmem:[%s1911_s1 + $0xe0] sm:$0xff]  ;;  %v57_v16 = vld [vmem:[%s1911_s1 + $0x118] sm:$0xff] }
   0x5   :  { %786 = vmatpush1.bf16.msra.mxu0 %v785_v7  ;;  %v791_v14 = vpack.c.bf16 %v58_v12, %v51_v11  ;;  %v65_v17 = vld [vmem:[%s1911_s1 + $0x158] sm:$0xff]  ;;  %v72_v18 = vld [vmem:[%s1911_s1 + $0x190] sm:$0xff]  ;;  %v793_v19 = vpack.c.bf16 %v57_v16, %v50_v15  ;;  %v71_v21 = vld [vmem:[%s1911_s1 + $0x188] sm:$0xff] }
   0x6   :  { %788 = vmatprep.subr.bf16.mxu0 %v787_v8  ;;  %v64_v20 = vld [vmem:[%s1911_s1 + $0x150] sm:$0xff]  ;;  %v795_v22 = vpack.c.bf16 %v72_v18, %v65_v17  ;;  %v79_v23 = vld [vmem:[%s1911_s1 + $0x1c8] sm:$0xff]  ;;  %v25_v24 = vld [vmem:[%s1911_s1 + $0x18] sm:$0xff] }
   0x7   :  { %v32_v25 = vld [vmem:[%s1911_s1 + $0x50] sm:$0xff]  ;;  %v86_v26 = vld [vmem:[%s1911_s1 + $0x200] sm:$0xff]  ;;  %v31_v29 = vld [vmem:[%s1911_s1 + $0x48] sm:$0xff]  ;;  %v797_v31 = vpack.c.bf16 %v71_v21, %v64_v20 }
   0x8   :  { %v847_v27 = vpack.c.bf16 %v32_v25, %v25_v24  ;;  %v24_v28 = vld [vmem:[%s1911_s1 + $0x10] sm:$0xff]  ;;  %v39_v32 = vld [vmem:[%s1911_s1 + $0x88] sm:$0xff]  ;;  %v46_v33 = vld [vmem:[%s1911_s1 + $0xc0] sm:$0xff]  ;;  %v799_v35 = vpack.c.bf16 %v86_v26, %v79_v23 }
   0x9   :  { %790 = vmatpush1.bf16.msra.mxu0 %v789_v13  ;;  %v849_v30 = vpack.c.bf16 %v31_v29, %v24_v28  ;;  %v38_v34 = vld [vmem:[%s1911_s1 + $0x80] sm:$0xff]  ;;  %v85_v37 = vld [vmem:[%s1911_s1 + $0x1f8] sm:$0xff]  ;;  %v851_v38 = vpack.c.bf16 %v46_v33, %v39_v32  ;;  %v100_v41 = vld [vmem:[%s1911_s1 + $0x270] sm:$0xff] }
   0xa   :  { %792 = vmatprep.subr.bf16.mxu0 %v791_v14  ;;  %848 = vmatprep.subr.bf16.mxu1 %v847_v27  ;;  %v78_v36 = vld [vmem:[%s1911_s1 + $0x1c0] sm:$0xff]  ;;  %v45_v39 = vld [vmem:[%s1911_s1 + $0xb8] sm:$0xff]  ;;  %v60_v44 = vld [vmem:[%s1911_s1 + $0x130] sm:$0xff] }
   0xb   :  { %850 = vmatpush1.bf16.msra.mxu1 %v849_v30  ;;  %v93_v40 = vld [vmem:[%s1911_s1 + $0x238] sm:$0xff]  ;;  %v853_v42 = vpack.c.bf16 %v45_v39, %v38_v34  ;;  %v52_v45 = vld [vmem:[%s1911_s1 + $0xf0] sm:$0xff]  ;;  %v59_v46 = vld [vmem:[%s1911_s1 + $0x128] sm:$0xff]  ;;  %v801_v47 = vpack.c.bf16 %v85_v37, %v78_v36 }
   0xc   :  { %v53_v43 = vld [vmem:[%s1911_s1 + $0xf8] sm:$0xff]  ;;  %852 = vmatprep.subr.bf16.mxu1 %v851_v38  ;;  %v92_v48 = vld [vmem:[%s1911_s1 + $0x230] sm:$0xff]  ;;  %v99_v49 = vld [vmem:[%s1911_s1 + $0x268] sm:$0xff]  ;;  %v803_v52 = vpack.c.bf16 %v100_v41, %v93_v40  ;;  %v857_v54 = vpack.c.bf16 %v59_v46, %v52_v45 }
   0xd   :  { %794 = vmatpush1.bf16.msra.mxu0 %v793_v19  ;;  %v855_v50 = vpack.c.bf16 %v60_v44, %v53_v43  ;;  %v107_v53 = vld [vmem:[%s1911_s1 + $0x2a8] sm:$0xff]  ;;  %v74_v56 = vld [vmem:[%s1911_s1 + $0x1a0] sm:$0xff]  ;;  %v73_v60 = vld [vmem:[%s1911_s1 + $0x198] sm:$0xff]  ;;  %v805_v61 = vpack.c.bf16 %v99_v49, %v92_v48 }
   0xe   :  { %796 = vmatprep.subr.bf16.mxu0 %v795_v22  ;;  %v67_v55 = vld [vmem:[%s1911_s1 + $0x168] sm:$0xff]  ;;  %v114_v57 = vld [vmem:[%s1911_s1 + $0x2e0] sm:$0xff]  ;;  %v81_v62 = vld [vmem:[%s1911_s1 + $0x1d8] sm:$0xff] }
   0xf   :  { %854 = vmatpush1.bf16.msra.mxu1 %v853_v42  ;;  %v859_v58 = vpack.c.bf16 %v74_v56, %v67_v55  ;;  %v66_v59 = vld [vmem:[%s1911_s1 + $0x160] sm:$0xff]  ;;  %v88_v63 = vld [vmem:[%s1911_s1 + $0x210] sm:$0xff]  ;;  %v807_v0 = vpack.c.bf16 %v114_v57, %v107_v53  ;;  %v113_v2 = vld [vmem:[%s1911_s1 + $0x2d8] sm:$0xff] }
  0x10   :  { %856 = vmatprep.subr.bf16.mxu1 %v855_v50  ;;  %v106_v1 = vld [vmem:[%s1911_s1 + $0x2a0] sm:$0xff]  ;;  %v121_v3 = vld [vmem:[%s1911_s1 + $0x318] sm:$0xff]  ;;  %v861_v4 = vpack.c.bf16 %v73_v60, %v66_v59  ;;  %v128_v5 = vld [vmem:[%s1911_s1 + $0x350] sm:$0xff]  ;;  %v863_v6 = vpack.c.bf16 %v88_v63, %v81_v62 }
  0x11   :  { %798 = vmatpush1.bf16.msra.mxu0 %v797_v31  ;;  %v80_v7 = vld [vmem:[%s1911_s1 + $0x1d0] sm:$0xff]  ;;  %v87_v8 = vld [vmem:[%s1911_s1 + $0x208] sm:$0xff]  ;;  %v102_v10 = vld [vmem:[%s1911_s1 + $0x280] sm:$0xff]  ;;  %v809_v11 = vpack.c.bf16 %v113_v2, %v106_v1  ;;  %v811_v12 = vpack.c.bf16 %v128_v5, %v121_v3 }
  0x12   :  { %800 = vmatprep.subr.bf16.mxu0 %v799_v35  ;;  %v95_v9 = vld [vmem:[%s1911_s1 + $0x248] sm:$0xff]  ;;  %v120_v13 = vld [vmem:[%s1911_s1 + $0x310] sm:$0xff]  ;;  %v865_v16 = vpack.c.bf16 %v87_v8, %v80_v7  ;;  %v142_v17 = vld [vmem:[%s1911_s1 + $0x3c0] sm:$0xff] }
  0x13   :  { %858 = vmatpush1.bf16.msra.mxu1 %v857_v54  ;;  %v127_v14 = vld [vmem:[%s1911_s1 + $0x348] sm:$0xff]  ;;  %v867_v18 = vpack.c.bf16 %v102_v10, %v95_v9  ;;  %v94_v19 = vld [vmem:[%s1911_s1 + $0x240] sm:$0xff]  ;;  %v101_v20 = vld [vmem:[%s1911_s1 + $0x278] sm:$0xff] }
  0x14   :  { %860 = vmatprep.subr.bf16.mxu1 %v859_v58  ;;  %v135_v15 = vld [vmem:[%s1911_s1 + $0x388] sm:$0xff]  ;;  %v109_v21 = vld [vmem:[%s1911_s1 + $0x2b8] sm:$0xff]  ;;  %v116_v22 = vld [vmem:[%s1911_s1 + $0x2f0] sm:$0xff]  ;;  %v813_v23 = vpack.c.bf16 %v127_v14, %v120_v13  ;;  %v869_v28 = vpack.c.bf16 %v101_v20, %v94_v19 }
  0x15   :  { %802 = vmatpush1.bf16.msra.mxu0 %v801_v47  ;;  %v815_v24 = vpack.c.bf16 %v142_v17, %v135_v15  ;;  %v134_v25 = vld [vmem:[%s1911_s1 + $0x380] sm:$0xff]  ;;  %v141_v26 = vld [vmem:[%s1911_s1 + $0x3b8] sm:$0xff]  ;;  %v156_v29 = vld [vmem:[%s1911_s1 + $0x430] sm:$0xff]  ;;  %v871_v30 = vpack.c.bf16 %v116_v22, %v109_v21 }
  0x16   :  { %804 = vmatprep.subr.bf16.mxu0 %v803_v52  ;;  %v149_v27 = vld [vmem:[%s1911_s1 + $0x3f8] sm:$0xff]  ;;  %v108_v31 = vld [vmem:[%s1911_s1 + $0x2b0] sm:$0xff]  ;;  %v115_v32 = vld [vmem:[%s1911_s1 + $0x2e8] sm:$0xff]  ;;  %v817_v35 = vpack.c.bf16 %v141_v26, %v134_v25 }
  0x17   :  { %862 = vmatpush1.bf16.msra.mxu1 %v861_v4  ;;  %v123_v33 = vld [vmem:[%s1911_s1 + $0x328] sm:$0xff]  ;;  %v130_v34 = vld [vmem:[%s1911_s1 + $0x360] sm:$0xff]  ;;  %v148_v36 = vld [vmem:[%s1911_s1 + $0x3f0] sm:$0xff]  ;;  %v819_v37 = vpack.c.bf16 %v156_v29, %v149_v27  ;;  %v873_v41 = vpack.c.bf16 %v115_v32, %v108_v31 }
  0x18   :  { %864 = vmatprep.subr.bf16.mxu1 %v863_v6  ;;  %v155_v38 = vld [vmem:[%s1911_s1 + $0x428] sm:$0xff]  ;;  %v170_v40 = vld [vmem:[%s1911_s1 + $0x4a0] sm:$0xff]  ;;  %v875_v42 = vpack.c.bf16 %v130_v34, %v123_v33  ;;  %v129_v44 = vld [vmem:[%s1911_s1 + $0x358] sm:$0xff] }
  0x19   :  { %806 = vmatpush1.bf16.msra.mxu0 %v805_v61  ;;  %v163_v39 = vld [vmem:[%s1911_s1 + $0x468] sm:$0xff]  ;;  %v122_v43 = vld [vmem:[%s1911_s1 + $0x320] sm:$0xff]  ;;  %v137_v46 = vld [vmem:[%s1911_s1 + $0x398] sm:$0xff]  ;;  %v821_v48 = vpack.c.bf16 %v155_v38, %v148_v36 }
  0x1a   :  { %808 = vmatprep.subr.bf16.mxu0 %v807_v0  ;;  %v1256_v45 = vld [vmem:[%s1912_s0 + $0x8] sm:$0xff]  ;;  %v144_v47 = vld [vmem:[%s1911_s1 + $0x3d0] sm:$0xff]  ;;  %v823_v49 = vpack.c.bf16 %v170_v40, %v163_v39  ;;  %v162_v50 = vld [vmem:[%s1911_s1 + $0x460] sm:$0xff]  ;;  %v877_v53 = vpack.c.bf16 %v129_v44, %v122_v43 }
  0x1b   :  { %866 = vmatpush1.bf16.msra.mxu1 %v865_v16  ;;  %310 = vmatprep.mubr.f32.mxu0 %v1256_v45  ;;  %v169_v51 = vld [vmem:[%s1911_s1 + $0x498] sm:$0xff]  ;;  %v184_v54 = vld [vmem:[%s1911_s1 + $0x510] sm:$0xff]  ;;  %v879_v55 = vpack.c.bf16 %v144_v47, %v137_v46  ;;  %v143_v57 = vld [vmem:[%s1911_s1 + $0x3c8] sm:$0xff] }
  0x1c   :  { %868 = vmatprep.subr.bf16.mxu1 %v867_v18  ;;  %399 = vmatprep.mubr.f32.mxu1 %v1256_v45  ;;  %v177_v52 = vld [vmem:[%s1911_s1 + $0x4d8] sm:$0xff]  ;;  %v136_v56 = vld [vmem:[%s1911_s1 + $0x390] sm:$0xff]  ;;  %v151_v58 = vld [vmem:[%s1911_s1 + $0x408] sm:$0xff]  ;;  %v825_v60 = vpack.c.bf16 %v169_v51, %v162_v50 }
  0x1d   :  { %810 = vmatpush1.bf16.msra.mxu0 %v809_v11  ;;  %v158_v59 = vld [vmem:[%s1911_s1 + $0x440] sm:$0xff]  ;;  %v827_v61 = vpack.c.bf16 %v184_v54, %v177_v52  ;;  %v176_v62 = vld [vmem:[%s1911_s1 + $0x4d0] sm:$0xff]  ;;  %v183_v63 = vld [vmem:[%s1911_s1 + $0x508] sm:$0xff]  ;;  %v881_v1 = vpack.c.bf16 %v143_v57, %v136_v56 }
  0x1e   :  { %812 = vmatprep.subr.bf16.mxu0 %v811_v12  ;;  %v191_v0 = vld [vmem:[%s1911_s1 + $0x548] sm:$0xff]  ;;  %v198_v2 = vld [vmem:[%s1911_s1 + $0x580] sm:$0xff]  ;;  %v883_v3 = vpack.c.bf16 %v158_v59, %v151_v58  ;;  %v157_v5 = vld [vmem:[%s1911_s1 + $0x438] sm:$0xff]  ;;  %v829_v8 = vpack.c.bf16 %v183_v63, %v176_v62 }
  0x1f   :  { %870 = vmatpush1.bf16.msra.mxu1 %v869_v28  ;;  %v150_v4 = vld [vmem:[%s1911_s1 + $0x400] sm:$0xff]  ;;  %v165_v6 = vld [vmem:[%s1911_s1 + $0x478] sm:$0xff]  ;;  %v172_v7 = vld [vmem:[%s1911_s1 + $0x4b0] sm:$0xff]  ;;  %v831_v9 = vpack.c.bf16 %v198_v2, %v191_v0 }
  0x20   :  { %872 = vmatprep.subr.bf16.mxu1 %v871_v30  ;;  %v190_v10 = vld [vmem:[%s1911_s1 + $0x540] sm:$0xff]  ;;  %v197_v11 = vld [vmem:[%s1911_s1 + $0x578] sm:$0xff]  ;;  %v885_v13 = vpack.c.bf16 %v157_v5, %v150_v4  ;;  %v212_v14 = vld [vmem:[%s1911_s1 + $0x5f0] sm:$0xff]  ;;  %v887_v15 = vpack.c.bf16 %v172_v7, %v165_v6 }
  0x21   :  { %814 = vmatpush1.bf16.msra.mxu0 %v813_v23  ;;  %v205_v12 = vld [vmem:[%s1911_s1 + $0x5b8] sm:$0xff]  ;;  %v164_v16 = vld [vmem:[%s1911_s1 + $0x470] sm:$0xff]  ;;  %v171_v17 = vld [vmem:[%s1911_s1 + $0x4a8] sm:$0xff]  ;;  %v833_v20 = vpack.c.bf16 %v197_v11, %v190_v10 }
  0x22   :  { %816 = vmatprep.subr.bf16.mxu0 %v815_v24  ;;  %v179_v18 = vld [vmem:[%s1911_s1 + $0x4e8] sm:$0xff]  ;;  %v186_v19 = vld [vmem:[%s1911_s1 + $0x520] sm:$0xff]  ;;  %v835_v21 = vpack.c.bf16 %v212_v14, %v205_v12  ;;  %v204_v22 = vld [vmem:[%s1911_s1 + $0x5b0] sm:$0xff]  ;;  %v889_v25 = vpack.c.bf16 %v171_v17, %v164_v16 }
  0x23   :  { %874 = vmatpush1.bf16.msra.mxu1 %v873_v41  ;;  %v211_v23 = vld [vmem:[%s1911_s1 + $0x5e8] sm:$0xff]  ;;  %v226_v26 = vld [vmem:[%s1911_s1 + $0x660] sm:$0xff]  ;;  %v891_v27 = vpack.c.bf16 %v186_v19, %v179_v18  ;;  %v185_v29 = vld [vmem:[%s1911_s1 + $0x518] sm:$0xff] }
  0x24   :  { %876 = vmatprep.subr.bf16.mxu1 %v875_v42  ;;  %v219_v24 = vld [vmem:[%s1911_s1 + $0x628] sm:$0xff]  ;;  %v178_v28 = vld [vmem:[%s1911_s1 + $0x4e0] sm:$0xff]  ;;  %v193_v30 = vld [vmem:[%s1911_s1 + $0x558] sm:$0xff]  ;;  %v837_v32 = vpack.c.bf16 %v211_v23, %v204_v22 }
  0x25   :  { %818 = vmatpush1.bf16.msra.mxu0 %v817_v35  ;;  %v200_v31 = vld [vmem:[%s1911_s1 + $0x590] sm:$0xff]  ;;  %v839_v33 = vpack.c.bf16 %v226_v26, %v219_v24  ;;  %v218_v34 = vld [vmem:[%s1911_s1 + $0x620] sm:$0xff]  ;;  %v225_v35 = vld [vmem:[%s1911_s1 + $0x658] sm:$0xff] }
  0x26   :  { %820 = vmatprep.subr.bf16.mxu0 %v819_v37  ;;  %v233_v36 = vld [vmem:[%s1911_s1 + $0x698] sm:$0xff]  ;;  %v893_v37 = vpack.c.bf16 %v185_v29, %v178_v28  ;;  %v240_v38 = vld [vmem:[%s1911_s1 + $0x6d0] sm:$0xff]  ;;  %v895_v39 = vpack.c.bf16 %v200_v31, %v193_v30  ;;  %v199_v41 = vld [vmem:[%s1911_s1 + $0x588] sm:$0xff]  ;;  %v841_v44 = vpack.c.bf16 %v225_v35, %v218_v34 }
  0x27   :  { %878 = vmatpush1.bf16.msra.mxu1 %v877_v53  ;;  %v192_v40 = vld [vmem:[%s1911_s1 + $0x550] sm:$0xff]  ;;  %v207_v42 = vld [vmem:[%s1911_s1 + $0x5c8] sm:$0xff]  ;;  %v214_v43 = vld [vmem:[%s1911_s1 + $0x600] sm:$0xff]  ;;  %v843_v46 = vpack.c.bf16 %v240_v38, %v233_v36 }
  0x28   :  { %880 = vmatprep.subr.bf16.mxu1 %v879_v55  ;;  %v232_v47 = vld [vmem:[%s1911_s1 + $0x690] sm:$0xff]  ;;  %v897_v50 = vpack.c.bf16 %v199_v41, %v192_v40  ;;  %v34_v51 = vld [vmem:[%s1911_s1 + $0x60] sm:$0xff]  ;;  %v899_v52 = vpack.c.bf16 %v214_v43, %v207_v42  ;;  %v213_v54 = vld [vmem:[%s1911_s1 + $0x5f8] sm:$0xff] }
  0x29   :  { %822 = vmatpush1.bf16.msra.mxu0 %v821_v48  ;;  %v239_v48 = vld [vmem:[%s1911_s1 + $0x6c8] sm:$0xff]  ;;  %v206_v53 = vld [vmem:[%s1911_s1 + $0x5c0] sm:$0xff]  ;;  %v221_v55 = vld [vmem:[%s1911_s1 + $0x638] sm:$0xff] }
  0x2a   :  { %824 = vmatprep.subr.bf16.mxu0 %v823_v49  ;;  %v27_v49 = vld [vmem:[%s1911_s1 + $0x28] sm:$0xff]  ;;  %v228_v56 = vld [vmem:[%s1911_s1 + $0x670] sm:$0xff]  ;;  %v845_v57 = vpack.c.bf16 %v239_v48, %v232_v47  ;;  %v26_v59 = vld [vmem:[%s1911_s1 + $0x20] sm:$0xff]  ;;  %v901_v62 = vpack.c.bf16 %v213_v54, %v206_v53 }
  0x2b   :  { %882 = vmatpush1.bf16.msra.mxu1 %v881_v1  ;;  %v911_v58 = vpack.c.bf16 %v34_v51, %v27_v49  ;;  %v48_v63 = vld [vmem:[%s1911_s1 + $0xd0] sm:$0xff]  ;;  %v903_v0 = vpack.c.bf16 %v228_v56, %v221_v55  ;;  %v227_v2 = vld [vmem:[%s1911_s1 + $0x668] sm:$0xff]  ;;  %v242_v4 = vld [vmem:[%s1911_s1 + $0x6e0] sm:$0xff] }
  0x2c   :  { %884 = vmatprep.subr.bf16.mxu1 %v883_v3  ;;  %v220_v1 = vld [vmem:[%s1911_s1 + $0x630] sm:$0xff]  ;;  %v235_v3 = vld [vmem:[%s1911_s1 + $0x6a8] sm:$0xff]  ;;  %v1437_v5 = vld [vmem:[%s1912_s0] sm:$0xff] }
  0x2d   :  { %826 = vmatpush1.bf16.msra.mxu0 %v825_v60  ;;  %v33_v60 = vld [vmem:[%s1911_s1 + $0x58] sm:$0xff]  ;;  %v55_v10 = vld [vmem:[%s1911_s1 + $0x108] sm:$0xff]  ;;  %v905_v11 = vpack.c.bf16 %v227_v2, %v220_v1  ;;  %v62_v12 = vld [vmem:[%s1911_s1 + $0x140] sm:$0xff] }
  0x2e   :  { %828 = vmatprep.subr.bf16.mxu0 %v827_v61  ;;  %v41_v61 = vld [vmem:[%s1911_s1 + $0x98] sm:$0xff]  ;;  %v913_v6 = vpack.c.bf16 %v33_v60, %v26_v59  ;;  %v234_v14 = vld [vmem:[%s1911_s1 + $0x6a0] sm:$0xff]  ;;  %v140_v16 = vld [vmem:[%s1911_s1 + $0x3b0] sm:$0xff] }
  0x2f   :  { %886 = vmatpush1.bf16.msra.mxu1 %v885_v13  ;;  %v915_v7 = vpack.c.bf16 %v48_v63, %v41_v61  ;;  %v907_v13 = vpack.c.bf16 %v242_v4, %v235_v3  ;;  %v147_v17 = vld [vmem:[%s1911_s1 + $0x3e8] sm:$0xff]  ;;  %v1467_v18 = vld [vmem:[%s1912_s0 + $0x18] sm:$0xff]  ;;  %v76_v24 = vld [vmem:[%s1911_s1 + $0x1b0] sm:$0xff] }
  0x30   :  { %888 = vmatprep.subr.bf16.mxu1 %v887_v15  ;;  %v241_v15 = vld [vmem:[%s1911_s1 + $0x6d8] sm:$0xff]  ;;  %v975_v26 = vpack.c.bf16 %v147_v17, %v140_v16  ;;  %v35_v28 = vld [vmem:[%s1911_s1 + $0x68] sm:$0xff]  ;;  %v1491_v29 = vld [vmem:[%s1912_s0 + $0x10] sm:$0xff] }
  0x31   :  { %830 = vmatpush1.bf16.msra.mxu0 %v829_v8  ;;  %v40_v8 = vld [vmem:[%s1911_s1 + $0x90] sm:$0xff]  ;;  %v61_v22 = vld [vmem:[%s1911_s1 + $0x138] sm:$0xff]  ;;  %v154_v30 = vld [vmem:[%s1911_s1 + $0x420] sm:$0xff] }
  0x32   :  { %832 = vmatprep.subr.bf16.mxu0 %v831_v9  ;;  %v47_v9 = vld [vmem:[%s1911_s1 + $0xc8] sm:$0xff]  ;;  %v69_v23 = vld [vmem:[%s1911_s1 + $0x178] sm:$0xff]  ;;  %v68_v34 = vld [vmem:[%s1911_s1 + $0x170] sm:$0xff] }
  0x33   :  { %890 = vmatpush1.bf16.msra.mxu1 %v889_v25  ;;  %v917_v19 = vpack.c.bf16 %v47_v9, %v40_v8  ;;  %v909_v25 = vpack.c.bf16 %v241_v15, %v234_v14  ;;  %v161_v31 = vld [vmem:[%s1911_s1 + $0x458] sm:$0xff]  ;;  %v923_v35 = vpack.c.bf16 %v76_v24, %v69_v23  ;;  %v75_v36 = vld [vmem:[%s1911_s1 + $0x1a8] sm:$0xff]  ;;  %v90_v38 = vld [vmem:[%s1911_s1 + $0x220] sm:$0xff] }
  0x34   :  { %892 = vmatprep.subr.bf16.mxu1 %v891_v27  ;;  %v28_v27 = vld [vmem:[%s1911_s1 + $0x30] sm:$0xff]  ;;  %v979_v40 = vpack.c.bf16 %v161_v31, %v154_v30  ;;  %v42_v41 = vld [vmem:[%s1911_s1 + $0xa0] sm:$0xff]  ;;  %v49_v42 = vld [vmem:[%s1911_s1 + $0xd8] sm:$0xff]  ;;  %v925_v47 = vpack.c.bf16 %v75_v36, %v68_v34 }
  0x35   :  { %834 = vmatpush1.bf16.msra.mxu0 %v833_v20  ;;  %v54_v20 = vld [vmem:[%s1911_s1 + $0x100] sm:$0xff]  ;;  %v89_v49 = vld [vmem:[%s1911_s1 + $0x218] sm:$0xff]  ;;  %v981_v53 = vpack.c.bf16 %v49_v42, %v42_v41  ;;  %v56_v56 = vld [vmem:[%s1911_s1 + $0x110] sm:$0xff] }
  0x36   :  { %836 = vmatprep.subr.bf16.mxu0 %v835_v21  ;;  %v919_v21 = vpack.c.bf16 %v62_v12, %v55_v10  ;;  %v1527_v43 = vld [vmem:[%s1912_s0 + $0x20] sm:$0xff]  ;;  %v97_v51 = vld [vmem:[%s1911_s1 + $0x258] sm:$0xff]  ;;  %v627_v63 = vld [vmem:[%s1913_s2 + $0x8] sm:$0xff] }
  0x37   :  { %894 = vmatpush1.bf16.msra.mxu1 %v893_v37  ;;  %v83_v37 = vld [vmem:[%s1911_s1 + $0x1e8] sm:$0xff]  ;;  %v82_v48 = vld [vmem:[%s1911_s1 + $0x1e0] sm:$0xff]  ;;  %v189_v60 = vld [vmem:[%s1911_s1 + $0x538] sm:$0xff] }
  0x38   :  { %896 = vmatprep.subr.bf16.mxu1 %v895_v39  ;;  %v977_v39 = vpack.c.bf16 %v35_v28, %v28_v27  ;;  %v626_v54 = vld [vmem:[%s1913_s2] sm:$0xff]  ;;  %v929_v61 = vpack.c.bf16 %v89_v49, %v82_v48  ;;  %v103_v1 = vld [vmem:[%s1911_s1 + $0x288] sm:$0xff]  ;;  %v77_v8 = vld [vmem:[%s1911_s1 + $0x1b8] sm:$0xff] }
  0x39   :  { %838 = vmatpush1.bf16.msra.mxu0 %v837_v32  ;;  %v1502_v32 = vld [vmem:[%s1912_s0 + $0x28] sm:$0xff]  ;;  %v182_v59 = vld [vmem:[%s1911_s1 + $0x500] sm:$0xff]  ;;  %632 = vperm.xlu0 %1008, %v626_v54   ;;  %v1597_v9 = vld [vmem:[%s1912_s0 + $0x30] sm:$0xff] }
  0x3a   :  { %840 = vmatprep.subr.bf16.mxu0 %v839_v33  ;;  %v921_v33 = vpack.c.bf16 %v61_v22, %v54_v20  ;;  %v111_v2 = vld [vmem:[%s1911_s1 + $0x2c8] sm:$0xff]  ;;  %v118_v3 = vld [vmem:[%s1911_s1 + $0x300] sm:$0xff]  ;;  %v196_v10 = vld [vmem:[%s1911_s1 + $0x570] sm:$0xff] }
  0x3b   :  { %898 = vmatpush1.bf16.msra.mxu1 %v897_v50  ;;  %v927_v50 = vpack.c.bf16 %v90_v38, %v83_v37  ;;  %v935_v14 = vpack.c.bf16 %v118_v3, %v111_v2  ;;  %v110_v15 = vld [vmem:[%s1911_s1 + $0x2c0] sm:$0xff]  ;;  %v117_v16 = vld [vmem:[%s1911_s1 + $0x2f8] sm:$0xff]  ;;  %v132_v20 = vld [vmem:[%s1911_s1 + $0x370] sm:$0xff] }
  0x3c   :  { %900 = vmatprep.subr.bf16.mxu1 %v899_v52  ;;  %v104_v52 = vld [vmem:[%s1911_s1 + $0x290] sm:$0xff]  ;;  %v125_v17 = vld [vmem:[%s1911_s1 + $0x338] sm:$0xff]  ;;  %v91_v23 = vld [vmem:[%s1911_s1 + $0x228] sm:$0xff] }
  0x3d   :  { %842 = vmatpush1.bf16.msra.mxu0 %v841_v44  ;;  %v168_v44 = vld [vmem:[%s1911_s1 + $0x490] sm:$0xff]  ;;  %637 = vperm.xlu0 %1008, %v627_v63   ;;  %v210_v24 = vld [vmem:[%s1911_s1 + $0x5e0] sm:$0xff]  ;;  %v629_v27 = vld [vmem:[%s1913_s2 + $0x18] sm:$0xff]  ;;  %v939_v28 = vpack.c.bf16 %v132_v20, %v125_v17 }
  0x3e   :  { %844 = vmatprep.subr.bf16.mxu0 %v843_v46  ;;  %v175_v46 = vld [vmem:[%s1911_s1 + $0x4c8] sm:$0xff]  ;;  %v84_v22 = vld [vmem:[%s1911_s1 + $0x1f0] sm:$0xff]  ;;  %v98_v37 = vld [vmem:[%s1911_s1 + $0x260] sm:$0xff] }
  0x3f   :  { %902 = vmatpush1.bf16.msra.mxu1 %v901_v62  ;;  %v983_v55 = vpack.c.bf16 %v175_v46, %v168_v44  ;;  %v96_v62 = vld [vmem:[%s1911_s1 + $0x250] sm:$0xff]  ;;  %v131_v31 = vld [vmem:[%s1911_s1 + $0x368] sm:$0xff]  ;;  %v993_v34 = vpack.c.bf16 %v91_v23, %v84_v22  ;;  %v105_v38 = vld [vmem:[%s1911_s1 + $0x298] sm:$0xff] }
  0x40   :  { %904 = vmatprep.subr.bf16.mxu1 %v903_v0  ;;  %v931_v0 = vpack.c.bf16 %v104_v52, %v97_v51  ;;  %v933_v12 = vpack.c.bf16 %v103_v1, %v96_v62  ;;  %v124_v30 = vld [vmem:[%s1911_s1 + $0x330] sm:$0xff]  ;;  %v138_v44 = vld [vmem:[%s1911_s1 + $0x3a0] sm:$0xff]  ;;  %v153_v46 = vld [vmem:[%s1911_s1 + $0x418] sm:$0xff] }
  0x41   :  { %846 = vmatpush1.bf16.msra.mxu0 %v845_v57  ;;  %v63_v57 = vld [vmem:[%s1911_s1 + $0x148] sm:$0xff]  ;;  %v941_v41 = vpack.c.bf16 %v131_v31, %v124_v30  ;;  %v160_v48 = vld [vmem:[%s1911_s1 + $0x450] sm:$0xff]  ;;  %v238_v52 = vld [vmem:[%s1911_s1 + $0x6c0] sm:$0xff] }
  0x42   :  { %912 = vmatprep.subr.bf16.mxu0 %v911_v58  ;;  %v1562_v58 = vld [vmem:[%s1912_s0 + $0x38] sm:$0xff]  ;;  %v985_v4 = vpack.c.bf16 %v63_v57, %v56_v56  ;;  %v119_v51 = vld [vmem:[%s1911_s1 + $0x308] sm:$0xff]  ;;  %v152_v56 = vld [vmem:[%s1911_s1 + $0x410] sm:$0xff] }
  0x43   :  { %906 = vmatpush1.bf16.msra.mxu1 %v905_v11  ;;  %v203_v11 = vld [vmem:[%s1911_s1 + $0x5a8] sm:$0xff]  ;;  %v126_v63 = vld [vmem:[%s1911_s1 + $0x340] sm:$0xff]  ;;  %v201_v20 = vld [vmem:[%s1911_s1 + $0x598] sm:$0xff] }
  0x44   :  { %311 = vmatmul.mubr.f32.vlgmr.msra.gmra.mrb[0].mxu0 %v1437_v5  ;;  %908 = vmatprep.subr.bf16.mxu1 %v907_v13  ;;  %v628_v13 = vld [vmem:[%s1913_s2 + $0x10] sm:$0xff]  ;;  %v159_v57 = vld [vmem:[%s1911_s1 + $0x448] sm:$0xff]  ;;  %v166_v3 = vld [vmem:[%s1911_s1 + $0x480] sm:$0xff] }
  0x45   :  { %914 = vmatpush1.bf16.msra.mxu0 %v913_v6  ;;  %316 = vmatprep.mubr.f32.mxu0 %v1467_v18  ;;  %v987_v6 = vpack.c.bf16 %v189_v60, %v182_v59  ;;  %v167_v59 = vld [vmem:[%s1911_s1 + $0x488] sm:$0xff]  ;;  %v949_v1 = vpack.c.bf16 %v159_v57, %v152_v56  ;;  %v216_v22 = vld [vmem:[%s1911_s1 + $0x610] sm:$0xff] }
  0x46   :  { %916 = vmatprep.subr.bf16.mxu0 %v915_v7  ;;  %v70_v7 = vld [vmem:[%s1911_s1 + $0x180] sm:$0xff]  ;;  %642 = vperm.xlu1 %1009, %v628_v13   ;;  %v187_v13 = vld [vmem:[%s1911_s1 + $0x528] sm:$0xff] }
  0x47   :  { %910 = vmatpush1.bf16.msra.mxu1 %v909_v25  ;;  %v217_v25 = vld [vmem:[%s1911_s1 + $0x618] sm:$0xff] }
  0x48   :  { %317 = vmatmul.mubr.f32.gmra.mrb[2].mxu0 %v1491_v29  ;;  %976 = vmatprep.subr.bf16.mxu1 %v975_v26  ;;  %v937_v26 = vpack.c.bf16 %v117_v16, %v110_v15  ;;  %v995_v36 = vpack.c.bf16 %v217_v25, %v210_v24  ;;  %v202_v15 = vld [vmem:[%s1911_s1 + $0x5a0] sm:$0xff]  ;;  %v208_v25 = vld [vmem:[%s1911_s1 + $0x5d0] sm:$0xff] }
  0x49   :  { %918 = vmatpush1.bf16.msra.mxu0 %v917_v19  ;;  %322 = vmatprep.mubr.f32.mxu0 %v1502_v32  ;;  %v989_v19 = vpack.c.bf16 %v77_v8, %v70_v7  ;;  %v181_v7 = vld [vmem:[%s1911_s1 + $0x4f8] sm:$0xff]  ;;  %v188_v8 = vld [vmem:[%s1911_s1 + $0x530] sm:$0xff] }
  0x4a   :  { %920 = vmatprep.subr.bf16.mxu0 %v919_v21  ;;  %400 = vmatmul.mubr.f32.vlgmr.msra.gmra.mrb[0].mxu1 %v1437_v5  ;;  %v991_v21 = vpack.c.bf16 %v203_v11, %v196_v10  ;;  %v955_v11 = vpack.c.bf16 %v188_v8, %v181_v7 }
  0x4b   :  { %978 = vmatpush3.bf16.msra.mxu1 %v977_v39  ;;  %405 = vmatprep.mubr.f32.mxu1 %v1467_v18  ;;  %v224_v39 = vld [vmem:[%s1911_s1 + $0x650] sm:$0xff] }
  0x4c   :  { %323 = vmatmul.mubr.f32.gmra.mrb[4].mxu0 %v1527_v43  ;;  %980 = vmatprep.subr.bf16.mxu1 %v979_v40  ;;  %v231_v40 = vld [vmem:[%s1911_s1 + $0x688] sm:$0xff] }
  0x4d   :  { %922 = vmatpush1.bf16.msra.mxu0 %v921_v33  ;;  %328 = vmatprep.mubr.f32.mxu0 %v1562_v58  ;;  %v139_v33 = vld [vmem:[%s1911_s1 + $0x3a8] sm:$0xff]  ;;  %v999_v49 = vpack.c.bf16 %v231_v40, %v224_v39  ;;  %v236_v39 = vld [vmem:[%s1911_s1 + $0x6b0] sm:$0xff] }
  0x4e   :  { %924 = vmatprep.subr.bf16.mxu0 %v923_v35  ;;  %406 = vmatmul.mubr.f32.gmra.mrb[2].mxu1 %v1491_v29  ;;  %v146_v35 = vld [vmem:[%s1911_s1 + $0x3e0] sm:$0xff]  ;;  %v243_v40 = vld [vmem:[%s1911_s1 + $0x6e8] sm:$0xff] }
  0x4f   :  { %982 = vmatpush3.bf16.msra.mxu1 %v981_v53  ;;  %411 = vmatprep.mubr.f32.mxu1 %v1502_v32  ;;  %v943_v42 = vpack.c.bf16 %v146_v35, %v139_v33  ;;  %v245_v53 = vld [vmem:[%s1911_s1 + $0x6f8] sm:$0xff]  ;;  %v222_v33 = vld [vmem:[%s1911_s1 + $0x640] sm:$0xff] }
  0x50   :  { %984 = vmatprep.subr.bf16.mxu1 %v983_v55  ;;  %329 = vmatmul.mubr.f32.gmra.mrb[6].mxu0 %v1597_v9  ;;  %v947_v55 = vpack.c.bf16 %v160_v48, %v153_v46  ;;  %v1003_v62 = vpack.c.bf16 %v245_v53, %v238_v52  ;;  %v237_v35 = vld [vmem:[%s1911_s1 + $0x6b8] sm:$0xff] }
  0x51   :  { %926 = vmatpush1.bf16.msra.mxu0 %v925_v47  ;;  %488 = vmatprep.mubr.f32.mxu0 %v1256_v45  ;;  %v997_v47 = vpack.c.bf16 %v105_v38, %v98_v37 }
  0x52   :  { %928 = vmatprep.subr.bf16.mxu0 %v927_v50  ;;  %412 = vmatmul.mubr.f32.gmra.mrb[4].mxu1 %v1527_v43  ;;  %v112_v50 = vld [vmem:[%s1911_s1 + $0x2d0] sm:$0xff] }
  0x53   :  { %986 = vmatpush3.bf16.msra.mxu1 %v985_v4  ;;  %417 = vmatprep.mubr.f32.mxu1 %v1562_v58  ;;  %v1001_v60 = vpack.c.bf16 %v119_v51, %v112_v50  ;;  %v173_v4 = vld [vmem:[%s1911_s1 + $0x4b8] sm:$0xff] }
  0x54   :  { %988 = vmatprep.subr.bf16.mxu1 %v987_v6  ;;  %647 = vperm.xlu1 %1009, %v629_v27   ;;  %v953_v10 = vpack.c.bf16 %v173_v4, %v166_v3  ;;  %v223_v27 = vld [vmem:[%s1911_s1 + $0x648] sm:$0xff] }
  0x55   :  { %930 = vmatpush1.bf16.msra.mxu0 %v929_v61  ;;  %v174_v61 = vld [vmem:[%s1911_s1 + $0x4c0] sm:$0xff] }
  0x56   :  { %932 = vmatprep.subr.bf16.mxu0 %v931_v0  ;;  %418 = vmatmul.mubr.f32.gmra.mrb[6].mxu1 %v1597_v9  ;;  %v133_v0 = vld [vmem:[%s1911_s1 + $0x378] sm:$0xff]  ;;  %v951_v2 = vpack.c.bf16 %v174_v61, %v167_v59 }
  0x57   :  { %990 = vmatpush3.bf16.msra.mxu1 %v989_v19  ;;  %577 = vmatprep.mubr.f32.mxu1 %v1256_v45  ;;  %v145_v45 = vld [vmem:[%s1911_s1 + $0x3d8] sm:$0xff]  ;;  %v1005_v6 = vpack.c.bf16 %v133_v0, %v126_v63  ;;  %v194_v19 = vld [vmem:[%s1911_s1 + $0x560] sm:$0xff] }
  0x58   :  { %992 = vmatprep.subr.bf16.mxu1 %v991_v21  ;;  %v945_v54 = vpack.c.bf16 %v145_v45, %v138_v44  ;;  %v209_v21 = vld [vmem:[%s1911_s1 + $0x5d8] sm:$0xff]  ;;  %v961_v23 = vpack.c.bf16 %v201_v20, %v194_v19 }
  0x59   :  { %934 = vmatpush1.bf16.msra.mxu0 %v933_v12  ;;  %v180_v12 = vld [vmem:[%s1911_s1 + $0x4f0] sm:$0xff]  ;;  %v963_v24 = vpack.c.bf16 %v216_v22, %v209_v21 }
  0x5a   :  { %936 = vmatprep.subr.bf16.mxu0 %v935_v14  ;;  %v195_v14 = vld [vmem:[%s1911_s1 + $0x568] sm:$0xff]  ;;  %v957_v16 = vpack.c.bf16 %v187_v13, %v180_v12 }
  0x5b   :  { %994 = vmatpush3.bf16.msra.mxu1 %v993_v34  ;;  %v959_v17 = vpack.c.bf16 %v202_v15, %v195_v14  ;;  %v229_v34 = vld [vmem:[%s1911_s1 + $0x678] sm:$0xff] }
  0x5c   :  { %996 = vmatprep.subr.bf16.mxu1 %v995_v36  ;;  %v244_v36 = vld [vmem:[%s1911_s1 + $0x6f0] sm:$0xff]  ;;  %v969_v37 = vpack.c.bf16 %v229_v34, %v222_v33 }
  0x5d   :  { %938 = vmatpush1.bf16.msra.mxu0 %v937_v26  ;;  %v215_v26 = vld [vmem:[%s1911_s1 + $0x608] sm:$0xff]  ;;  %v971_v38 = vpack.c.bf16 %v244_v36, %v237_v35 }
  0x5e   :  { %940 = vmatprep.subr.bf16.mxu0 %v939_v28  ;;  %v230_v28 = vld [vmem:[%s1911_s1 + $0x680] sm:$0xff]  ;;  %v965_v30 = vpack.c.bf16 %v215_v26, %v208_v25 }
  0x5f   :  { %998 = vmatpush3.bf16.msra.mxu1 %v997_v47  ;;  %v967_v31 = vpack.c.bf16 %v230_v28, %v223_v27 }
  0x60   :  { %1000 = vmatprep.subr.bf16.mxu1 %v999_v49 }
  0x61   :  { %942 = vmatpush1.bf16.msra.mxu0 %v941_v41  ;;  %v973_v41 = vpack.c.bf16 %v243_v40, %v236_v39 }
  0x62   :  { %944 = vmatprep.subr.bf16.mxu0 %v943_v42 }
  0x63   :  { %1002 = vmatpush3.bf16.msra.mxu1 %v1001_v60 }
  0x64   :  { %1004 = vmatprep.subr.bf16.mxu1 %v1003_v62 }
  0x65   :  { %946 = vmatpush1.bf16.msra.mxu0 %v945_v54 }
  0x66   :  { %948 = vmatprep.subr.bf16.mxu0 %v947_v55 }
  0x67   :  { %1006 = vmatpush3.bf16.msra.mxu1 %v1005_v6 }
  0x69   :  { %950 = vmatpush1.bf16.msra.mxu0 %v949_v1 }
  0x6a   :  { %952 = vmatprep.subr.bf16.mxu0 %v951_v2  ;;  %578 = vmatmul.mubr.f32.vlgmr.msra.gmra.mrb[8].mxu1 %v1437_v5 }
  0x6b   :  { %582 = vmatprep.mubr.f32.mxu1 %v1467_v18 }
  0x6d   :  { %954 = vmatpush1.bf16.msra.mxu0 %v953_v10 }
  0x6e   :  { %956 = vmatprep.subr.bf16.mxu0 %v955_v11  ;;  %583 = vmatmul.mubr.f32.gmra.mrb[10].mxu1 %v1491_v29 }
  0x6f   :  { %587 = vmatprep.mubr.f32.mxu1 %v1502_v32 }
  0x71   :  { %958 = vmatpush1.bf16.msra.mxu0 %v957_v16 }
  0x72   :  { %960 = vmatprep.subr.bf16.mxu0 %v959_v17  ;;  %588 = vmatmul.mubr.f32.gmra.mrb[12].mxu1 %v1527_v43 }
  0x73   :  { %592 = vmatprep.mubr.f32.mxu1 %v1562_v58 }
  0x75   :  { %962 = vmatpush1.bf16.msra.mxu0 %v961_v23 }
  0x76   :  { %964 = vmatprep.subr.bf16.mxu0 %v963_v24  ;;  %593 = vmatmul.mubr.f32.gmra.mrb[14].mxu1 %v1597_v9 }
  0x79   :  { %966 = vmatpush1.bf16.msra.mxu0 %v965_v30 }
  0x7a   :  { %968 = vmatprep.subr.bf16.mxu0 %v967_v31 }
  0x7d   :  { %970 = vmatpush1.bf16.msra.mxu0 %v969_v37 }
  0x7e   :  { %972 = vmatprep.subr.bf16.mxu0 %v971_v38 }
  0x81   :  { %974 = vmatpush1.bf16.msra.mxu0 %v973_v41 }
  0x84   :  { %489 = vmatmul.mubr.f32.vlgmr.msra.gmra.mrb[8].mxu0 %v1437_v5 }
  0x85   :  { %494 = vmatprep.mubr.f32.mxu0 %v1467_v18 }
  0x88   :  { %495 = vmatmul.mubr.f32.gmra.mrb[10].mxu0 %v1491_v29 }
  0x89   :  { %500 = vmatprep.mubr.f32.mxu0 %v1502_v32 }
  0x8c   :  { %501 = vmatmul.mubr.f32.gmra.mrb[12].mxu0 %v1527_v43 }
  0x8d   :  { %506 = vmatprep.mubr.f32.mxu0 %v1562_v58 }
  0x90   :  { %507 = vmatmul.mubr.f32.gmra.mrb[14].mxu0 %v1597_v9 }
  0xb8   :  { %v1787_v44 = vpop.permute.xlu0 %632 }
  0xbc   :  { %v1791_v43 = vpop.permute.xlu0 %637 }
  0xc5   :  { %v1801_v61 = vpop.permute.xlu1 %642 }
  0xd3   :  { %v1827_v24 = vpop.permute.xlu1 %647 }
 0x117   :  { %v312_v42 = vpop.f32.mrb[0].mxu0 }
 0x118   :  { %v598_v45 = vmul.f32 0.003921569, %v312_v42  ;;  %v314_v46 = vpop.f32.mrb[1].mxu0 }
 0x119   :  { %v599_v47 = vmul.f32 0.003921569, %v314_v46 }
 0x11a   :  { %v650_v5 = vadd.f32 %v1787_v44, %v598_v45 }
 0x11b   :  { %v651_v18 = vadd.f32 %v1787_v44, %v599_v47  ;;  %v318_v48 = vpop.f32.mrb[2].mxu0 }
 0x11c   :  { %v678_v29 = vmax.f32 %v650_v5, 0.0  ;;  %v605_v49 = vmul.f32 0.003921569, %v318_v48  ;;  %v320_v32 = vpop.f32.mrb[3].mxu0 }
 0x11d   :  { %v679_v50 = vmax.f32 %v651_v18, 0.0  ;;  %v606_v58 = vmul.f32 0.003921569, %v320_v32  ;;  %v401_v53 = vpop.f32.mrb[0].mxu1 }
 0x11e   :  { %706 = vst [vmem:[%s1914_s3] sm:$0xff] %v678_v29  ;;  %v657_v9 = vadd.f32 %v1791_v43, %v605_v49  ;;  %v600_v57 = vmul.f32 0.003921569, %v401_v53  ;;  %v403_v59 = vpop.f32.mrb[1].mxu1 }
 0x11f   :  { %707 = vst [vmem:[%s1914_s3 + $0x8] sm:$0xff] %v679_v50  ;;  %v658_v51 = vadd.f32 %v1791_v43, %v606_v58  ;;  %v324_v52 = vpop.f32.mrb[4].mxu0  ;;  %v601_v63 = vmul.f32 0.003921569, %v403_v59 }
 0x120   :  { %v685_v54 = vmax.f32 %v657_v9, 0.0  ;;  %v612_v55 = vmul.f32 0.003921569, %v324_v52  ;;  %v326_v56 = vpop.f32.mrb[5].mxu0  ;;  %v652_v1 = vadd.f32 %v1787_v44, %v600_v57 }
 0x121   :  { %v686_v60 = vmax.f32 %v658_v51, 0.0  ;;  %v613_v62 = vmul.f32 0.003921569, %v326_v56  ;;  %v653_v3 = vadd.f32 %v1787_v44, %v601_v63  ;;  %v407_v4 = vpop.f32.mrb[2].mxu1 }
 0x122   :  { %714 = vst [vmem:[%s1914_s3 + $0x38] sm:$0xff] %v685_v54  ;;  %v664_v0 = vadd.f32 %v1801_v61, %v612_v55  ;;  %v680_v7 = vmax.f32 %v652_v1, 0.0  ;;  %v607_v8 = vmul.f32 0.003921569, %v407_v4  ;;  %v409_v10 = vpop.f32.mrb[3].mxu1 }
 0x123   :  { %715 = vst [vmem:[%s1914_s3 + $0x40] sm:$0xff] %v686_v60  ;;  %v665_v2 = vadd.f32 %v1801_v61, %v613_v62  ;;  %v681_v12 = vmax.f32 %v653_v3, 0.0  ;;  %v608_v13 = vmul.f32 0.003921569, %v409_v10  ;;  %v330_v15 = vpop.f32.mrb[6].mxu0 }
 0x124   :  { %v692_v6 = vmax.f32 %v664_v0, 0.0  ;;  %708 = vst [vmem:[%s1914_s3 + $0x10] sm:$0xff] %v680_v7  ;;  %v659_v14 = vadd.f32 %v1791_v43, %v607_v8  ;;  %v619_v19 = vmul.f32 0.003921569, %v330_v15  ;;  %v332_v20 = vpop.f32.mrb[7].mxu0 }
 0x125   :  { %v693_v11 = vmax.f32 %v665_v2, 0.0  ;;  %709 = vst [vmem:[%s1914_s3 + $0x18] sm:$0xff] %v681_v12  ;;  %v660_v16 = vadd.f32 %v1791_v43, %v608_v13  ;;  %v413_v17 = vpop.f32.mrb[4].mxu1  ;;  %v620_v25 = vmul.f32 0.003921569, %v332_v20 }
 0x126   :  { %721 = vst [vmem:[%s1914_s3 + $0x70] sm:$0xff] %v692_v6  ;;  %v687_v21 = vmax.f32 %v659_v14, 0.0  ;;  %v614_v22 = vmul.f32 0.003921569, %v413_v17  ;;  %v415_v23 = vpop.f32.mrb[5].mxu1  ;;  %v671_v28 = vadd.f32 %v1827_v24, %v619_v19 }
 0x127   :  { %722 = vst [vmem:[%s1914_s3 + $0x78] sm:$0xff] %v693_v11  ;;  %v688_v26 = vmax.f32 %v660_v16, 0.0  ;;  %v615_v27 = vmul.f32 0.003921569, %v415_v23  ;;  %v672_v31 = vadd.f32 %v1827_v24, %v620_v25 }
 0x128   :  { %716 = vst [vmem:[%s1914_s3 + $0x48] sm:$0xff] %v687_v21  ;;  %v666_v30 = vadd.f32 %v1801_v61, %v614_v22  ;;  %v699_v35 = vmax.f32 %v671_v28, 0.0 }
 0x129   :  { %717 = vst [vmem:[%s1914_s3 + $0x50] sm:$0xff] %v688_v26  ;;  %v667_v33 = vadd.f32 %v1801_v61, %v615_v27  ;;  %v419_v34 = vpop.f32.mrb[6].mxu1  ;;  %v700_v39 = vmax.f32 %v672_v31, 0.0 }
 0x12a   :  { %v694_v36 = vmax.f32 %v666_v30, 0.0  ;;  %v621_v37 = vmul.f32 0.003921569, %v419_v34  ;;  %v421_v38 = vpop.f32.mrb[7].mxu1  ;;  %728 = vst [vmem:[%s1914_s3 + $0xa8] sm:$0xff] %v699_v35 }
 0x12b   :  { %v695_v40 = vmax.f32 %v667_v33, 0.0  ;;  %v622_v41 = vmul.f32 0.003921569, %v421_v38  ;;  %729 = vst [vmem:[%s1914_s3 + $0xb0] sm:$0xff] %v700_v39 }
 0x12c   :  { %723 = vst [vmem:[%s1914_s3 + $0x80] sm:$0xff] %v694_v36  ;;  %v673_v42 = vadd.f32 %v1827_v24, %v621_v37 }
 0x12d   :  { %724 = vst [vmem:[%s1914_s3 + $0x88] sm:$0xff] %v695_v40  ;;  %v674_v45 = vadd.f32 %v1827_v24, %v622_v41 }
 0x12e   :  { %v701_v46 = vmax.f32 %v673_v42, 0.0 }
 0x12f   :  { %v702_v47 = vmax.f32 %v674_v45, 0.0 }
 0x130   :  { %730 = vst [vmem:[%s1914_s3 + $0xb8] sm:$0xff] %v701_v46 }
 0x131   :  { %731 = vst [vmem:[%s1914_s3 + $0xc0] sm:$0xff] %v702_v47 }
 0x13d   :  { %v771_v5 = vpop.f32.mrb[8].mxu1 }
 0x13e   :  { %v772_v18 = vpop.f32.mrb[9].mxu1 }
 0x13f   :  { %v773_v48 = vadd.f32 %v772_v18, %v771_v5 }
 0x141   :  { %v604_v29 = vmul.f32 0.003921569, %v773_v48  ;;  %v774_v49 = vpop.f32.mrb[10].mxu1 }
 0x142   :  { %v775_v32 = vpop.f32.mrb[11].mxu1 }
 0x143   :  { %v656_v50 = vadd.f32 %v1787_v44, %v604_v29  ;;  %v776_v58 = vadd.f32 %v775_v32, %v774_v49 }
 0x145   :  { %v684_v9 = vmax.f32 %v656_v50, 0.0  ;;  %v611_v51 = vmul.f32 0.003921569, %v776_v58  ;;  %v777_v52 = vpop.f32.mrb[12].mxu1 }
 0x146   :  { %v778_v53 = vpop.f32.mrb[13].mxu1 }
 0x147   :  { %713 = vst.msk [vmem:[%s1914_s3 + $0x30] sm:$0xff] %vm712_vm0, %v684_v9  ;;  %v663_v54 = vadd.f32 %v1791_v43, %v611_v51  ;;  %v779_v55 = vadd.f32 %v778_v53, %v777_v52 }
 0x149   :  { %v691_v56 = vmax.f32 %v663_v54, 0.0  ;;  %v618_v57 = vmul.f32 0.003921569, %v779_v55  ;;  %v780_v59 = vpop.f32.mrb[14].mxu1 }
 0x14a   :  { %v781_v60 = vpop.f32.mrb[15].mxu1 }
 0x14b   :  { %720 = vst.msk [vmem:[%s1914_s3 + $0x68] sm:$0xff] %vm712_vm0, %v691_v56  ;;  %v670_v62 = vadd.f32 %v1801_v61, %v618_v57  ;;  %v782_v63 = vadd.f32 %v781_v60, %v780_v59 }
 0x14d   :  { %v698_v0 = vmax.f32 %v670_v62, 0.0  ;;  %v625_v1 = vmul.f32 0.003921569, %v782_v63 }
 0x14f   :  { %727 = vst.msk [vmem:[%s1914_s3 + $0xa0] sm:$0xff] %vm712_vm0, %v698_v0  ;;  %v677_v2 = vadd.f32 %v1827_v24, %v625_v1 }
 0x151   :  { %v705_v3 = vmax.f32 %v677_v2, 0.0 }
 0x153   :  { %734 = vst.msk [vmem:[%s1914_s3 + $0xd8] sm:$0xff] %vm712_vm0, %v705_v3 }
 0x157   :  { %v490_v4 = vpop.f32.mrb[8].mxu0 }
 0x158   :  { %v602_v6 = vmul.f32 0.003921569, %v490_v4  ;;  %v492_v7 = vpop.f32.mrb[9].mxu0 }
 0x159   :  { %v603_v8 = vmul.f32 0.003921569, %v492_v7 }
 0x15a   :  { %v654_v10 = vadd.f32 %v1787_v44, %v602_v6 }
 0x15b   :  { %v655_v11 = vadd.f32 %v1787_v44, %v603_v8  ;;  %v496_v12 = vpop.f32.mrb[10].mxu0 }
 0x15c   :  { %v682_v13 = vmax.f32 %v654_v10, 0.0  ;;  %v609_v14 = vmul.f32 0.003921569, %v496_v12  ;;  %v498_v15 = vpop.f32.mrb[11].mxu0 }
 0x15d   :  { %v683_v16 = vmax.f32 %v655_v11, 0.0  ;;  %v610_v17 = vmul.f32 0.003921569, %v498_v15 }
 0x15e   :  { %710 = vst [vmem:[%s1914_s3 + $0x20] sm:$0xff] %v682_v13  ;;  %v661_v19 = vadd.f32 %v1791_v43, %v609_v14 }
 0x15f   :  { %711 = vst [vmem:[%s1914_s3 + $0x28] sm:$0xff] %v683_v16  ;;  %v662_v20 = vadd.f32 %v1791_v43, %v610_v17  ;;  %v502_v21 = vpop.f32.mrb[12].mxu0 }
 0x160   :  { %v689_v44 = vmax.f32 %v661_v19, 0.0  ;;  %v616_v22 = vmul.f32 0.003921569, %v502_v21  ;;  %v504_v23 = vpop.f32.mrb[13].mxu0 }
 0x161   :  { %v690_v25 = vmax.f32 %v662_v20, 0.0  ;;  %v617_v26 = vmul.f32 0.003921569, %v504_v23 }
 0x162   :  { %718 = vst [vmem:[%s1914_s3 + $0x58] sm:$0xff] %v689_v44  ;;  %v668_v27 = vadd.f32 %v1801_v61, %v616_v22 }
 0x163   :  { %719 = vst [vmem:[%s1914_s3 + $0x60] sm:$0xff] %v690_v25  ;;  %v669_v28 = vadd.f32 %v1801_v61, %v617_v26  ;;  %v508_v30 = vpop.f32.mrb[14].mxu0 }
 0x164   :  { %v696_v43 = vmax.f32 %v668_v27, 0.0  ;;  %v623_v31 = vmul.f32 0.003921569, %v508_v30  ;;  %v510_v33 = vpop.f32.mrb[15].mxu0 }
 0x165   :  { %v697_v34 = vmax.f32 %v669_v28, 0.0  ;;  %v624_v35 = vmul.f32 0.003921569, %v510_v33 }
 0x166   :  { %725 = vst [vmem:[%s1914_s3 + $0x90] sm:$0xff] %v696_v43  ;;  %v675_v36 = vadd.f32 %v1827_v24, %v623_v31 }
 0x167   :  { %726 = vst [vmem:[%s1914_s3 + $0x98] sm:$0xff] %v697_v34  ;;  %v676_v37 = vadd.f32 %v1827_v24, %v624_v35 }
 0x168   :  { %v703_v38 = vmax.f32 %v675_v36, 0.0 }
 0x169   :  { %v704_v61 = vmax.f32 %v676_v37, 0.0 }
 0x16a   :  { %732 = vst [vmem:[%s1914_s3 + $0xc8] sm:$0xff] %v703_v38 }
 0x16b   :  { %733 = vst [vmem:[%s1914_s3 + $0xd0] sm:$0xff] %v704_v61 }

// kernel: cnn_base_forward.5
= control target key start
LH: loop header
LB: loop body
LE: loop exit
PB: predicated region body
PF: predicated region fallthrough
CT: control target
= control target key end

     0   :  { %v648_v3 = vmov 0   ;;  %vm465_vm0 = vcmask 277504   ;;  %s1229_s1 = inlined_call_operand.vmem [shape: f32[512,162], index: 1, kind: input, shape index: {}]   ;;  %s1230_s0 = inlined_call_operand.vmem [shape: f32[64,512], index: 0, kind: input, shape index: {}]   ;;  %s1231_s2 = inlined_call_operand.vmem [shape: f32[64,1], index: 2, kind: input, shape index: {}]   ;;  %s1232_s3 = inlined_call_operand.vmem [shape: f32[64,162], index: 3, kind: output, shape index: {}]  }
   0x1   :  { %v47_v0 = vld [vmem:[%s1229_s1 + $0x8] sm:$0xff]  ;;  %v49_v1 = vld [vmem:[%s1229_s1 + $0x18] sm:$0xff]  ;;  %v46_v2 = vld [vmem:[%s1229_s1] sm:$0xff]  ;;  %646 = vset.pattern.permute.xlu0 %v648_v3  ;;  %647 = vset.pattern.permute.xlu1 %v648_v3 }
   0x2   :  { %v485_v4 = vpack.c.bf16 %v49_v1, %v47_v0  ;;  %v48_v5 = vld [vmem:[%s1229_s1 + $0x10] sm:$0xff]  ;;  %v111_v6 = vld [vmem:[%s1229_s1 + $0x208] sm:$0xff]  ;;  %v113_v7 = vld [vmem:[%s1229_s1 + $0x218] sm:$0xff] }
   0x3   :  { %v487_v8 = vpack.c.bf16 %v48_v5, %v46_v2  ;;  %v549_v9 = vpack.c.bf16 %v113_v7, %v111_v6  ;;  %v110_v10 = vld [vmem:[%s1229_s1 + $0x200] sm:$0xff]  ;;  %v112_v11 = vld [vmem:[%s1229_s1 + $0x210] sm:$0xff]  ;;  %v51_v12 = vld [vmem:[%s1229_s1 + $0x28] sm:$0xff] }
   0x4   :  { %486 = vmatprep.subr.bf16.mxu1 %v485_v4  ;;  %v551_v13 = vpack.c.bf16 %v112_v11, %v110_v10  ;;  %v53_v14 = vld [vmem:[%s1229_s1 + $0x38] sm:$0xff]  ;;  %v50_v15 = vld [vmem:[%s1229_s1 + $0x20] sm:$0xff]  ;;  %v52_v16 = vld [vmem:[%s1229_s1 + $0x30] sm:$0xff] }
   0x5   :  { %488 = vmatpush1.bf16.msra.mxu1 %v487_v8  ;;  %550 = vmatprep.subr.bf16.mxu0 %v549_v9  ;;  %v489_v17 = vpack.c.bf16 %v53_v14, %v51_v12  ;;  %v491_v18 = vpack.c.bf16 %v52_v16, %v50_v15  ;;  %v115_v19 = vld [vmem:[%s1229_s1 + $0x228] sm:$0xff]  ;;  %v117_v20 = vld [vmem:[%s1229_s1 + $0x238] sm:$0xff]  ;;  %v114_v21 = vld [vmem:[%s1229_s1 + $0x220] sm:$0xff] }
   0x6   :  { %552 = vmatpush1.bf16.msra.mxu0 %v551_v13  ;;  %v553_v22 = vpack.c.bf16 %v117_v20, %v115_v19  ;;  %v116_v23 = vld [vmem:[%s1229_s1 + $0x230] sm:$0xff]  ;;  %v55_v24 = vld [vmem:[%s1229_s1 + $0x48] sm:$0xff]  ;;  %v57_v25 = vld [vmem:[%s1229_s1 + $0x58] sm:$0xff] }
   0x7   :  { %490 = vmatprep.subr.bf16.mxu1 %v489_v17  ;;  %v555_v26 = vpack.c.bf16 %v116_v23, %v114_v21  ;;  %v493_v27 = vpack.c.bf16 %v57_v25, %v55_v24  ;;  %v54_v28 = vld [vmem:[%s1229_s1 + $0x40] sm:$0xff]  ;;  %v56_v29 = vld [vmem:[%s1229_s1 + $0x50] sm:$0xff]  ;;  %v119_v30 = vld [vmem:[%s1229_s1 + $0x248] sm:$0xff] }
   0x8   :  { %554 = vmatprep.subr.bf16.mxu0 %v553_v22  ;;  %v121_v31 = vld [vmem:[%s1229_s1 + $0x258] sm:$0xff]  ;;  %v118_v32 = vld [vmem:[%s1229_s1 + $0x240] sm:$0xff]  ;;  %v120_v33 = vld [vmem:[%s1229_s1 + $0x250] sm:$0xff]  ;;  %v495_v34 = vpack.c.bf16 %v56_v29, %v54_v28 }
   0x9   :  { %492 = vmatpush1.bf16.msra.mxu1 %v491_v18  ;;  %v557_v35 = vpack.c.bf16 %v121_v31, %v119_v30  ;;  %v59_v36 = vld [vmem:[%s1229_s1 + $0x68] sm:$0xff]  ;;  %v61_v37 = vld [vmem:[%s1229_s1 + $0x78] sm:$0xff]  ;;  %v58_v38 = vld [vmem:[%s1229_s1 + $0x60] sm:$0xff]  ;;  %v559_v39 = vpack.c.bf16 %v120_v33, %v118_v32 }
   0xa   :  { %556 = vmatpush1.bf16.msra.mxu0 %v555_v26  ;;  %494 = vmatprep.subr.bf16.mxu1 %v493_v27  ;;  %v497_v40 = vpack.c.bf16 %v61_v37, %v59_v36  ;;  %v60_v41 = vld [vmem:[%s1229_s1 + $0x70] sm:$0xff]  ;;  %v123_v42 = vld [vmem:[%s1229_s1 + $0x268] sm:$0xff]  ;;  %v125_v43 = vld [vmem:[%s1229_s1 + $0x278] sm:$0xff] }
   0xb   :  { %558 = vmatprep.subr.bf16.mxu0 %v557_v35  ;;  %v561_v44 = vpack.c.bf16 %v125_v43, %v123_v42  ;;  %v122_v45 = vld [vmem:[%s1229_s1 + $0x260] sm:$0xff]  ;;  %v124_v46 = vld [vmem:[%s1229_s1 + $0x270] sm:$0xff]  ;;  %v63_v47 = vld [vmem:[%s1229_s1 + $0x88] sm:$0xff]  ;;  %v499_v49 = vpack.c.bf16 %v60_v41, %v58_v38 }
   0xc   :  { %v65_v48 = vld [vmem:[%s1229_s1 + $0x98] sm:$0xff]  ;;  %v127_v50 = vld [vmem:[%s1229_s1 + $0x288] sm:$0xff]  ;;  %v563_v52 = vpack.c.bf16 %v124_v46, %v122_v45  ;;  %v62_v54 = vld [vmem:[%s1229_s1 + $0x80] sm:$0xff] }
   0xd   :  { %496 = vmatpush1.bf16.msra.mxu1 %v495_v34  ;;  %v129_v51 = vld [vmem:[%s1229_s1 + $0x298] sm:$0xff]  ;;  %v501_v53 = vpack.c.bf16 %v65_v48, %v63_v47  ;;  %v64_v55 = vld [vmem:[%s1229_s1 + $0x90] sm:$0xff]  ;;  %v126_v56 = vld [vmem:[%s1229_s1 + $0x280] sm:$0xff] }
   0xe   :  { %560 = vmatpush1.bf16.msra.mxu0 %v559_v39  ;;  %498 = vmatprep.subr.bf16.mxu1 %v497_v40  ;;  %v565_v57 = vpack.c.bf16 %v129_v51, %v127_v50  ;;  %v128_v58 = vld [vmem:[%s1229_s1 + $0x290] sm:$0xff]  ;;  %v67_v59 = vld [vmem:[%s1229_s1 + $0xa8] sm:$0xff]  ;;  %v69_v60 = vld [vmem:[%s1229_s1 + $0xb8] sm:$0xff]  ;;  %v503_v63 = vpack.c.bf16 %v64_v55, %v62_v54 }
   0xf   :  { %562 = vmatprep.subr.bf16.mxu0 %v561_v44  ;;  %v131_v61 = vld [vmem:[%s1229_s1 + $0x2a8] sm:$0xff]  ;;  %v133_v62 = vld [vmem:[%s1229_s1 + $0x2b8] sm:$0xff]  ;;  %v567_v0 = vpack.c.bf16 %v128_v58, %v126_v56  ;;  %v505_v1 = vpack.c.bf16 %v69_v60, %v67_v59  ;;  %v66_v2 = vld [vmem:[%s1229_s1 + $0xa0] sm:$0xff] }
  0x10   :  { %v68_v3 = vld [vmem:[%s1229_s1 + $0xb0] sm:$0xff]  ;;  %v130_v4 = vld [vmem:[%s1229_s1 + $0x2a0] sm:$0xff]  ;;  %v569_v5 = vpack.c.bf16 %v133_v62, %v131_v61  ;;  %v71_v7 = vld [vmem:[%s1229_s1 + $0xc8] sm:$0xff] }
  0x11   :  { %500 = vmatpush1.bf16.msra.mxu1 %v499_v49  ;;  %v132_v6 = vld [vmem:[%s1229_s1 + $0x2b0] sm:$0xff]  ;;  %v73_v8 = vld [vmem:[%s1229_s1 + $0xd8] sm:$0xff]  ;;  %v135_v9 = vld [vmem:[%s1229_s1 + $0x2c8] sm:$0xff]  ;;  %v507_v11 = vpack.c.bf16 %v68_v3, %v66_v2 }
  0x12   :  { %564 = vmatpush1.bf16.msra.mxu0 %v563_v52  ;;  %502 = vmatprep.subr.bf16.mxu1 %v501_v53  ;;  %v137_v10 = vld [vmem:[%s1229_s1 + $0x2d8] sm:$0xff]  ;;  %v571_v12 = vpack.c.bf16 %v132_v6, %v130_v4  ;;  %v509_v13 = vpack.c.bf16 %v73_v8, %v71_v7  ;;  %v70_v14 = vld [vmem:[%s1229_s1 + $0xc0] sm:$0xff]  ;;  %v72_v15 = vld [vmem:[%s1229_s1 + $0xd0] sm:$0xff] }
  0x13   :  { %566 = vmatprep.subr.bf16.mxu0 %v565_v57  ;;  %v134_v16 = vld [vmem:[%s1229_s1 + $0x2c0] sm:$0xff]  ;;  %v573_v17 = vpack.c.bf16 %v137_v10, %v135_v9  ;;  %v136_v18 = vld [vmem:[%s1229_s1 + $0x2d0] sm:$0xff]  ;;  %v75_v19 = vld [vmem:[%s1229_s1 + $0xe8] sm:$0xff]  ;;  %v511_v23 = vpack.c.bf16 %v72_v15, %v70_v14 }
  0x14   :  { %v77_v20 = vld [vmem:[%s1229_s1 + $0xf8] sm:$0xff]  ;;  %v139_v21 = vld [vmem:[%s1229_s1 + $0x2e8] sm:$0xff]  ;;  %v575_v24 = vpack.c.bf16 %v136_v18, %v134_v16  ;;  %v74_v26 = vld [vmem:[%s1229_s1 + $0xe0] sm:$0xff] }
  0x15   :  { %504 = vmatpush1.bf16.msra.mxu1 %v503_v63  ;;  %v141_v22 = vld [vmem:[%s1229_s1 + $0x2f8] sm:$0xff]  ;;  %v513_v25 = vpack.c.bf16 %v77_v20, %v75_v19  ;;  %v76_v27 = vld [vmem:[%s1229_s1 + $0xf0] sm:$0xff]  ;;  %v138_v28 = vld [vmem:[%s1229_s1 + $0x2e0] sm:$0xff] }
  0x16   :  { %568 = vmatpush1.bf16.msra.mxu0 %v567_v0  ;;  %506 = vmatprep.subr.bf16.mxu1 %v505_v1  ;;  %v577_v29 = vpack.c.bf16 %v141_v22, %v139_v21  ;;  %v140_v30 = vld [vmem:[%s1229_s1 + $0x2f0] sm:$0xff]  ;;  %v79_v31 = vld [vmem:[%s1229_s1 + $0x108] sm:$0xff]  ;;  %v81_v32 = vld [vmem:[%s1229_s1 + $0x118] sm:$0xff]  ;;  %v515_v35 = vpack.c.bf16 %v76_v27, %v74_v26 }
  0x17   :  { %570 = vmatprep.subr.bf16.mxu0 %v569_v5  ;;  %v143_v33 = vld [vmem:[%s1229_s1 + $0x308] sm:$0xff]  ;;  %v145_v34 = vld [vmem:[%s1229_s1 + $0x318] sm:$0xff]  ;;  %v579_v36 = vpack.c.bf16 %v140_v30, %v138_v28  ;;  %v517_v37 = vpack.c.bf16 %v81_v32, %v79_v31  ;;  %v78_v38 = vld [vmem:[%s1229_s1 + $0x100] sm:$0xff] }
  0x18   :  { %v80_v39 = vld [vmem:[%s1229_s1 + $0x110] sm:$0xff]  ;;  %v142_v40 = vld [vmem:[%s1229_s1 + $0x300] sm:$0xff]  ;;  %v581_v41 = vpack.c.bf16 %v145_v34, %v143_v33  ;;  %v83_v43 = vld [vmem:[%s1229_s1 + $0x128] sm:$0xff] }
  0x19   :  { %508 = vmatpush1.bf16.msra.mxu1 %v507_v11  ;;  %v144_v42 = vld [vmem:[%s1229_s1 + $0x310] sm:$0xff]  ;;  %v85_v44 = vld [vmem:[%s1229_s1 + $0x138] sm:$0xff]  ;;  %v147_v45 = vld [vmem:[%s1229_s1 + $0x328] sm:$0xff]  ;;  %v519_v47 = vpack.c.bf16 %v80_v39, %v78_v38 }
  0x1a   :  { %572 = vmatpush1.bf16.msra.mxu0 %v571_v12  ;;  %510 = vmatprep.subr.bf16.mxu1 %v509_v13  ;;  %v149_v46 = vld [vmem:[%s1229_s1 + $0x338] sm:$0xff]  ;;  %v583_v48 = vpack.c.bf16 %v144_v42, %v142_v40  ;;  %v521_v49 = vpack.c.bf16 %v85_v44, %v83_v43  ;;  %v82_v50 = vld [vmem:[%s1229_s1 + $0x120] sm:$0xff]  ;;  %v84_v51 = vld [vmem:[%s1229_s1 + $0x130] sm:$0xff] }
  0x1b   :  { %574 = vmatprep.subr.bf16.mxu0 %v573_v17  ;;  %v146_v52 = vld [vmem:[%s1229_s1 + $0x320] sm:$0xff]  ;;  %v585_v53 = vpack.c.bf16 %v149_v46, %v147_v45  ;;  %v148_v54 = vld [vmem:[%s1229_s1 + $0x330] sm:$0xff]  ;;  %v87_v55 = vld [vmem:[%s1229_s1 + $0x148] sm:$0xff]  ;;  %v523_v59 = vpack.c.bf16 %v84_v51, %v82_v50 }
  0x1c   :  { %v89_v56 = vld [vmem:[%s1229_s1 + $0x158] sm:$0xff]  ;;  %v151_v57 = vld [vmem:[%s1229_s1 + $0x348] sm:$0xff]  ;;  %v587_v60 = vpack.c.bf16 %v148_v54, %v146_v52  ;;  %v86_v62 = vld [vmem:[%s1229_s1 + $0x140] sm:$0xff] }
  0x1d   :  { %512 = vmatpush1.bf16.msra.mxu1 %v511_v23  ;;  %v153_v58 = vld [vmem:[%s1229_s1 + $0x358] sm:$0xff]  ;;  %v525_v61 = vpack.c.bf16 %v89_v56, %v87_v55  ;;  %v88_v63 = vld [vmem:[%s1229_s1 + $0x150] sm:$0xff]  ;;  %v150_v0 = vld [vmem:[%s1229_s1 + $0x340] sm:$0xff] }
  0x1e   :  { %576 = vmatpush1.bf16.msra.mxu0 %v575_v24  ;;  %514 = vmatprep.subr.bf16.mxu1 %v513_v25  ;;  %v589_v1 = vpack.c.bf16 %v153_v58, %v151_v57  ;;  %v152_v2 = vld [vmem:[%s1229_s1 + $0x350] sm:$0xff]  ;;  %v91_v3 = vld [vmem:[%s1229_s1 + $0x168] sm:$0xff]  ;;  %v93_v4 = vld [vmem:[%s1229_s1 + $0x178] sm:$0xff]  ;;  %v527_v7 = vpack.c.bf16 %v88_v63, %v86_v62 }
  0x1f   :  { %578 = vmatprep.subr.bf16.mxu0 %v577_v29  ;;  %v155_v5 = vld [vmem:[%s1229_s1 + $0x368] sm:$0xff]  ;;  %v157_v6 = vld [vmem:[%s1229_s1 + $0x378] sm:$0xff]  ;;  %v90_v8 = vld [vmem:[%s1229_s1 + $0x160] sm:$0xff]  ;;  %v591_v9 = vpack.c.bf16 %v152_v2, %v150_v0  ;;  %v529_v10 = vpack.c.bf16 %v93_v4, %v91_v3 }
  0x20   :  { %v92_v11 = vld [vmem:[%s1229_s1 + $0x170] sm:$0xff]  ;;  %v154_v12 = vld [vmem:[%s1229_s1 + $0x360] sm:$0xff]  ;;  %v593_v14 = vpack.c.bf16 %v157_v6, %v155_v5  ;;  %v95_v15 = vld [vmem:[%s1229_s1 + $0x188] sm:$0xff] }
  0x21   :  { %516 = vmatpush1.bf16.msra.mxu1 %v515_v35  ;;  %v156_v13 = vld [vmem:[%s1229_s1 + $0x370] sm:$0xff]  ;;  %v97_v16 = vld [vmem:[%s1229_s1 + $0x198] sm:$0xff]  ;;  %v15_v17 = vld [vmem:[%s1230_s0 + $0x8] sm:$0xff]  ;;  %v531_v21 = vpack.c.bf16 %v92_v11, %v90_v8 }
  0x22   :  { %580 = vmatpush1.bf16.msra.mxu0 %v579_v36  ;;  %518 = vmatprep.subr.bf16.mxu1 %v517_v37  ;;  %v159_v18 = vld [vmem:[%s1229_s1 + $0x388] sm:$0xff]  ;;  %v161_v19 = vld [vmem:[%s1229_s1 + $0x398] sm:$0xff]  ;;  %v595_v22 = vpack.c.bf16 %v156_v13, %v154_v12  ;;  %v533_v23 = vpack.c.bf16 %v97_v16, %v95_v15  ;;  %v94_v24 = vld [vmem:[%s1229_s1 + $0x180] sm:$0xff] }
  0x23   :  { %582 = vmatprep.subr.bf16.mxu0 %v581_v41  ;;  %286 = vmatprep.mubr.f32.mxu1 %v15_v17  ;;  %v17_v20 = vld [vmem:[%s1230_s0 + $0x18] sm:$0xff]  ;;  %v96_v25 = vld [vmem:[%s1229_s1 + $0x190] sm:$0xff]  ;;  %v158_v26 = vld [vmem:[%s1229_s1 + $0x380] sm:$0xff]  ;;  %v597_v27 = vpack.c.bf16 %v161_v19, %v159_v18 }
  0x24   :  { %399 = vmatprep.mubr.f32.mxu0 %v17_v20  ;;  %v160_v28 = vld [vmem:[%s1229_s1 + $0x390] sm:$0xff]  ;;  %v99_v29 = vld [vmem:[%s1229_s1 + $0x1a8] sm:$0xff]  ;;  %v101_v30 = vld [vmem:[%s1229_s1 + $0x1b8] sm:$0xff]  ;;  %v535_v33 = vpack.c.bf16 %v96_v25, %v94_v24 }
  0x25   :  { %520 = vmatpush1.bf16.msra.mxu1 %v519_v47  ;;  %v163_v31 = vld [vmem:[%s1229_s1 + $0x3a8] sm:$0xff]  ;;  %v165_v32 = vld [vmem:[%s1229_s1 + $0x3b8] sm:$0xff]  ;;  %v599_v34 = vpack.c.bf16 %v160_v28, %v158_v26  ;;  %v537_v35 = vpack.c.bf16 %v101_v30, %v99_v29  ;;  %v98_v36 = vld [vmem:[%s1229_s1 + $0x1a0] sm:$0xff] }
  0x26   :  { %584 = vmatpush1.bf16.msra.mxu0 %v583_v48  ;;  %522 = vmatprep.subr.bf16.mxu1 %v521_v49  ;;  %v100_v37 = vld [vmem:[%s1229_s1 + $0x1b0] sm:$0xff]  ;;  %v162_v38 = vld [vmem:[%s1229_s1 + $0x3a0] sm:$0xff]  ;;  %v601_v39 = vpack.c.bf16 %v165_v32, %v163_v31  ;;  %v103_v41 = vld [vmem:[%s1229_s1 + $0x1c8] sm:$0xff] }
  0x27   :  { %586 = vmatprep.subr.bf16.mxu0 %v585_v53  ;;  %v164_v40 = vld [vmem:[%s1229_s1 + $0x3b0] sm:$0xff]  ;;  %v105_v42 = vld [vmem:[%s1229_s1 + $0x1d8] sm:$0xff]  ;;  %v167_v43 = vld [vmem:[%s1229_s1 + $0x3c8] sm:$0xff]  ;;  %v539_v45 = vpack.c.bf16 %v100_v37, %v98_v36 }
  0x28   :  { %v169_v44 = vld [vmem:[%s1229_s1 + $0x3d8] sm:$0xff]  ;;  %v102_v46 = vld [vmem:[%s1229_s1 + $0x1c0] sm:$0xff]  ;;  %v104_v47 = vld [vmem:[%s1229_s1 + $0x1d0] sm:$0xff]  ;;  %v603_v48 = vpack.c.bf16 %v164_v40, %v162_v38  ;;  %v541_v49 = vpack.c.bf16 %v105_v42, %v103_v41 }
  0x29   :  { %524 = vmatpush1.bf16.msra.mxu1 %v523_v59  ;;  %v166_v50 = vld [vmem:[%s1229_s1 + $0x3c0] sm:$0xff]  ;;  %v168_v51 = vld [vmem:[%s1229_s1 + $0x3d0] sm:$0xff]  ;;  %v605_v53 = vpack.c.bf16 %v169_v44, %v167_v43  ;;  %v107_v54 = vld [vmem:[%s1229_s1 + $0x1e8] sm:$0xff] }
  0x2a   :  { %588 = vmatpush1.bf16.msra.mxu0 %v587_v60  ;;  %526 = vmatprep.subr.bf16.mxu1 %v525_v61  ;;  %v174_v52 = vld [vmem:[%s1231_s2] sm:$0xff]  ;;  %v109_v55 = vld [vmem:[%s1229_s1 + $0x1f8] sm:$0xff]  ;;  %v176_v56 = vld [vmem:[%s1231_s2 + $0x10] sm:$0xff]  ;;  %v543_v60 = vpack.c.bf16 %v104_v47, %v102_v46  ;;  %v607_v62 = vpack.c.bf16 %v168_v51, %v166_v50 }
  0x2b   :  { %590 = vmatprep.subr.bf16.mxu0 %v589_v1  ;;  %184 = vperm.xlu0 %646, %v174_v52   ;;  %v171_v57 = vld [vmem:[%s1229_s1 + $0x3e8] sm:$0xff]  ;;  %v173_v58 = vld [vmem:[%s1229_s1 + $0x3f8] sm:$0xff]  ;;  %v545_v63 = vpack.c.bf16 %v109_v55, %v107_v54  ;;  %v106_v0 = vld [vmem:[%s1229_s1 + $0x1e0] sm:$0xff] }
  0x2c   :  { %v175_v59 = vld [vmem:[%s1231_s2 + $0x8] sm:$0xff]  ;;  %194 = vperm.xlu1 %647, %v176_v56   ;;  %v177_v61 = vld [vmem:[%s1231_s2 + $0x18] sm:$0xff]  ;;  %v108_v1 = vld [vmem:[%s1229_s1 + $0x1f0] sm:$0xff]  ;;  %v609_v2 = vpack.c.bf16 %v173_v58, %v171_v57 }
  0x2d   :  { %528 = vmatpush1.bf16.msra.mxu1 %v527_v7  ;;  %v170_v3 = vld [vmem:[%s1229_s1 + $0x3e0] sm:$0xff]  ;;  %v172_v4 = vld [vmem:[%s1229_s1 + $0x3f0] sm:$0xff]  ;;  %v547_v6 = vpack.c.bf16 %v108_v1, %v106_v0  ;;  %v179_v7 = vld [vmem:[%s1231_s2 + $0x28] sm:$0xff] }
  0x2e   :  { %592 = vmatpush1.bf16.msra.mxu0 %v591_v9  ;;  %530 = vmatprep.subr.bf16.mxu1 %v529_v10  ;;  %v178_v5 = vld [vmem:[%s1231_s2 + $0x20] sm:$0xff]  ;;  %v611_v8 = vpack.c.bf16 %v172_v4, %v170_v3  ;;  %v180_v9 = vld [vmem:[%s1231_s2 + $0x30] sm:$0xff]  ;;  %v181_v11 = vld [vmem:[%s1231_s2 + $0x38] sm:$0xff] }
  0x2f   :  { %594 = vmatprep.subr.bf16.mxu0 %v593_v14  ;;  %189 = vperm.xlu0 %646, %v175_v59   ;;  %v14_v10 = vld [vmem:[%s1230_s0] sm:$0xff]  ;;  %v16_v12 = vld [vmem:[%s1230_s0 + $0x10] sm:$0xff]  ;;  %v19_v13 = vld [vmem:[%s1230_s0 + $0x28] sm:$0xff] }
  0x30   :  { %199 = vperm.xlu1 %647, %v177_v61   ;;  %v21_v14 = vld [vmem:[%s1230_s0 + $0x38] sm:$0xff]  ;;  %v18_v15 = vld [vmem:[%s1230_s0 + $0x20] sm:$0xff]  ;;  %v20_v16 = vld [vmem:[%s1230_s0 + $0x30] sm:$0xff] }
  0x31   :  { %532 = vmatpush1.bf16.msra.mxu1 %v531_v21  ;;  %v23_v17 = vld [vmem:[%s1230_s0 + $0x48] sm:$0xff]  ;;  %v25_v18 = vld [vmem:[%s1230_s0 + $0x58] sm:$0xff]  ;;  %v22_v19 = vld [vmem:[%s1230_s0 + $0x40] sm:$0xff] }
  0x32   :  { %596 = vmatpush1.bf16.msra.mxu0 %v595_v22  ;;  %534 = vmatprep.subr.bf16.mxu1 %v533_v23  ;;  %v24_v20 = vld [vmem:[%s1230_s0 + $0x50] sm:$0xff]  ;;  %v27_v21 = vld [vmem:[%s1230_s0 + $0x68] sm:$0xff]  ;;  %v29_v22 = vld [vmem:[%s1230_s0 + $0x78] sm:$0xff] }
  0x33   :  { %598 = vmatprep.subr.bf16.mxu0 %v597_v27  ;;  %204 = vperm.xlu0 %646, %v178_v5   ;;  %v26_v23 = vld [vmem:[%s1230_s0 + $0x60] sm:$0xff]  ;;  %v28_v24 = vld [vmem:[%s1230_s0 + $0x70] sm:$0xff]  ;;  %v31_v25 = vld [vmem:[%s1230_s0 + $0x88] sm:$0xff] }
  0x34   :  { %209 = vperm.xlu1 %647, %v179_v7   ;;  %v33_v26 = vld [vmem:[%s1230_s0 + $0x98] sm:$0xff]  ;;  %v30_v27 = vld [vmem:[%s1230_s0 + $0x80] sm:$0xff]  ;;  %v32_v28 = vld [vmem:[%s1230_s0 + $0x90] sm:$0xff] }
  0x35   :  { %536 = vmatpush1.bf16.msra.mxu1 %v535_v33  ;;  %v35_v29 = vld [vmem:[%s1230_s0 + $0xa8] sm:$0xff]  ;;  %v37_v30 = vld [vmem:[%s1230_s0 + $0xb8] sm:$0xff]  ;;  %v34_v31 = vld [vmem:[%s1230_s0 + $0xa0] sm:$0xff] }
  0x36   :  { %600 = vmatpush1.bf16.msra.mxu0 %v599_v34  ;;  %538 = vmatprep.subr.bf16.mxu1 %v537_v35  ;;  %v36_v32 = vld [vmem:[%s1230_s0 + $0xb0] sm:$0xff]  ;;  %v39_v33 = vld [vmem:[%s1230_s0 + $0xc8] sm:$0xff]  ;;  %v41_v34 = vld [vmem:[%s1230_s0 + $0xd8] sm:$0xff] }
  0x37   :  { %602 = vmatprep.subr.bf16.mxu0 %v601_v39  ;;  %214 = vperm.xlu0 %646, %v180_v9   ;;  %v38_v35 = vld [vmem:[%s1230_s0 + $0xc0] sm:$0xff]  ;;  %v40_v36 = vld [vmem:[%s1230_s0 + $0xd0] sm:$0xff]  ;;  %v43_v37 = vld [vmem:[%s1230_s0 + $0xe8] sm:$0xff] }
  0x38   :  { %219 = vperm.xlu1 %647, %v181_v11   ;;  %v45_v38 = vld [vmem:[%s1230_s0 + $0xf8] sm:$0xff]  ;;  %v42_v39 = vld [vmem:[%s1230_s0 + $0xe0] sm:$0xff]  ;;  %v44_v40 = vld [vmem:[%s1230_s0 + $0xf0] sm:$0xff] }
  0x39   :  { %540 = vmatpush1.bf16.msra.mxu1 %v539_v45 }
  0x3a   :  { %604 = vmatpush1.bf16.msra.mxu0 %v603_v48  ;;  %542 = vmatprep.subr.bf16.mxu1 %v541_v49 }
  0x3b   :  { %606 = vmatprep.subr.bf16.mxu0 %v605_v53 }
  0x3d   :  { %544 = vmatpush1.bf16.msra.mxu1 %v543_v60 }
  0x3e   :  { %608 = vmatpush1.bf16.msra.mxu0 %v607_v62  ;;  %546 = vmatprep.subr.bf16.mxu1 %v545_v63 }
  0x3f   :  { %610 = vmatprep.subr.bf16.mxu0 %v609_v2 }
  0x41   :  { %548 = vmatpush1.bf16.msra.mxu1 %v547_v6 }
  0x42   :  { %612 = vmatpush1.bf16.msra.mxu0 %v611_v8 }
  0x44   :  { %287 = vmatmul.mubr.f32.vlgmr.msra.gmra.mrb[0].mxu1 %v14_v10 }
  0x45   :  { %400 = vmatmul.mubr.f32.vlgmr.msra.gmra.mrb[0].mxu0 %v16_v12  ;;  %292 = vmatprep.mubr.f32.mxu1 %v19_v13 }
  0x46   :  { %405 = vmatprep.mubr.f32.mxu0 %v21_v14 }
  0x48   :  { %293 = vmatmul.mubr.f32.gmra.mrb[2].mxu1 %v18_v15 }
  0x49   :  { %406 = vmatmul.mubr.f32.gmra.mrb[2].mxu0 %v20_v16  ;;  %298 = vmatprep.mubr.f32.mxu1 %v23_v17 }
  0x4a   :  { %411 = vmatprep.mubr.f32.mxu0 %v25_v18 }
  0x4c   :  { %299 = vmatmul.mubr.f32.gmra.mrb[4].mxu1 %v22_v19 }
  0x4d   :  { %412 = vmatmul.mubr.f32.gmra.mrb[4].mxu0 %v24_v20  ;;  %304 = vmatprep.mubr.f32.mxu1 %v27_v21 }
  0x4e   :  { %417 = vmatprep.mubr.f32.mxu0 %v29_v22 }
  0x50   :  { %305 = vmatmul.mubr.f32.gmra.mrb[6].mxu1 %v26_v23 }
  0x51   :  { %418 = vmatmul.mubr.f32.gmra.mrb[6].mxu0 %v28_v24  ;;  %310 = vmatprep.mubr.f32.mxu1 %v31_v25 }
  0x52   :  { %423 = vmatprep.mubr.f32.mxu0 %v33_v26 }
  0x54   :  { %311 = vmatmul.mubr.f32.gmra.mrb[8].mxu1 %v30_v27 }
  0x55   :  { %424 = vmatmul.mubr.f32.gmra.mrb[8].mxu0 %v32_v28  ;;  %316 = vmatprep.mubr.f32.mxu1 %v35_v29 }
  0x56   :  { %429 = vmatprep.mubr.f32.mxu0 %v37_v30 }
  0x58   :  { %317 = vmatmul.mubr.f32.gmra.mrb[10].mxu1 %v34_v31 }
  0x59   :  { %430 = vmatmul.mubr.f32.gmra.mrb[10].mxu0 %v36_v32  ;;  %322 = vmatprep.mubr.f32.mxu1 %v39_v33 }
  0x5a   :  { %435 = vmatprep.mubr.f32.mxu0 %v41_v34 }
  0x5c   :  { %323 = vmatmul.mubr.f32.gmra.mrb[12].mxu1 %v38_v35 }
  0x5d   :  { %436 = vmatmul.mubr.f32.gmra.mrb[12].mxu0 %v40_v36  ;;  %328 = vmatprep.mubr.f32.mxu1 %v43_v37 }
  0x5e   :  { %441 = vmatprep.mubr.f32.mxu0 %v45_v38 }
  0x60   :  { %329 = vmatmul.mubr.f32.gmra.mrb[14].mxu1 %v42_v39 }
  0x61   :  { %442 = vmatmul.mubr.f32.gmra.mrb[14].mxu0 %v44_v40 }
  0xaa   :  { %v185_v41 = vpop.permute.xlu0 %184 }
  0xab   :  { %v195_v57 = vpop.permute.xlu1 %194 }
  0xae   :  { %v190_v48 = vpop.permute.xlu0 %189 }
  0xaf   :  { %v200_v7 = vpop.permute.xlu1 %199 }
  0xb2   :  { %v205_v18 = vpop.permute.xlu0 %204 }
  0xb3   :  { %v210_v29 = vpop.permute.xlu1 %209 }
  0xb6   :  { %v215_v40 = vpop.permute.xlu0 %214 }
 0x117   :  { %v288_v42 = vpop.f32.mrb[0].mxu1 }
 0x118   :  { %v289_v43 = vadd.f32 %v288_v42, %v185_v41  ;;  %v290_v44 = vpop.f32.mrb[1].mxu1  ;;  %v401_v45 = vpop.f32.mrb[0].mxu0 }
 0x119   :  { %v291_v46 = vadd.f32 %v290_v44, %v185_v41  ;;  %v403_v47 = vpop.f32.mrb[1].mxu0 }
 0x11a   :  { %v402_v49 = vadd.f32 %v401_v45, %v289_v43 }
 0x11b   :  { %v404_v50 = vadd.f32 %v403_v47, %v291_v46  ;;  %v294_v51 = vpop.f32.mrb[2].mxu1 }
 0x11c   :  { %v448_v52 = vmax.f32 %v402_v49, 0.0  ;;  %v295_v53 = vadd.f32 %v294_v51, %v190_v48  ;;  %v296_v54 = vpop.f32.mrb[3].mxu1  ;;  %v407_v55 = vpop.f32.mrb[2].mxu0 }
 0x11d   :  { %v449_v56 = vmax.f32 %v404_v50, 0.0  ;;  %v297_v58 = vadd.f32 %v296_v54, %v190_v48  ;;  %v409_v59 = vpop.f32.mrb[3].mxu0  ;;  %v220_v51 = vpop.permute.xlu1 %219 }
 0x11e   :  { %464 = vst [vmem:[%s1232_s3] sm:$0xff] %v448_v52  ;;  %v408_v60 = vadd.f32 %v407_v55, %v295_v53 }
 0x11f   :  { %466 = vst.msk [vmem:[%s1232_s3 + $0x8] sm:$0xff] %vm465_vm0, %v449_v56  ;;  %v410_v61 = vadd.f32 %v409_v59, %v297_v58  ;;  %v300_v62 = vpop.f32.mrb[4].mxu1 }
 0x120   :  { %v450_v63 = vmax.f32 %v408_v60, 0.0  ;;  %v301_v0 = vadd.f32 %v300_v62, %v195_v57  ;;  %v302_v1 = vpop.f32.mrb[5].mxu1  ;;  %v413_v2 = vpop.f32.mrb[4].mxu0 }
 0x121   :  { %v451_v3 = vmax.f32 %v410_v61, 0.0  ;;  %v303_v4 = vadd.f32 %v302_v1, %v195_v57  ;;  %v415_v5 = vpop.f32.mrb[5].mxu0 }
 0x122   :  { %467 = vst [vmem:[%s1232_s3 + $0x10] sm:$0xff] %v450_v63  ;;  %v414_v6 = vadd.f32 %v413_v2, %v301_v0 }
 0x123   :  { %468 = vst.msk [vmem:[%s1232_s3 + $0x18] sm:$0xff] %vm465_vm0, %v451_v3  ;;  %v416_v8 = vadd.f32 %v415_v5, %v303_v4  ;;  %v306_v9 = vpop.f32.mrb[6].mxu1 }
 0x124   :  { %v452_v10 = vmax.f32 %v414_v6, 0.0  ;;  %v307_v11 = vadd.f32 %v306_v9, %v200_v7  ;;  %v308_v12 = vpop.f32.mrb[7].mxu1  ;;  %v419_v13 = vpop.f32.mrb[6].mxu0 }
 0x125   :  { %v453_v14 = vmax.f32 %v416_v8, 0.0  ;;  %v309_v15 = vadd.f32 %v308_v12, %v200_v7  ;;  %v421_v16 = vpop.f32.mrb[7].mxu0 }
 0x126   :  { %469 = vst [vmem:[%s1232_s3 + $0x20] sm:$0xff] %v452_v10  ;;  %v420_v17 = vadd.f32 %v419_v13, %v307_v11 }
 0x127   :  { %470 = vst.msk [vmem:[%s1232_s3 + $0x28] sm:$0xff] %vm465_vm0, %v453_v14  ;;  %v422_v19 = vadd.f32 %v421_v16, %v309_v15  ;;  %v312_v20 = vpop.f32.mrb[8].mxu1 }
 0x128   :  { %v454_v21 = vmax.f32 %v420_v17, 0.0  ;;  %v313_v22 = vadd.f32 %v312_v20, %v205_v18  ;;  %v314_v23 = vpop.f32.mrb[9].mxu1  ;;  %v425_v24 = vpop.f32.mrb[8].mxu0 }
 0x129   :  { %v455_v25 = vmax.f32 %v422_v19, 0.0  ;;  %v315_v26 = vadd.f32 %v314_v23, %v205_v18  ;;  %v427_v27 = vpop.f32.mrb[9].mxu0 }
 0x12a   :  { %471 = vst [vmem:[%s1232_s3 + $0x30] sm:$0xff] %v454_v21  ;;  %v426_v28 = vadd.f32 %v425_v24, %v313_v22 }
 0x12b   :  { %472 = vst.msk [vmem:[%s1232_s3 + $0x38] sm:$0xff] %vm465_vm0, %v455_v25  ;;  %v428_v30 = vadd.f32 %v427_v27, %v315_v26  ;;  %v318_v31 = vpop.f32.mrb[10].mxu1 }
 0x12c   :  { %v456_v32 = vmax.f32 %v426_v28, 0.0  ;;  %v319_v33 = vadd.f32 %v318_v31, %v210_v29  ;;  %v320_v34 = vpop.f32.mrb[11].mxu1  ;;  %v431_v35 = vpop.f32.mrb[10].mxu0 }
 0x12d   :  { %v457_v36 = vmax.f32 %v428_v30, 0.0  ;;  %v321_v37 = vadd.f32 %v320_v34, %v210_v29  ;;  %v433_v38 = vpop.f32.mrb[11].mxu0 }
 0x12e   :  { %473 = vst [vmem:[%s1232_s3 + $0x40] sm:$0xff] %v456_v32  ;;  %v432_v39 = vadd.f32 %v431_v35, %v319_v33 }
 0x12f   :  { %474 = vst.msk [vmem:[%s1232_s3 + $0x48] sm:$0xff] %vm465_vm0, %v457_v36  ;;  %v434_v41 = vadd.f32 %v433_v38, %v321_v37  ;;  %v324_v42 = vpop.f32.mrb[12].mxu1 }
 0x130   :  { %v458_v43 = vmax.f32 %v432_v39, 0.0  ;;  %v325_v44 = vadd.f32 %v324_v42, %v215_v40  ;;  %v326_v45 = vpop.f32.mrb[13].mxu1  ;;  %v437_v46 = vpop.f32.mrb[12].mxu0 }
 0x131   :  { %v459_v47 = vmax.f32 %v434_v41, 0.0  ;;  %v327_v48 = vadd.f32 %v326_v45, %v215_v40  ;;  %v439_v49 = vpop.f32.mrb[13].mxu0 }
 0x132   :  { %475 = vst [vmem:[%s1232_s3 + $0x50] sm:$0xff] %v458_v43  ;;  %v438_v50 = vadd.f32 %v437_v46, %v325_v44 }
 0x133   :  { %476 = vst.msk [vmem:[%s1232_s3 + $0x58] sm:$0xff] %vm465_vm0, %v459_v47  ;;  %v440_v52 = vadd.f32 %v439_v49, %v327_v48  ;;  %v330_v53 = vpop.f32.mrb[14].mxu1 }
 0x134   :  { %v460_v54 = vmax.f32 %v438_v50, 0.0  ;;  %v331_v55 = vadd.f32 %v330_v53, %v220_v51  ;;  %v332_v56 = vpop.f32.mrb[15].mxu1  ;;  %v443_v57 = vpop.f32.mrb[14].mxu0 }
 0x135   :  { %v461_v58 = vmax.f32 %v440_v52, 0.0  ;;  %v333_v59 = vadd.f32 %v332_v56, %v220_v51  ;;  %v445_v60 = vpop.f32.mrb[15].mxu0 }
 0x136   :  { %477 = vst [vmem:[%s1232_s3 + $0x60] sm:$0xff] %v460_v54  ;;  %v444_v61 = vadd.f32 %v443_v57, %v331_v55 }
 0x137   :  { %478 = vst.msk [vmem:[%s1232_s3 + $0x68] sm:$0xff] %vm465_vm0, %v461_v58  ;;  %v446_v62 = vadd.f32 %v445_v60, %v333_v59 }
 0x138   :  { %v462_v63 = vmax.f32 %v444_v61, 0.0 }
 0x139   :  { %v463_v0 = vmax.f32 %v446_v62, 0.0 }
 0x13a   :  { %479 = vst [vmem:[%s1232_s3 + $0x70] sm:$0xff] %v462_v63 }
 0x13b   :  { %480 = vst.msk [vmem:[%s1232_s3 + $0x78] sm:$0xff] %vm465_vm0, %v463_v0 }

// kernel: cnn_base_forward.6
= control target key start
LH: loop header
LB: loop body
LE: loop exit
PB: predicated region body
PF: predicated region fallthrough
CT: control target
= control target key end

     0   :  { %v628_v3 = vmov 0   ;;  %vm130_vm0 = vcmask 523264   ;;  %vm402_vm1 = vcmask 801792   ;;  %s949_s1 = inlined_call_operand.vmem [shape: f32[576,98], index: 1, kind: input, shape index: {}]   ;;  %s950_s0 = inlined_call_operand.vmem [shape: f32[32,576], index: 0, kind: input, shape index: {}]   ;;  %s951_s2 = inlined_call_operand.vmem [shape: f32[32,1], index: 2, kind: input, shape index: {}]   ;;  %s952_s3 = inlined_call_operand.vmem [shape: f32[32,98], index: 3, kind: output, shape index: {}]  }
   0x1   :  { %v50_v0 = vld [vmem:[%s949_s1 + $0x80] sm:$0xff]  ;;  %v51_v1 = vld [vmem:[%s949_s1 + $0x88] sm:$0xff]  ;;  %626 = vset.pattern.permute.xlu0 %v628_v3  ;;  %627 = vset.pattern.permute.xlu1 %v628_v3  ;;  %v52_v12 = vld [vmem:[%s949_s1 + $0x90] sm:$0xff] }
   0x2   :  { %v82_v2 = vld [vmem:[%s949_s1 + $0x180] sm:$0xff]  ;;  %v537_v4 = vpack.c.bf16 %v51_v1, %v50_v0  ;;  %v83_v5 = vld [vmem:[%s949_s1 + $0x188] sm:$0xff]  ;;  %v53_v14 = vld [vmem:[%s949_s1 + $0x98] sm:$0xff] }
   0x3   :  { %v34_v6 = vld [vmem:[%s949_s1] sm:$0xff]  ;;  %v35_v7 = vld [vmem:[%s949_s1 + $0x8] sm:$0xff]  ;;  %v569_v8 = vpack.c.bf16 %v83_v5, %v82_v2  ;;  %v84_v15 = vld [vmem:[%s949_s1 + $0x190] sm:$0xff]  ;;  %v541_v17 = vpack.c.bf16 %v53_v14, %v52_v12 }
   0x4   :  { %v539_v9 = vpack.c.bf16 %v35_v7, %v34_v6  ;;  %v66_v10 = vld [vmem:[%s949_s1 + $0x100] sm:$0xff]  ;;  %v67_v11 = vld [vmem:[%s949_s1 + $0x108] sm:$0xff]  ;;  %538 = vmatprep.subr.bf16.mxu0 %v537_v4  ;;  %v85_v16 = vld [vmem:[%s949_s1 + $0x198] sm:$0xff] }
   0x5   :  { %v571_v13 = vpack.c.bf16 %v67_v11, %v66_v10  ;;  %570 = vmatprep.subr.bf16.mxu1 %v569_v8  ;;  %v573_v18 = vpack.c.bf16 %v85_v16, %v84_v15  ;;  %v36_v19 = vld [vmem:[%s949_s1 + $0x10] sm:$0xff]  ;;  %v37_v20 = vld [vmem:[%s949_s1 + $0x18] sm:$0xff]  ;;  %v54_v24 = vld [vmem:[%s949_s1 + $0xa0] sm:$0xff] }
   0x6   :  { %540 = vmatpush3.bf16.msra.mxu0 %v539_v9  ;;  %v68_v21 = vld [vmem:[%s949_s1 + $0x110] sm:$0xff]  ;;  %v543_v22 = vpack.c.bf16 %v37_v20, %v36_v19  ;;  %v69_v23 = vld [vmem:[%s949_s1 + $0x118] sm:$0xff]  ;;  %v55_v25 = vld [vmem:[%s949_s1 + $0xa8] sm:$0xff] }
   0x7   :  { %572 = vmatpush3.bf16.msra.mxu1 %v571_v13  ;;  %542 = vmatprep.subr.bf16.mxu0 %v541_v17  ;;  %v575_v26 = vpack.c.bf16 %v69_v23, %v68_v21  ;;  %v545_v27 = vpack.c.bf16 %v55_v25, %v54_v24  ;;  %v86_v28 = vld [vmem:[%s949_s1 + $0x1a0] sm:$0xff]  ;;  %v87_v29 = vld [vmem:[%s949_s1 + $0x1a8] sm:$0xff]  ;;  %v56_v36 = vld [vmem:[%s949_s1 + $0xb0] sm:$0xff] }
   0x8   :  { %574 = vmatprep.subr.bf16.mxu1 %v573_v18  ;;  %v38_v30 = vld [vmem:[%s949_s1 + $0x20] sm:$0xff]  ;;  %v577_v31 = vpack.c.bf16 %v87_v29, %v86_v28  ;;  %v39_v32 = vld [vmem:[%s949_s1 + $0x28] sm:$0xff]  ;;  %v57_v37 = vld [vmem:[%s949_s1 + $0xb8] sm:$0xff] }
   0x9   :  { %v70_v33 = vld [vmem:[%s949_s1 + $0x120] sm:$0xff]  ;;  %v71_v34 = vld [vmem:[%s949_s1 + $0x128] sm:$0xff]  ;;  %v547_v35 = vpack.c.bf16 %v39_v32, %v38_v30  ;;  %v88_v38 = vld [vmem:[%s949_s1 + $0x1b0] sm:$0xff]  ;;  %v549_v40 = vpack.c.bf16 %v57_v37, %v56_v36 }
   0xa   :  { %544 = vmatpush3.bf16.msra.mxu0 %v543_v22  ;;  %v579_v39 = vpack.c.bf16 %v71_v34, %v70_v33  ;;  %v89_v41 = vld [vmem:[%s949_s1 + $0x1b8] sm:$0xff]  ;;  %v40_v42 = vld [vmem:[%s949_s1 + $0x30] sm:$0xff]  ;;  %v58_v47 = vld [vmem:[%s949_s1 + $0xc0] sm:$0xff] }
   0xb   :  { %576 = vmatpush3.bf16.msra.mxu1 %v575_v26  ;;  %546 = vmatprep.subr.bf16.mxu0 %v545_v27  ;;  %v41_v43 = vld [vmem:[%s949_s1 + $0x38] sm:$0xff]  ;;  %v581_v44 = vpack.c.bf16 %v89_v41, %v88_v38  ;;  %v72_v45 = vld [vmem:[%s949_s1 + $0x130] sm:$0xff]  ;;  %v59_v48 = vld [vmem:[%s949_s1 + $0xc8] sm:$0xff] }
   0xc   :  { %578 = vmatprep.subr.bf16.mxu1 %v577_v31  ;;  %v73_v46 = vld [vmem:[%s949_s1 + $0x138] sm:$0xff]  ;;  %v90_v49 = vld [vmem:[%s949_s1 + $0x1c0] sm:$0xff]  ;;  %v91_v50 = vld [vmem:[%s949_s1 + $0x1c8] sm:$0xff]  ;;  %v551_v51 = vpack.c.bf16 %v41_v43, %v40_v42  ;;  %v553_v53 = vpack.c.bf16 %v59_v48, %v58_v47 }
   0xd   :  { %v583_v52 = vpack.c.bf16 %v73_v46, %v72_v45  ;;  %v42_v54 = vld [vmem:[%s949_s1 + $0x40] sm:$0xff]  ;;  %v43_v55 = vld [vmem:[%s949_s1 + $0x48] sm:$0xff]  ;;  %v585_v57 = vpack.c.bf16 %v91_v50, %v90_v49  ;;  %v60_v59 = vld [vmem:[%s949_s1 + $0xd0] sm:$0xff] }
   0xe   :  { %548 = vmatpush3.bf16.msra.mxu0 %v547_v35  ;;  %v74_v56 = vld [vmem:[%s949_s1 + $0x140] sm:$0xff]  ;;  %v75_v58 = vld [vmem:[%s949_s1 + $0x148] sm:$0xff]  ;;  %v61_v60 = vld [vmem:[%s949_s1 + $0xd8] sm:$0xff]  ;;  %v555_v63 = vpack.c.bf16 %v43_v55, %v42_v54 }
   0xf   :  { %580 = vmatpush3.bf16.msra.mxu1 %v579_v39  ;;  %550 = vmatprep.subr.bf16.mxu0 %v549_v40  ;;  %v92_v61 = vld [vmem:[%s949_s1 + $0x1d0] sm:$0xff]  ;;  %v93_v62 = vld [vmem:[%s949_s1 + $0x1d8] sm:$0xff]  ;;  %v587_v0 = vpack.c.bf16 %v75_v58, %v74_v56  ;;  %v557_v1 = vpack.c.bf16 %v61_v60, %v60_v59  ;;  %v62_v7 = vld [vmem:[%s949_s1 + $0xe0] sm:$0xff] }
  0x10   :  { %582 = vmatprep.subr.bf16.mxu1 %v581_v44  ;;  %v44_v2 = vld [vmem:[%s949_s1 + $0x50] sm:$0xff]  ;;  %v45_v3 = vld [vmem:[%s949_s1 + $0x58] sm:$0xff]  ;;  %v589_v5 = vpack.c.bf16 %v93_v62, %v92_v61  ;;  %v63_v8 = vld [vmem:[%s949_s1 + $0xe8] sm:$0xff] }
  0x11   :  { %v76_v4 = vld [vmem:[%s949_s1 + $0x150] sm:$0xff]  ;;  %v77_v6 = vld [vmem:[%s949_s1 + $0x158] sm:$0xff]  ;;  %v94_v9 = vld [vmem:[%s949_s1 + $0x1e0] sm:$0xff]  ;;  %v559_v11 = vpack.c.bf16 %v45_v3, %v44_v2  ;;  %v561_v15 = vpack.c.bf16 %v63_v8, %v62_v7 }
  0x12   :  { %552 = vmatpush3.bf16.msra.mxu0 %v551_v51  ;;  %v95_v10 = vld [vmem:[%s949_s1 + $0x1e8] sm:$0xff]  ;;  %v46_v12 = vld [vmem:[%s949_s1 + $0x60] sm:$0xff]  ;;  %v591_v14 = vpack.c.bf16 %v77_v6, %v76_v4  ;;  %v17_v18 = vld [vmem:[%s950_s0 + $0x18] sm:$0xff] }
  0x13   :  { %584 = vmatpush3.bf16.msra.mxu1 %v583_v52  ;;  %554 = vmatprep.subr.bf16.mxu0 %v553_v53  ;;  %v47_v13 = vld [vmem:[%s949_s1 + $0x68] sm:$0xff]  ;;  %v78_v16 = vld [vmem:[%s949_s1 + $0x160] sm:$0xff]  ;;  %v593_v19 = vpack.c.bf16 %v95_v10, %v94_v9  ;;  %v64_v21 = vld [vmem:[%s949_s1 + $0xf0] sm:$0xff] }
  0x14   :  { %586 = vmatprep.subr.bf16.mxu1 %v585_v57  ;;  %v15_v17 = vld [vmem:[%s950_s0 + $0x8] sm:$0xff]  ;;  %v65_v22 = vld [vmem:[%s949_s1 + $0xf8] sm:$0xff]  ;;  %v96_v23 = vld [vmem:[%s949_s1 + $0x1f0] sm:$0xff]  ;;  %292 = vmatprep.mubr.f32.mxu1 %v17_v18  ;;  %v563_v25 = vpack.c.bf16 %v47_v13, %v46_v12 }
  0x15   :  { %v79_v20 = vld [vmem:[%s949_s1 + $0x168] sm:$0xff]  ;;  %207 = vmatprep.mubr.f32.mxu0 %v15_v17  ;;  %v97_v24 = vld [vmem:[%s949_s1 + $0x1f8] sm:$0xff]  ;;  %v565_v27 = vpack.c.bf16 %v65_v22, %v64_v21  ;;  %v48_v28 = vld [vmem:[%s949_s1 + $0x70] sm:$0xff] }
  0x16   :  { %556 = vmatpush3.bf16.msra.mxu0 %v555_v63  ;;  %v595_v26 = vpack.c.bf16 %v79_v20, %v78_v16  ;;  %v49_v29 = vld [vmem:[%s949_s1 + $0x78] sm:$0xff]  ;;  %v80_v30 = vld [vmem:[%s949_s1 + $0x170] sm:$0xff]  ;;  %v597_v31 = vpack.c.bf16 %v97_v24, %v96_v23  ;;  %v98_v33 = vld [vmem:[%s949_s1 + $0x200] sm:$0xff] }
  0x17   :  { %588 = vmatpush3.bf16.msra.mxu1 %v587_v0  ;;  %558 = vmatprep.subr.bf16.mxu0 %v557_v1  ;;  %v81_v32 = vld [vmem:[%s949_s1 + $0x178] sm:$0xff]  ;;  %v99_v34 = vld [vmem:[%s949_s1 + $0x208] sm:$0xff]  ;;  %v567_v35 = vpack.c.bf16 %v49_v29, %v48_v28  ;;  %v106_v38 = vld [vmem:[%s951_s2] sm:$0xff] }
  0x18   :  { %590 = vmatprep.subr.bf16.mxu1 %v589_v5  ;;  %v599_v36 = vpack.c.bf16 %v81_v32, %v80_v30  ;;  %v601_v37 = vpack.c.bf16 %v99_v34, %v98_v33  ;;  %v100_v39 = vld [vmem:[%s949_s1 + $0x210] sm:$0xff]  ;;  %v101_v40 = vld [vmem:[%s949_s1 + $0x218] sm:$0xff]  ;;  %112 = vperm.xlu0 %626, %v106_v38   ;;  %v14_v42 = vld [vmem:[%s950_s0] sm:$0xff] }
  0x19   :  { %v108_v41 = vld [vmem:[%s951_s2 + $0x10] sm:$0xff]  ;;  %v107_v43 = vld [vmem:[%s951_s2 + $0x8] sm:$0xff]  ;;  %v605_v46 = vpack.c.bf16 %v101_v40, %v100_v39  ;;  %v22_v47 = vld [vmem:[%s950_s0 + $0x40] sm:$0xff] }
  0x1a   :  { %560 = vmatpush3.bf16.msra.mxu0 %v559_v11  ;;  %122 = vperm.xlu1 %627, %v108_v41   ;;  %v16_v44 = vld [vmem:[%s950_s0 + $0x10] sm:$0xff]  ;;  %v102_v48 = vld [vmem:[%s949_s1 + $0x220] sm:$0xff]  ;;  %v103_v49 = vld [vmem:[%s949_s1 + $0x228] sm:$0xff] }
  0x1b   :  { %592 = vmatpush3.bf16.msra.mxu1 %v591_v14  ;;  %562 = vmatprep.subr.bf16.mxu0 %v561_v15  ;;  %v20_v45 = vld [vmem:[%s950_s0 + $0x30] sm:$0xff]  ;;  %v19_v50 = vld [vmem:[%s950_s0 + $0x28] sm:$0xff]  ;;  %v21_v51 = vld [vmem:[%s950_s0 + $0x38] sm:$0xff]  ;;  %v609_v53 = vpack.c.bf16 %v103_v49, %v102_v48 }
  0x1c   :  { %594 = vmatprep.subr.bf16.mxu1 %v593_v19  ;;  %117 = vperm.xlu0 %626, %v107_v43   ;;  %v25_v52 = vld [vmem:[%s950_s0 + $0x58] sm:$0xff]  ;;  %v27_v54 = vld [vmem:[%s950_s0 + $0x68] sm:$0xff]  ;;  %v104_v55 = vld [vmem:[%s949_s1 + $0x230] sm:$0xff] }
  0x1d   :  { %v105_v56 = vld [vmem:[%s949_s1 + $0x238] sm:$0xff]  ;;  %v24_v57 = vld [vmem:[%s950_s0 + $0x50] sm:$0xff]  ;;  %v26_v58 = vld [vmem:[%s950_s0 + $0x60] sm:$0xff] }
  0x1e   :  { %564 = vmatpush3.bf16.msra.mxu0 %v563_v25  ;;  %v30_v59 = vld [vmem:[%s950_s0 + $0x80] sm:$0xff]  ;;  %v613_v60 = vpack.c.bf16 %v105_v56, %v104_v55  ;;  %v32_v61 = vld [vmem:[%s950_s0 + $0x90] sm:$0xff]  ;;  %v29_v62 = vld [vmem:[%s950_s0 + $0x78] sm:$0xff] }
  0x1f   :  { %596 = vmatpush3.bf16.msra.mxu1 %v595_v26  ;;  %566 = vmatprep.subr.bf16.mxu0 %v565_v27  ;;  %v31_v63 = vld [vmem:[%s950_s0 + $0x88] sm:$0xff]  ;;  %v18_v0 = vld [vmem:[%s950_s0 + $0x20] sm:$0xff]  ;;  %v28_v1 = vld [vmem:[%s950_s0 + $0x70] sm:$0xff] }
  0x20   :  { %598 = vmatprep.subr.bf16.mxu1 %v597_v31  ;;  %v109_v2 = vld [vmem:[%s951_s2 + $0x18] sm:$0xff]  ;;  %v23_v3 = vld [vmem:[%s950_s0 + $0x48] sm:$0xff] }
  0x21   :  { %v33_v4 = vld [vmem:[%s950_s0 + $0x98] sm:$0xff]  ;;  %127 = vperm.xlu1 %627, %v109_v2  }
  0x22   :  { %568 = vmatpush3.bf16.msra.mxu0 %v567_v35 }
  0x23   :  { %600 = vmatpush3.bf16.msra.mxu1 %v599_v36  ;;  %602 = vmatprep.subr.bf16.mxu0 %v601_v37 }
  0x24   :  { %617 = vmatprep.subr.bf16.mxu1 %v601_v37 }
  0x25   :  { %208 = vmatmul.mubr.f32.vlgmr.msra.gmra.mrb[0].mxu0 %v14_v42 }
  0x26   :  { %293 = vmatmul.mubr.f32.vlgmr.msra.gmra.mrb[0].mxu1 %v16_v44  ;;  %604 = vmatpush3.bf16.msra.mxu0 %v601_v37 }
  0x27   :  { %621 = vmatpush3.bf16.msra.mxu1 %v601_v37  ;;  %212 = vmatprep.mubr.f32.mxu0 %v20_v45 }
  0x28   :  { %297 = vmatprep.mubr.f32.mxu1 %v22_v47  ;;  %606 = vmatprep.subr.bf16.mxu0 %v605_v46 }
  0x29   :  { %213 = vmatmul.mubr.f32.gmra.mrb[2].mxu0 %v19_v50  ;;  %618 = vmatprep.subr.bf16.mxu1 %v605_v46 }
  0x2a   :  { %298 = vmatmul.mubr.f32.gmra.mrb[2].mxu1 %v21_v51  ;;  %608 = vmatpush3.bf16.msra.mxu0 %v605_v46 }
  0x2b   :  { %622 = vmatpush3.bf16.msra.mxu1 %v605_v46  ;;  %217 = vmatprep.mubr.f32.mxu0 %v25_v52 }
  0x2c   :  { %302 = vmatprep.mubr.f32.mxu1 %v27_v54  ;;  %610 = vmatprep.subr.bf16.mxu0 %v609_v53 }
  0x2d   :  { %218 = vmatmul.mubr.f32.gmra.mrb[4].mxu0 %v24_v57  ;;  %619 = vmatprep.subr.bf16.mxu1 %v609_v53 }
  0x2e   :  { %303 = vmatmul.mubr.f32.gmra.mrb[4].mxu1 %v26_v58  ;;  %612 = vmatpush3.bf16.msra.mxu0 %v609_v53 }
  0x2f   :  { %623 = vmatpush3.bf16.msra.mxu1 %v609_v53  ;;  %222 = vmatprep.mubr.f32.mxu0 %v30_v59 }
  0x30   :  { %307 = vmatprep.mubr.f32.mxu1 %v32_v61  ;;  %614 = vmatprep.subr.bf16.mxu0 %v613_v60 }
  0x31   :  { %223 = vmatmul.mubr.f32.gmra.mrb[6].mxu0 %v29_v62  ;;  %620 = vmatprep.subr.bf16.mxu1 %v613_v60 }
  0x32   :  { %308 = vmatmul.mubr.f32.gmra.mrb[6].mxu1 %v31_v63  ;;  %616 = vmatpush3.bf16.msra.mxu0 %v613_v60 }
  0x33   :  { %624 = vmatpush3.bf16.msra.mxu1 %v613_v60  ;;  %531 = vmatprep.mubr.msk.f32.mxu0 %vm130_vm0, %v18_v0 }
  0x34   :  { %534 = vmatprep.mubr.msk.f32.mxu1 %vm130_vm0, %v28_v1 }
  0x35   :  { %532 = vmatmul.mubr.msk.f32.vlgmr.msra.gmra.mrb[8].mxu0 %vm130_vm0, %v23_v3 }
  0x36   :  { %535 = vmatmul.mubr.msk.f32.vlgmr.msra.gmra.mrb[8].mxu1 %vm130_vm0, %v33_v4 }
  0x97   :  { %v113_v5 = vpop.permute.xlu0 %112 }
  0x99   :  { %v123_v21 = vpop.permute.xlu1 %122 }
  0x9b   :  { %v118_v14 = vpop.permute.xlu0 %117 }
  0xa0   :  { %v128_v37 = vpop.permute.xlu1 %127 }
  0xf8   :  { %v447_v6 = vpop.f32.mrb[0].mxu0 }
  0xf9   :  { %v448_v7 = vpop.f32.mrb[1].mxu0  ;;  %v491_v8 = vpop.f32.mrb[0].mxu1 }
  0xfa   :  { %v449_v9 = vadd.f32 %v448_v7, %v447_v6  ;;  %v492_v10 = vpop.f32.mrb[1].mxu1 }
  0xfb   :  { %v493_v11 = vadd.f32 %v492_v10, %v491_v8 }
  0xfc   :  { %v210_v12 = vadd.f32 %v449_v9, %v113_v5  ;;  %v450_v13 = vpop.f32.mrb[2].mxu0 }
  0xfd   :  { %v451_v15 = vpop.f32.mrb[3].mxu0  ;;  %v494_v16 = vpop.f32.mrb[2].mxu1 }
  0xfe   :  { %v452_v17 = vadd.f32 %v451_v15, %v450_v13  ;;  %v495_v18 = vpop.f32.mrb[3].mxu1  ;;  %v295_v19 = vadd.f32 %v493_v11, %v210_v12 }
  0xff   :  { %v496_v20 = vadd.f32 %v495_v18, %v494_v16 }
 0x100   :  { %v215_v22 = vadd.f32 %v452_v17, %v118_v14  ;;  %v453_v23 = vpop.f32.mrb[4].mxu0 }
 0x101   :  { %v454_v24 = vpop.f32.mrb[5].mxu0  ;;  %v497_v25 = vpop.f32.mrb[4].mxu1 }
 0x102   :  { %v455_v26 = vadd.f32 %v454_v24, %v453_v23  ;;  %v498_v27 = vpop.f32.mrb[5].mxu1  ;;  %v300_v28 = vadd.f32 %v496_v20, %v215_v22 }
 0x103   :  { %v499_v29 = vadd.f32 %v498_v27, %v497_v25 }
 0x104   :  { %v220_v30 = vadd.f32 %v455_v26, %v123_v21  ;;  %v456_v31 = vpop.f32.mrb[6].mxu0 }
 0x105   :  { %v457_v32 = vpop.f32.mrb[7].mxu0  ;;  %v500_v33 = vpop.f32.mrb[6].mxu1 }
 0x106   :  { %v458_v34 = vadd.f32 %v457_v32, %v456_v31  ;;  %v501_v35 = vpop.f32.mrb[7].mxu1  ;;  %v305_v36 = vadd.f32 %v499_v29, %v220_v30 }
 0x107   :  { %v502_v38 = vadd.f32 %v501_v35, %v500_v33 }
 0x108   :  { %v225_v39 = vadd.f32 %v458_v34, %v128_v37  ;;  %v533_v40 = vpop.f32.mrb[8].mxu0 }
 0x109   :  { %v385_v41 = vadd.f32 %v533_v40, %v300_v28  ;;  %v536_v42 = vpop.f32.mrb[8].mxu1  ;;  %v379_v43 = vpop.f32.mrb[9].mxu0 }
 0x10a   :  { %v310_v44 = vadd.f32 %v502_v38, %v225_v39  ;;  %v380_v45 = vadd.f32 %v379_v43, %v295_v19  ;;  %v389_v46 = vpop.f32.mrb[9].mxu1 }
 0x10b   :  { %v399_v47 = vmax.f32 %v385_v41, 0.0  ;;  %v390_v48 = vadd.f32 %v389_v46, %v305_v36 }
 0x10c   :  { %v395_v49 = vadd.f32 %v536_v42, %v310_v44  ;;  %v398_v50 = vmax.f32 %v380_v45, 0.0 }
 0x10d   :  { %404 = vst.msk [vmem:[%s952_s3 + $0x8] sm:$0xff] %vm402_vm1, %v399_v47  ;;  %v400_v51 = vmax.f32 %v390_v48, 0.0 }
 0x10e   :  { %v401_v52 = vmax.f32 %v395_v49, 0.0  ;;  %403 = vst.msk [vmem:[%s952_s3] sm:$0xff] %vm402_vm1, %v398_v50 }
 0x10f   :  { %405 = vst.msk [vmem:[%s952_s3 + $0x10] sm:$0xff] %vm402_vm1, %v400_v51 }
 0x110   :  { %406 = vst.msk [vmem:[%s952_s3 + $0x18] sm:$0xff] %vm402_vm1, %v401_v52 }

// kernel: cnn_base_forward.7
= control target key start
LH: loop header
LB: loop body
LE: loop exit
PB: predicated region body
PF: predicated region fallthrough
CT: control target
= control target key end

     0   :  { %s5829_s0 = inlined_call_operand.vmem [shape: f32[2,1568], index: 0, kind: input, shape index: {}]   ;;  %s5830_s1 = inlined_call_operand.vmem [shape: f32[1568,512], index: 1, kind: input, shape index: {}]   ;;  %s5831_s2 = inlined_call_operand.vmem [shape: f32[1,512], index: 2, kind: input, shape index: {}]   ;;  %s5832_s3 = inlined_call_operand.vmem [shape: f32[512,1], index: 3, kind: input, shape index: {}]   ;;  %s5833_s4 = inlined_call_operand.<no memory space> [shape: f32[1,1], index: 4, kind: input, shape index: {}]   ;;  %s5834_s5 = inlined_call_operand.hbm [shape: f32[2,512], index: 5, kind: output, shape index: {0}]   ;;  %s5835_s6 = inlined_call_operand.vmem [shape: f32[2,1], index: 6, kind: output, shape index: {1}]  }
   0x1   :  { %v12_v0 = vstv %s5833_s4 }
   0x2   :  { %13 = vst [vmem:[#allocation2] sm:$0x1] %v12_v0 }
   0x3   :  { %v30_v1 = vld [vmem:[%s5830_s1 + $0x8] sm:$0xff]  ;;  %v32_v3 = vld [vmem:[%s5830_s1 + $0x18] sm:$0xff]  ;;  %v29_v6 = vld [vmem:[%s5830_s1] sm:$0xff] }
   0x4   :  { %v34_v2 = vld [vmem:[%s5830_s1 + $0x28] sm:$0xff]  ;;  %v36_v5 = vld [vmem:[%s5830_s1 + $0x38] sm:$0xff]  ;;  %v33_v7 = vld [vmem:[%s5830_s1 + $0x20] sm:$0xff] }
   0x5   :  { %v2238_v4 = vpack.c.bf16 %v34_v2, %v30_v1  ;;  %v2630_v8 = vpack.c.bf16 %v36_v5, %v32_v3  ;;  %v2240_v9 = vpack.c.bf16 %v33_v7, %v29_v6  ;;  %v31_v10 = vld [vmem:[%s5830_s1 + $0x10] sm:$0xff]  ;;  %v38_v12 = vld [vmem:[%s5830_s1 + $0x48] sm:$0xff]  ;;  %v40_v15 = vld [vmem:[%s5830_s1 + $0x58] sm:$0xff] }
   0x6   :  { %v35_v11 = vld [vmem:[%s5830_s1 + $0x30] sm:$0xff]  ;;  %v42_v14 = vld [vmem:[%s5830_s1 + $0x68] sm:$0xff]  ;;  %v44_v16 = vld [vmem:[%s5830_s1 + $0x78] sm:$0xff] }
   0x7   :  { %2239 = vmatprep.subr.bf16.mxu0 %v2238_v4  ;;  %v2632_v13 = vpack.c.bf16 %v35_v11, %v31_v10  ;;  %2631 = vmatprep.subr.bf16.mxu1 %v2630_v8  ;;  %v2242_v17 = vpack.c.bf16 %v42_v14, %v38_v12  ;;  %v2634_v18 = vpack.c.bf16 %v44_v16, %v40_v15  ;;  %v37_v19 = vld [vmem:[%s5830_s1 + $0x40] sm:$0xff]  ;;  %v39_v21 = vld [vmem:[%s5830_s1 + $0x50] sm:$0xff]  ;;  %v46_v24 = vld [vmem:[%s5830_s1 + $0x88] sm:$0xff] }
   0x8   :  { %2241 = vmatpush1.bf16.msra.mxu0 %v2240_v9  ;;  %v41_v20 = vld [vmem:[%s5830_s1 + $0x60] sm:$0xff]  ;;  %v43_v23 = vld [vmem:[%s5830_s1 + $0x70] sm:$0xff]  ;;  %v50_v25 = vld [vmem:[%s5830_s1 + $0xa8] sm:$0xff] }
   0x9   :  { %2633 = vmatpush1.bf16.msra.mxu1 %v2632_v13  ;;  %v2244_v22 = vpack.c.bf16 %v41_v20, %v37_v19  ;;  %2243 = vmatprep.subr.bf16.mxu0 %v2242_v17  ;;  %v2636_v26 = vpack.c.bf16 %v43_v23, %v39_v21  ;;  %v2246_v27 = vpack.c.bf16 %v50_v25, %v46_v24  ;;  %v48_v28 = vld [vmem:[%s5830_s1 + $0x98] sm:$0xff]  ;;  %v45_v30 = vld [vmem:[%s5830_s1 + $0x80] sm:$0xff]  ;;  %v47_v33 = vld [vmem:[%s5830_s1 + $0x90] sm:$0xff] }
   0xa   :  { %2635 = vmatprep.subr.bf16.mxu1 %v2634_v18  ;;  %v52_v29 = vld [vmem:[%s5830_s1 + $0xb8] sm:$0xff]  ;;  %v49_v32 = vld [vmem:[%s5830_s1 + $0xa0] sm:$0xff]  ;;  %v51_v34 = vld [vmem:[%s5830_s1 + $0xb0] sm:$0xff] }
   0xb   :  { %v2638_v31 = vpack.c.bf16 %v52_v29, %v48_v28  ;;  %v2248_v35 = vpack.c.bf16 %v49_v32, %v45_v30  ;;  %v54_v36 = vld [vmem:[%s5830_s1 + $0xc8] sm:$0xff]  ;;  %v56_v38 = vld [vmem:[%s5830_s1 + $0xd8] sm:$0xff]  ;;  %v2640_v39 = vpack.c.bf16 %v51_v34, %v47_v33  ;;  %v53_v42 = vld [vmem:[%s5830_s1 + $0xc0] sm:$0xff] }
   0xc   :  { %2245 = vmatpush1.bf16.msra.mxu0 %v2244_v22  ;;  %v58_v37 = vld [vmem:[%s5830_s1 + $0xe8] sm:$0xff]  ;;  %v60_v41 = vld [vmem:[%s5830_s1 + $0xf8] sm:$0xff]  ;;  %v57_v43 = vld [vmem:[%s5830_s1 + $0xe0] sm:$0xff] }
   0xd   :  { %2637 = vmatpush1.bf16.msra.mxu1 %v2636_v26  ;;  %2247 = vmatprep.subr.bf16.mxu0 %v2246_v27  ;;  %v2250_v40 = vpack.c.bf16 %v58_v37, %v54_v36  ;;  %v2642_v44 = vpack.c.bf16 %v60_v41, %v56_v38  ;;  %v55_v45 = vld [vmem:[%s5830_s1 + $0xd0] sm:$0xff]  ;;  %v62_v47 = vld [vmem:[%s5830_s1 + $0x108] sm:$0xff]  ;;  %v64_v49 = vld [vmem:[%s5830_s1 + $0x118] sm:$0xff]  ;;  %v2252_v51 = vpack.c.bf16 %v57_v43, %v53_v42 }
   0xe   :  { %2639 = vmatprep.subr.bf16.mxu1 %v2638_v31  ;;  %v59_v46 = vld [vmem:[%s5830_s1 + $0xf0] sm:$0xff]  ;;  %v66_v48 = vld [vmem:[%s5830_s1 + $0x128] sm:$0xff]  ;;  %v68_v50 = vld [vmem:[%s5830_s1 + $0x138] sm:$0xff] }
   0xf   :  { %v2644_v52 = vpack.c.bf16 %v59_v46, %v55_v45  ;;  %v2254_v53 = vpack.c.bf16 %v66_v48, %v62_v47  ;;  %v61_v54 = vld [vmem:[%s5830_s1 + $0x100] sm:$0xff]  ;;  %v63_v56 = vld [vmem:[%s5830_s1 + $0x110] sm:$0xff]  ;;  %v2646_v57 = vpack.c.bf16 %v68_v50, %v64_v49  ;;  %v70_v59 = vld [vmem:[%s5830_s1 + $0x148] sm:$0xff]  ;;  %v815_v47 = vlaneseq }
  0x10   :  { %2249 = vmatpush1.bf16.msra.mxu0 %v2248_v35  ;;  %v65_v55 = vld [vmem:[%s5830_s1 + $0x120] sm:$0xff]  ;;  %v67_v58 = vld [vmem:[%s5830_s1 + $0x130] sm:$0xff]  ;;  %v74_v60 = vld [vmem:[%s5830_s1 + $0x168] sm:$0xff]  ;;  %v3144_v48 = vmov 1983009808  }
  0x11   :  { %2641 = vmatpush1.bf16.msra.mxu1 %v2640_v39  ;;  %2251 = vmatprep.subr.bf16.mxu0 %v2250_v40  ;;  %v72_v61 = vld [vmem:[%s5830_s1 + $0x158] sm:$0xff]  ;;  %v2256_v63 = vpack.c.bf16 %v65_v55, %v61_v54  ;;  %v2648_v0 = vpack.c.bf16 %v67_v58, %v63_v56  ;;  %v2258_v1 = vpack.c.bf16 %v74_v60, %v70_v59  ;;  %v69_v2 = vld [vmem:[%s5830_s1 + $0x140] sm:$0xff]  ;;  %v71_v4 = vld [vmem:[%s5830_s1 + $0x150] sm:$0xff]  ;;  %v841_v49 = vunpack.c.l.s4 %v3144_v48 }
  0x12   :  { %2643 = vmatprep.subr.bf16.mxu1 %v2642_v44  ;;  %v76_v62 = vld [vmem:[%s5830_s1 + $0x178] sm:$0xff]  ;;  %v73_v3 = vld [vmem:[%s5830_s1 + $0x160] sm:$0xff]  ;;  %v75_v6 = vld [vmem:[%s5830_s1 + $0x170] sm:$0xff] }
  0x13   :  { %v2650_v5 = vpack.c.bf16 %v76_v62, %v72_v61  ;;  %v78_v7 = vld [vmem:[%s5830_s1 + $0x188] sm:$0xff]  ;;  %v80_v9 = vld [vmem:[%s5830_s1 + $0x198] sm:$0xff]  ;;  %v2260_v11 = vpack.c.bf16 %v73_v3, %v69_v2  ;;  %v2652_v12 = vpack.c.bf16 %v75_v6, %v71_v4  ;;  %v77_v14 = vld [vmem:[%s5830_s1 + $0x180] sm:$0xff]  ;;  %v3437_v62 = vshrl.u32 %v815_v47, 7 }
  0x14   :  { %2253 = vmatpush1.bf16.msra.mxu0 %v2252_v51  ;;  %v82_v8 = vld [vmem:[%s5830_s1 + $0x1a8] sm:$0xff]  ;;  %v84_v10 = vld [vmem:[%s5830_s1 + $0x1b8] sm:$0xff]  ;;  %v81_v15 = vld [vmem:[%s5830_s1 + $0x1a0] sm:$0xff] }
  0x15   :  { %2645 = vmatpush1.bf16.msra.mxu1 %v2644_v52  ;;  %2255 = vmatprep.subr.bf16.mxu0 %v2254_v53  ;;  %v2262_v13 = vpack.c.bf16 %v82_v8, %v78_v7  ;;  %v79_v16 = vld [vmem:[%s5830_s1 + $0x190] sm:$0xff]  ;;  %v2654_v17 = vpack.c.bf16 %v84_v10, %v80_v9  ;;  %v86_v19 = vld [vmem:[%s5830_s1 + $0x1c8] sm:$0xff]  ;;  %v88_v21 = vld [vmem:[%s5830_s1 + $0x1d8] sm:$0xff]  ;;  %v2264_v23 = vpack.c.bf16 %v81_v15, %v77_v14 }
  0x16   :  { %2647 = vmatprep.subr.bf16.mxu1 %v2646_v57  ;;  %v83_v18 = vld [vmem:[%s5830_s1 + $0x1b0] sm:$0xff]  ;;  %v90_v20 = vld [vmem:[%s5830_s1 + $0x1e8] sm:$0xff]  ;;  %v92_v22 = vld [vmem:[%s5830_s1 + $0x1f8] sm:$0xff] }
  0x17   :  { %v2656_v24 = vpack.c.bf16 %v83_v18, %v79_v16  ;;  %v2266_v25 = vpack.c.bf16 %v90_v20, %v86_v19  ;;  %v85_v26 = vld [vmem:[%s5830_s1 + $0x1c0] sm:$0xff]  ;;  %v87_v28 = vld [vmem:[%s5830_s1 + $0x1d0] sm:$0xff]  ;;  %v2658_v29 = vpack.c.bf16 %v92_v22, %v88_v21  ;;  %v94_v31 = vld [vmem:[%s5830_s1 + $0x208] sm:$0xff] }
  0x18   :  { %2257 = vmatpush1.bf16.msra.mxu0 %v2256_v63  ;;  %v89_v27 = vld [vmem:[%s5830_s1 + $0x1e0] sm:$0xff]  ;;  %v91_v30 = vld [vmem:[%s5830_s1 + $0x1f0] sm:$0xff]  ;;  %v98_v32 = vld [vmem:[%s5830_s1 + $0x228] sm:$0xff]  ;;  %v842_v63 = vunpack.c.0.s8 %v841_v49 }
  0x19   :  { %2649 = vmatpush1.bf16.msra.mxu1 %v2648_v0  ;;  %2259 = vmatprep.subr.bf16.mxu0 %v2258_v1  ;;  %v96_v33 = vld [vmem:[%s5830_s1 + $0x218] sm:$0xff]  ;;  %v2268_v35 = vpack.c.bf16 %v89_v27, %v85_v26  ;;  %v2660_v36 = vpack.c.bf16 %v91_v30, %v87_v28  ;;  %v2270_v37 = vpack.c.bf16 %v98_v32, %v94_v31  ;;  %v93_v38 = vld [vmem:[%s5830_s1 + $0x200] sm:$0xff]  ;;  %v95_v40 = vld [vmem:[%s5830_s1 + $0x210] sm:$0xff] }
  0x1a   :  { %2651 = vmatprep.subr.bf16.mxu1 %v2650_v5  ;;  %v100_v34 = vld [vmem:[%s5830_s1 + $0x238] sm:$0xff]  ;;  %v97_v39 = vld [vmem:[%s5830_s1 + $0x220] sm:$0xff]  ;;  %v99_v42 = vld [vmem:[%s5830_s1 + $0x230] sm:$0xff] }
  0x1b   :  { %v2662_v41 = vpack.c.bf16 %v100_v34, %v96_v33  ;;  %v102_v43 = vld [vmem:[%s5830_s1 + $0x248] sm:$0xff]  ;;  %v104_v45 = vld [vmem:[%s5830_s1 + $0x258] sm:$0xff]  ;;  %v2272_v50 = vpack.c.bf16 %v97_v39, %v93_v38  ;;  %v2664_v51 = vpack.c.bf16 %v99_v42, %v95_v40  ;;  %v101_v53 = vld [vmem:[%s5830_s1 + $0x240] sm:$0xff] }
  0x1c   :  { %2261 = vmatpush1.bf16.msra.mxu0 %v2260_v11  ;;  %v106_v44 = vld [vmem:[%s5830_s1 + $0x268] sm:$0xff]  ;;  %v108_v46 = vld [vmem:[%s5830_s1 + $0x278] sm:$0xff]  ;;  %v105_v54 = vld [vmem:[%s5830_s1 + $0x260] sm:$0xff] }
  0x1d   :  { %2653 = vmatpush1.bf16.msra.mxu1 %v2652_v12  ;;  %2263 = vmatprep.subr.bf16.mxu0 %v2262_v13  ;;  %v2274_v52 = vpack.c.bf16 %v106_v44, %v102_v43  ;;  %v103_v55 = vld [vmem:[%s5830_s1 + $0x250] sm:$0xff]  ;;  %v2666_v56 = vpack.c.bf16 %v108_v46, %v104_v45  ;;  %v110_v58 = vld [vmem:[%s5830_s1 + $0x288] sm:$0xff]  ;;  %v112_v60 = vld [vmem:[%s5830_s1 + $0x298] sm:$0xff]  ;;  %v2276_v0 = vpack.c.bf16 %v105_v54, %v101_v53 }
  0x1e   :  { %2655 = vmatprep.subr.bf16.mxu1 %v2654_v17  ;;  %v107_v57 = vld [vmem:[%s5830_s1 + $0x270] sm:$0xff]  ;;  %v114_v59 = vld [vmem:[%s5830_s1 + $0x2a8] sm:$0xff]  ;;  %v116_v61 = vld [vmem:[%s5830_s1 + $0x2b8] sm:$0xff]  ;;  %v3464_v12 = vsub.s32 %v842_v63, %v3437_v62 }
  0x1f   :  { %v2668_v1 = vpack.c.bf16 %v107_v57, %v103_v55  ;;  %v2278_v2 = vpack.c.bf16 %v114_v59, %v110_v58  ;;  %v109_v3 = vld [vmem:[%s5830_s1 + $0x280] sm:$0xff]  ;;  %v111_v5 = vld [vmem:[%s5830_s1 + $0x290] sm:$0xff]  ;;  %v2670_v6 = vpack.c.bf16 %v116_v61, %v112_v60  ;;  %v118_v8 = vld [vmem:[%s5830_s1 + $0x2c8] sm:$0xff] }
  0x20   :  { %2265 = vmatpush1.bf16.msra.mxu0 %v2264_v23  ;;  %v113_v4 = vld [vmem:[%s5830_s1 + $0x2a0] sm:$0xff]  ;;  %v115_v7 = vld [vmem:[%s5830_s1 + $0x2b0] sm:$0xff]  ;;  %v122_v9 = vld [vmem:[%s5830_s1 + $0x2e8] sm:$0xff] }
  0x21   :  { %2657 = vmatpush1.bf16.msra.mxu1 %v2656_v24  ;;  %2267 = vmatprep.subr.bf16.mxu0 %v2266_v25  ;;  %v120_v10 = vld [vmem:[%s5830_s1 + $0x2d8] sm:$0xff]  ;;  %v2280_v13 = vpack.c.bf16 %v113_v4, %v109_v3  ;;  %v117_v14 = vld [vmem:[%s5830_s1 + $0x2c0] sm:$0xff]  ;;  %v2672_v15 = vpack.c.bf16 %v115_v7, %v111_v5  ;;  %v2282_v16 = vpack.c.bf16 %v122_v9, %v118_v8  ;;  %v119_v18 = vld [vmem:[%s5830_s1 + $0x2d0] sm:$0xff] }
  0x22   :  { %2659 = vmatprep.subr.bf16.mxu1 %v2658_v29  ;;  %v124_v11 = vld [vmem:[%s5830_s1 + $0x2f8] sm:$0xff]  ;;  %v121_v17 = vld [vmem:[%s5830_s1 + $0x2e0] sm:$0xff]  ;;  %v123_v19 = vld [vmem:[%s5830_s1 + $0x2f0] sm:$0xff] }
  0x23   :  { %v2674_v20 = vpack.c.bf16 %v124_v11, %v120_v10  ;;  %v126_v21 = vld [vmem:[%s5830_s1 + $0x308] sm:$0xff]  ;;  %v3487_v23 = vld [vmem:[%s5829_s0] sm:$0xff]  ;;  %v128_v24 = vld [vmem:[%s5830_s1 + $0x318] sm:$0xff]  ;;  %v2284_v27 = vpack.c.bf16 %v121_v17, %v117_v14  ;;  %v2676_v28 = vpack.c.bf16 %v123_v19, %v119_v18 }
  0x24   :  { %2269 = vmatpush1.bf16.msra.mxu0 %v2268_v35  ;;  %v130_v22 = vld [vmem:[%s5830_s1 + $0x328] sm:$0xff]  ;;  %v132_v25 = vld [vmem:[%s5830_s1 + $0x338] sm:$0xff]  ;;  %v3497_v26 = vrot.slane %v3487_v23, %v3464_v12  ;;  %v125_v30 = vld [vmem:[%s5830_s1 + $0x300] sm:$0xff]  ;;  %v839_v9 = vcombine.high %v3487_v23, %v3487_v23 }
  0x25   :  { %2661 = vmatpush1.bf16.msra.mxu1 %v2660_v36  ;;  %2271 = vmatprep.subr.bf16.mxu0 %v2270_v37  ;;  %v2286_v29 = vpack.c.bf16 %v130_v22, %v126_v21  ;;  %v129_v31 = vld [vmem:[%s5830_s1 + $0x320] sm:$0xff]  ;;  %v127_v32 = vld [vmem:[%s5830_s1 + $0x310] sm:$0xff]  ;;  %v2678_v34 = vpack.c.bf16 %v132_v25, %v128_v24  ;;  %v134_v36 = vld [vmem:[%s5830_s1 + $0x348] sm:$0xff] }
  0x26   :  { %2663 = vmatprep.subr.bf16.mxu1 %v2662_v41  ;;  %v854_v33 = vcombine.high %v3497_v26, %v3497_v26  ;;  %v131_v35 = vld [vmem:[%s5830_s1 + $0x330] sm:$0xff]  ;;  %v138_v37 = vld [vmem:[%s5830_s1 + $0x368] sm:$0xff]  ;;  %v136_v38 = vld [vmem:[%s5830_s1 + $0x358] sm:$0xff]  ;;  %v2288_v40 = vpack.c.bf16 %v129_v31, %v125_v30  ;;  %v3618_v25 = vrot.slane %v839_v9, %v3464_v12 }
  0x27   :  { %v140_v39 = vld [vmem:[%s5830_s1 + $0x378] sm:$0xff]  ;;  %v2680_v41 = vpack.c.bf16 %v131_v35, %v127_v32  ;;  %v2290_v42 = vpack.c.bf16 %v138_v37, %v134_v36  ;;  %v133_v43 = vld [vmem:[%s5830_s1 + $0x340] sm:$0xff]  ;;  %v135_v45 = vld [vmem:[%s5830_s1 + $0x350] sm:$0xff] }
  0x28   :  { %2273 = vmatpush1.bf16.msra.mxu0 %v2272_v50  ;;  %976 = vmatprep.mubr.f32.mxu0 %v854_v33  ;;  %v137_v44 = vld [vmem:[%s5830_s1 + $0x360] sm:$0xff]  ;;  %v2682_v46 = vpack.c.bf16 %v140_v39, %v136_v38  ;;  %v139_v47 = vld [vmem:[%s5830_s1 + $0x370] sm:$0xff]  ;;  %v142_v48 = vld [vmem:[%s5830_s1 + $0x388] sm:$0xff]  ;;  %v855_v39 = vcombine.high %v3618_v25, %v3618_v25 }
  0x29   :  { %2665 = vmatpush1.bf16.msra.mxu1 %v2664_v51  ;;  %2275 = vmatprep.subr.bf16.mxu0 %v2274_v52  ;;  %v146_v49 = vld [vmem:[%s5830_s1 + $0x3a8] sm:$0xff]  ;;  %v144_v50 = vld [vmem:[%s5830_s1 + $0x398] sm:$0xff]  ;;  %v2292_v52 = vpack.c.bf16 %v137_v44, %v133_v43  ;;  %v2684_v53 = vpack.c.bf16 %v139_v47, %v135_v45  ;;  %v141_v55 = vld [vmem:[%s5830_s1 + $0x380] sm:$0xff] }
  0x2a   :  { %2667 = vmatprep.subr.bf16.mxu1 %v2666_v56  ;;  %1473 = vmatprep.mubr.f32.mxu1 %v854_v33  ;;  %v148_v51 = vld [vmem:[%s5830_s1 + $0x3b8] sm:$0xff]  ;;  %v2294_v54 = vpack.c.bf16 %v146_v49, %v142_v48  ;;  %v145_v56 = vld [vmem:[%s5830_s1 + $0x3a0] sm:$0xff]  ;;  %v143_v57 = vld [vmem:[%s5830_s1 + $0x390] sm:$0xff] }
  0x2b   :  { %v2686_v58 = vpack.c.bf16 %v148_v51, %v144_v50  ;;  %v147_v59 = vld [vmem:[%s5830_s1 + $0x3b0] sm:$0xff]  ;;  %v150_v60 = vld [vmem:[%s5830_s1 + $0x3c8] sm:$0xff]  ;;  %v152_v63 = vld [vmem:[%s5830_s1 + $0x3d8] sm:$0xff] }
  0x2c   :  { %2277 = vmatpush1.bf16.msra.mxu0 %v2276_v0  ;;  %v154_v61 = vld [vmem:[%s5830_s1 + $0x3e8] sm:$0xff]  ;;  %v156_v0 = vld [vmem:[%s5830_s1 + $0x3f8] sm:$0xff]  ;;  %v149_v4 = vld [vmem:[%s5830_s1 + $0x3c0] sm:$0xff] }
  0x2d   :  { %2669 = vmatpush1.bf16.msra.mxu1 %v2668_v1  ;;  %2279 = vmatprep.subr.bf16.mxu0 %v2278_v2  ;;  %v2296_v1 = vpack.c.bf16 %v145_v56, %v141_v55  ;;  %v2688_v2 = vpack.c.bf16 %v147_v59, %v143_v57  ;;  %v2298_v3 = vpack.c.bf16 %v154_v61, %v150_v60  ;;  %v153_v5 = vld [vmem:[%s5830_s1 + $0x3e0] sm:$0xff]  ;;  %v155_v8 = vld [vmem:[%s5830_s1 + $0x3f0] sm:$0xff]  ;;  %v158_v10 = vld [vmem:[%s5830_s1 + $0x408] sm:$0xff] }
  0x2e   :  { %2671 = vmatprep.subr.bf16.mxu1 %v2670_v6  ;;  %v151_v6 = vld [vmem:[%s5830_s1 + $0x3d0] sm:$0xff]  ;;  %v2690_v7 = vpack.c.bf16 %v156_v0, %v152_v63  ;;  %v162_v11 = vld [vmem:[%s5830_s1 + $0x428] sm:$0xff]  ;;  %v164_v14 = vld [vmem:[%s5830_s1 + $0x438] sm:$0xff] }
  0x2f   :  { %v2302_v17 = vpack.c.bf16 %v162_v11, %v158_v10  ;;  %v157_v18 = vld [vmem:[%s5830_s1 + $0x400] sm:$0xff]  ;;  %v163_v22 = vld [vmem:[%s5830_s1 + $0x430] sm:$0xff]  ;;  %v166_v23 = vld [vmem:[%s5830_s1 + $0x448] sm:$0xff] }
  0x30   :  { %2281 = vmatpush1.bf16.msra.mxu0 %v2280_v13  ;;  %v160_v13 = vld [vmem:[%s5830_s1 + $0x418] sm:$0xff]  ;;  %v161_v19 = vld [vmem:[%s5830_s1 + $0x420] sm:$0xff]  ;;  %v170_v24 = vld [vmem:[%s5830_s1 + $0x468] sm:$0xff] }
  0x31   :  { %2673 = vmatpush1.bf16.msra.mxu1 %v2672_v15  ;;  %2283 = vmatprep.subr.bf16.mxu0 %v2282_v16  ;;  %v2300_v15 = vpack.c.bf16 %v153_v5, %v149_v4  ;;  %v2692_v16 = vpack.c.bf16 %v155_v8, %v151_v6  ;;  %v2694_v21 = vpack.c.bf16 %v164_v14, %v160_v13  ;;  %v165_v32 = vld [vmem:[%s5830_s1 + $0x440] sm:$0xff]  ;;  %v171_v36 = vld [vmem:[%s5830_s1 + $0x470] sm:$0xff]  ;;  %v174_v37 = vld [vmem:[%s5830_s1 + $0x488] sm:$0xff] }
  0x32   :  { %2675 = vmatprep.subr.bf16.mxu1 %v2674_v20  ;;  %v159_v20 = vld [vmem:[%s5830_s1 + $0x410] sm:$0xff]  ;;  %v2306_v31 = vpack.c.bf16 %v170_v24, %v166_v23  ;;  %v169_v33 = vld [vmem:[%s5830_s1 + $0x460] sm:$0xff]  ;;  %v178_v38 = vld [vmem:[%s5830_s1 + $0x4a8] sm:$0xff] }
  0x33   :  { %v2696_v30 = vpack.c.bf16 %v163_v22, %v159_v20  ;;  %v2310_v44 = vpack.c.bf16 %v178_v38, %v174_v37  ;;  %v173_v45 = vld [vmem:[%s5830_s1 + $0x480] sm:$0xff]  ;;  %v175_v47 = vld [vmem:[%s5830_s1 + $0x490] sm:$0xff]  ;;  %v182_v49 = vld [vmem:[%s5830_s1 + $0x4c8] sm:$0xff] }
  0x34   :  { %2285 = vmatpush1.bf16.msra.mxu0 %v2284_v27  ;;  %v168_v27 = vld [vmem:[%s5830_s1 + $0x458] sm:$0xff]  ;;  %v186_v50 = vld [vmem:[%s5830_s1 + $0x4e8] sm:$0xff]  ;;  %v181_v56 = vld [vmem:[%s5830_s1 + $0x4c0] sm:$0xff] }
  0x35   :  { %2677 = vmatpush1.bf16.msra.mxu1 %v2676_v28  ;;  %2287 = vmatprep.subr.bf16.mxu0 %v2286_v29  ;;  %v172_v28 = vld [vmem:[%s5830_s1 + $0x478] sm:$0xff]  ;;  %v2304_v29 = vpack.c.bf16 %v161_v19, %v157_v18  ;;  %v2314_v55 = vpack.c.bf16 %v186_v50, %v182_v49  ;;  %v185_v57 = vld [vmem:[%s5830_s1 + $0x4e0] sm:$0xff]  ;;  %v187_v60 = vld [vmem:[%s5830_s1 + $0x4f0] sm:$0xff] }
  0x36   :  { %2679 = vmatprep.subr.bf16.mxu1 %v2678_v34  ;;  %v167_v34 = vld [vmem:[%s5830_s1 + $0x450] sm:$0xff]  ;;  %v2698_v35 = vpack.c.bf16 %v172_v28, %v168_v27  ;;  %v184_v51 = vld [vmem:[%s5830_s1 + $0x4d8] sm:$0xff]  ;;  %v190_v61 = vld [vmem:[%s5830_s1 + $0x508] sm:$0xff] }
  0x37   :  { %v2700_v43 = vpack.c.bf16 %v171_v36, %v167_v34  ;;  %v194_v63 = vld [vmem:[%s5830_s1 + $0x528] sm:$0xff]  ;;  %v192_v0 = vld [vmem:[%s5830_s1 + $0x518] sm:$0xff]  ;;  %v189_v5 = vld [vmem:[%s5830_s1 + $0x500] sm:$0xff] }
  0x38   :  { %2289 = vmatpush1.bf16.msra.mxu0 %v2288_v40  ;;  %v176_v40 = vld [vmem:[%s5830_s1 + $0x498] sm:$0xff]  ;;  %v2318_v4 = vpack.c.bf16 %v194_v63, %v190_v61  ;;  %v193_v6 = vld [vmem:[%s5830_s1 + $0x520] sm:$0xff]  ;;  %v195_v9 = vld [vmem:[%s5830_s1 + $0x530] sm:$0xff] }
  0x39   :  { %2681 = vmatpush1.bf16.msra.mxu1 %v2680_v41  ;;  %2291 = vmatprep.subr.bf16.mxu0 %v2290_v42  ;;  %v180_v41 = vld [vmem:[%s5830_s1 + $0x4b8] sm:$0xff]  ;;  %v2308_v42 = vpack.c.bf16 %v169_v33, %v165_v32  ;;  %v198_v10 = vld [vmem:[%s5830_s1 + $0x548] sm:$0xff]  ;;  %v197_v18 = vld [vmem:[%s5830_s1 + $0x540] sm:$0xff] }
  0x3a   :  { %2683 = vmatprep.subr.bf16.mxu1 %v2682_v46  ;;  %v177_v46 = vld [vmem:[%s5830_s1 + $0x4a0] sm:$0xff]  ;;  %v2702_v48 = vpack.c.bf16 %v180_v41, %v176_v40  ;;  %v202_v11 = vld [vmem:[%s5830_s1 + $0x568] sm:$0xff]  ;;  %v200_v13 = vld [vmem:[%s5830_s1 + $0x558] sm:$0xff] }
  0x3b   :  { %v204_v14 = vld [vmem:[%s5830_s1 + $0x578] sm:$0xff]  ;;  %v201_v19 = vld [vmem:[%s5830_s1 + $0x560] sm:$0xff]  ;;  %v199_v20 = vld [vmem:[%s5830_s1 + $0x550] sm:$0xff] }
  0x3c   :  { %2293 = vmatpush1.bf16.msra.mxu0 %v2292_v52  ;;  %v188_v52 = vld [vmem:[%s5830_s1 + $0x4f8] sm:$0xff]  ;;  %v203_v22 = vld [vmem:[%s5830_s1 + $0x570] sm:$0xff]  ;;  %v206_v23 = vld [vmem:[%s5830_s1 + $0x588] sm:$0xff] }
  0x3d   :  { %2685 = vmatpush1.bf16.msra.mxu1 %v2684_v53  ;;  %2295 = vmatprep.subr.bf16.mxu0 %v2294_v54  ;;  %v2312_v53 = vpack.c.bf16 %v177_v46, %v173_v45  ;;  %v2706_v59 = vpack.c.bf16 %v188_v52, %v184_v51  ;;  %v210_v24 = vld [vmem:[%s5830_s1 + $0x5a8] sm:$0xff]  ;;  %v208_v27 = vld [vmem:[%s5830_s1 + $0x598] sm:$0xff]  ;;  %v205_v32 = vld [vmem:[%s5830_s1 + $0x580] sm:$0xff] }
  0x3e   :  { %2687 = vmatprep.subr.bf16.mxu1 %v2686_v58  ;;  %v183_v58 = vld [vmem:[%s5830_s1 + $0x4d0] sm:$0xff]  ;;  %v212_v28 = vld [vmem:[%s5830_s1 + $0x5b8] sm:$0xff]  ;;  %v209_v33 = vld [vmem:[%s5830_s1 + $0x5a0] sm:$0xff] }
  0x3f   :  { %v207_v34 = vld [vmem:[%s5830_s1 + $0x590] sm:$0xff]  ;;  %v214_v37 = vld [vmem:[%s5830_s1 + $0x5c8] sm:$0xff]  ;;  %v220_v40 = vld [vmem:[%s5830_s1 + $0x5f8] sm:$0xff]  ;;  %v2328_v41 = vpack.c.bf16 %v209_v33, %v205_v32 }
  0x40   :  { %2297 = vmatpush1.bf16.msra.mxu0 %v2296_v1  ;;  %v196_v1 = vld [vmem:[%s5830_s1 + $0x538] sm:$0xff]  ;;  %v211_v36 = vld [vmem:[%s5830_s1 + $0x5b0] sm:$0xff]  ;;  %v218_v38 = vld [vmem:[%s5830_s1 + $0x5e8] sm:$0xff] }
  0x41   :  { %2689 = vmatpush1.bf16.msra.mxu1 %v2688_v2  ;;  %2299 = vmatprep.subr.bf16.mxu0 %v2298_v3  ;;  %v2316_v2 = vpack.c.bf16 %v185_v57, %v181_v56  ;;  %v2708_v3 = vpack.c.bf16 %v187_v60, %v183_v58  ;;  %v2710_v8 = vpack.c.bf16 %v196_v1, %v192_v0  ;;  %v217_v45 = vld [vmem:[%s5830_s1 + $0x5e0] sm:$0xff]  ;;  %v215_v46 = vld [vmem:[%s5830_s1 + $0x5d0] sm:$0xff]  ;;  %v226_v49 = vld [vmem:[%s5830_s1 + $0x628] sm:$0xff] }
  0x42   :  { %2691 = vmatprep.subr.bf16.mxu1 %v2690_v7  ;;  %v191_v7 = vld [vmem:[%s5830_s1 + $0x510] sm:$0xff]  ;;  %v224_v50 = vld [vmem:[%s5830_s1 + $0x618] sm:$0xff]  ;;  %v225_v56 = vld [vmem:[%s5830_s1 + $0x620] sm:$0xff] }
  0x43   :  { %v228_v51 = vld [vmem:[%s5830_s1 + $0x638] sm:$0xff]  ;;  %v223_v57 = vld [vmem:[%s5830_s1 + $0x610] sm:$0xff]  ;;  %v230_v60 = vld [vmem:[%s5830_s1 + $0x648] sm:$0xff] }
  0x44   :  { %2301 = vmatpush1.bf16.msra.mxu0 %v2300_v15  ;;  %v2320_v15 = vpack.c.bf16 %v193_v6, %v189_v5  ;;  %v2726_v58 = vpack.c.bf16 %v228_v51, %v224_v50  ;;  %v234_v61 = vld [vmem:[%s5830_s1 + $0x668] sm:$0xff]  ;;  %v232_v63 = vld [vmem:[%s5830_s1 + $0x658] sm:$0xff]  ;;  %v233_v5 = vld [vmem:[%s5830_s1 + $0x660] sm:$0xff] }
  0x45   :  { %2693 = vmatpush1.bf16.msra.mxu1 %v2692_v16  ;;  %2303 = vmatprep.subr.bf16.mxu0 %v2302_v17  ;;  %v2712_v16 = vpack.c.bf16 %v195_v9, %v191_v7  ;;  %v2322_v17 = vpack.c.bf16 %v202_v11, %v198_v10  ;;  %v236_v0 = vld [vmem:[%s5830_s1 + $0x678] sm:$0xff]  ;;  %v231_v6 = vld [vmem:[%s5830_s1 + $0x650] sm:$0xff]  ;;  %v238_v9 = vld [vmem:[%s5830_s1 + $0x688] sm:$0xff] }
  0x46   :  { %2695 = vmatprep.subr.bf16.mxu1 %v2694_v21  ;;  %v2714_v21 = vpack.c.bf16 %v204_v14, %v200_v13  ;;  %v2730_v7 = vpack.c.bf16 %v236_v0, %v232_v63  ;;  %v242_v10 = vld [vmem:[%s5830_s1 + $0x6a8] sm:$0xff]  ;;  %v240_v11 = vld [vmem:[%s5830_s1 + $0x698] sm:$0xff]  ;;  %v249_v32 = vld [vmem:[%s5830_s1 + $0x6e0] sm:$0xff] }
  0x47   :  { %977 = vmatmul.mubr.f32.vlgmr.msra.gmra.mrb[0].mxu0 %v3497_v26  ;;  %v244_v13 = vld [vmem:[%s5830_s1 + $0x6b8] sm:$0xff]  ;;  %v247_v33 = vld [vmem:[%s5830_s1 + $0x6d0] sm:$0xff] }
  0x48   :  { %2305 = vmatpush1.bf16.msra.mxu0 %v2304_v29  ;;  %1474 = vmatmul.mubr.f32.vlgmr.msra.gmra.mrb[0].mxu1 %v3497_v26  ;;  %v179_v26 = vld [vmem:[%s5830_s1 + $0x4b0] sm:$0xff]  ;;  %v2324_v29 = vpack.c.bf16 %v201_v19, %v197_v18  ;;  %v241_v18 = vld [vmem:[%s5830_s1 + $0x6a0] sm:$0xff]  ;;  %v268_v50 = vld [vmem:[%s5830_s1 + $0x778] sm:$0xff] }
  0x49   :  { %2697 = vmatpush1.bf16.msra.mxu1 %v2696_v30  ;;  %2307 = vmatprep.subr.bf16.mxu0 %v2306_v31  ;;  %v2704_v54 = vpack.c.bf16 %v179_v26, %v175_v47  ;;  %v2716_v30 = vpack.c.bf16 %v203_v22, %v199_v20  ;;  %v2326_v31 = vpack.c.bf16 %v210_v24, %v206_v23  ;;  %v222_v26 = vld [vmem:[%s5830_s1 + $0x608] sm:$0xff]  ;;  %v239_v19 = vld [vmem:[%s5830_s1 + $0x690] sm:$0xff]  ;;  %v248_v24 = vld [vmem:[%s5830_s1 + $0x6d8] sm:$0xff] }
  0x4a   :  { %2699 = vmatprep.subr.bf16.mxu1 %v2698_v35  ;;  %1047 = vmatprep.mubr.f32.mxu0 %v855_v39  ;;  %v2718_v35 = vpack.c.bf16 %v212_v28, %v208_v27  ;;  %v2734_v20 = vpack.c.bf16 %v244_v13, %v240_v11  ;;  %v246_v22 = vld [vmem:[%s5830_s1 + $0x6c8] sm:$0xff]  ;;  %v252_v27 = vld [vmem:[%s5830_s1 + $0x6f8] sm:$0xff] }
  0x4b   :  { %1544 = vmatprep.mubr.f32.mxu1 %v855_v39  ;;  %v216_v39 = vld [vmem:[%s5830_s1 + $0x5d8] sm:$0xff]  ;;  %v250_v23 = vld [vmem:[%s5830_s1 + $0x6e8] sm:$0xff] }
  0x4c   :  { %2309 = vmatpush1.bf16.msra.mxu0 %v2308_v42  ;;  %v2720_v42 = vpack.c.bf16 %v211_v36, %v207_v34  ;;  %v2722_v47 = vpack.c.bf16 %v220_v40, %v216_v39  ;;  %v2738_v34 = vpack.c.bf16 %v252_v27, %v248_v24  ;;  %v254_v36 = vld [vmem:[%s5830_s1 + $0x708] sm:$0xff]  ;;  %v260_v39 = vld [vmem:[%s5830_s1 + $0x738] sm:$0xff] }
  0x4d   :  { %2701 = vmatpush1.bf16.msra.mxu1 %v2700_v43  ;;  %2311 = vmatprep.subr.bf16.mxu0 %v2310_v44  ;;  %v2330_v43 = vpack.c.bf16 %v218_v38, %v214_v37  ;;  %v213_v44 = vld [vmem:[%s5830_s1 + $0x5c0] sm:$0xff]  ;;  %v258_v37 = vld [vmem:[%s5830_s1 + $0x728] sm:$0xff]  ;;  %v256_v38 = vld [vmem:[%s5830_s1 + $0x718] sm:$0xff] }
  0x4e   :  { %2703 = vmatprep.subr.bf16.mxu1 %v2702_v48  ;;  %v219_v48 = vld [vmem:[%s5830_s1 + $0x5f0] sm:$0xff]  ;;  %v2332_v52 = vpack.c.bf16 %v217_v45, %v213_v44  ;;  %v257_v44 = vld [vmem:[%s5830_s1 + $0x720] sm:$0xff]  ;;  %v276_v63 = vld [vmem:[%s5830_s1 + $0x7b8] sm:$0xff] }
  0x4f   :  { %v255_v45 = vld [vmem:[%s5830_s1 + $0x710] sm:$0xff]  ;;  %v284_v11 = vld [vmem:[%s5830_s1 + $0x7f8] sm:$0xff] }
  0x50   :  { %2313 = vmatpush1.bf16.msra.mxu0 %v2312_v53  ;;  %v2724_v53 = vpack.c.bf16 %v219_v48, %v215_v46  ;;  %v2742_v46 = vpack.c.bf16 %v260_v39, %v256_v38  ;;  %v262_v48 = vld [vmem:[%s5830_s1 + $0x748] sm:$0xff]  ;;  %v292_v24 = vld [vmem:[%s5830_s1 + $0x838] sm:$0xff] }
  0x51   :  { %2705 = vmatpush1.bf16.msra.mxu1 %v2704_v54  ;;  %2315 = vmatprep.subr.bf16.mxu0 %v2314_v55  ;;  %v2334_v54 = vpack.c.bf16 %v226_v49, %v222_v26  ;;  %v221_v55 = vld [vmem:[%s5830_s1 + $0x600] sm:$0xff]  ;;  %v266_v26 = vld [vmem:[%s5830_s1 + $0x768] sm:$0xff]  ;;  %v264_v49 = vld [vmem:[%s5830_s1 + $0x758] sm:$0xff] }
  0x52   :  { %2707 = vmatprep.subr.bf16.mxu1 %v2706_v59  ;;  %v227_v59 = vld [vmem:[%s5830_s1 + $0x630] sm:$0xff]  ;;  %v2336_v1 = vpack.c.bf16 %v225_v56, %v221_v55  ;;  %v265_v55 = vld [vmem:[%s5830_s1 + $0x760] sm:$0xff]  ;;  %v300_v38 = vld [vmem:[%s5830_s1 + $0x878] sm:$0xff] }
  0x53   :  { %v263_v56 = vld [vmem:[%s5830_s1 + $0x750] sm:$0xff] }
  0x54   :  { %2317 = vmatpush1.bf16.msra.mxu0 %v2316_v2  ;;  %v2728_v2 = vpack.c.bf16 %v227_v59, %v223_v57  ;;  %v2746_v57 = vpack.c.bf16 %v268_v50, %v264_v49  ;;  %v270_v59 = vld [vmem:[%s5830_s1 + $0x788] sm:$0xff]  ;;  %v304_v50 = vld [vmem:[%s5830_s1 + $0x898] sm:$0xff] }
  0x55   :  { %2709 = vmatpush1.bf16.msra.mxu1 %v2708_v3  ;;  %2319 = vmatprep.subr.bf16.mxu0 %v2318_v4  ;;  %v2338_v3 = vpack.c.bf16 %v234_v61, %v230_v60  ;;  %v229_v4 = vld [vmem:[%s5830_s1 + $0x640] sm:$0xff]  ;;  %v274_v60 = vld [vmem:[%s5830_s1 + $0x7a8] sm:$0xff]  ;;  %v272_v61 = vld [vmem:[%s5830_s1 + $0x798] sm:$0xff] }
  0x56   :  { %2711 = vmatprep.subr.bf16.mxu1 %v2710_v8  ;;  %v235_v8 = vld [vmem:[%s5830_s1 + $0x670] sm:$0xff]  ;;  %v2340_v14 = vpack.c.bf16 %v233_v5, %v229_v4  ;;  %v273_v4 = vld [vmem:[%s5830_s1 + $0x7a0] sm:$0xff]  ;;  %v306_v49 = vld [vmem:[%s5830_s1 + $0x8a8] sm:$0xff] }
  0x57   :  { %v271_v5 = vld [vmem:[%s5830_s1 + $0x790] sm:$0xff] }
  0x58   :  { %2321 = vmatpush1.bf16.msra.mxu0 %v2320_v15  ;;  %v2732_v15 = vpack.c.bf16 %v235_v8, %v231_v6  ;;  %v2750_v6 = vpack.c.bf16 %v276_v63, %v272_v61  ;;  %v278_v8 = vld [vmem:[%s5830_s1 + $0x7c8] sm:$0xff]  ;;  %v312_v63 = vld [vmem:[%s5830_s1 + $0x8d8] sm:$0xff] }
  0x59   :  { %2713 = vmatpush1.bf16.msra.mxu1 %v2712_v16  ;;  %2323 = vmatprep.subr.bf16.mxu0 %v2322_v17  ;;  %v2342_v16 = vpack.c.bf16 %v242_v10, %v238_v9  ;;  %v237_v17 = vld [vmem:[%s5830_s1 + $0x680] sm:$0xff]  ;;  %v282_v9 = vld [vmem:[%s5830_s1 + $0x7e8] sm:$0xff]  ;;  %v280_v10 = vld [vmem:[%s5830_s1 + $0x7d8] sm:$0xff] }
  0x5a   :  { %2715 = vmatprep.subr.bf16.mxu1 %v2714_v21  ;;  %v243_v21 = vld [vmem:[%s5830_s1 + $0x6b0] sm:$0xff]  ;;  %v2344_v28 = vpack.c.bf16 %v241_v18, %v237_v17  ;;  %v281_v17 = vld [vmem:[%s5830_s1 + $0x7e0] sm:$0xff]  ;;  %v314_v61 = vld [vmem:[%s5830_s1 + $0x8e8] sm:$0xff] }
  0x5b   :  { %v279_v18 = vld [vmem:[%s5830_s1 + $0x7d0] sm:$0xff] }
  0x5c   :  { %2325 = vmatpush1.bf16.msra.mxu0 %v2324_v29  ;;  %v2736_v29 = vpack.c.bf16 %v243_v21, %v239_v19  ;;  %v2754_v19 = vpack.c.bf16 %v284_v11, %v280_v10  ;;  %v286_v21 = vld [vmem:[%s5830_s1 + $0x808] sm:$0xff]  ;;  %v320_v11 = vld [vmem:[%s5830_s1 + $0x918] sm:$0xff] }
  0x5d   :  { %2717 = vmatpush1.bf16.msra.mxu1 %v2716_v30  ;;  %2327 = vmatprep.subr.bf16.mxu0 %v2326_v31  ;;  %v2346_v30 = vpack.c.bf16 %v250_v23, %v246_v22  ;;  %v245_v31 = vld [vmem:[%s5830_s1 + $0x6c0] sm:$0xff]  ;;  %v290_v22 = vld [vmem:[%s5830_s1 + $0x828] sm:$0xff]  ;;  %v288_v23 = vld [vmem:[%s5830_s1 + $0x818] sm:$0xff] }
  0x5e   :  { %2719 = vmatprep.subr.bf16.mxu1 %v2718_v35  ;;  %v251_v35 = vld [vmem:[%s5830_s1 + $0x6f0] sm:$0xff]  ;;  %v2348_v40 = vpack.c.bf16 %v249_v32, %v245_v31  ;;  %v289_v31 = vld [vmem:[%s5830_s1 + $0x820] sm:$0xff]  ;;  %v322_v10 = vld [vmem:[%s5830_s1 + $0x928] sm:$0xff] }
  0x5f   :  { %v287_v32 = vld [vmem:[%s5830_s1 + $0x810] sm:$0xff] }
  0x60   :  { %2329 = vmatpush1.bf16.msra.mxu0 %v2328_v41  ;;  %v2740_v41 = vpack.c.bf16 %v251_v35, %v247_v33  ;;  %v2758_v33 = vpack.c.bf16 %v292_v24, %v288_v23  ;;  %v294_v35 = vld [vmem:[%s5830_s1 + $0x848] sm:$0xff]  ;;  %v328_v24 = vld [vmem:[%s5830_s1 + $0x958] sm:$0xff] }
  0x61   :  { %2721 = vmatpush1.bf16.msra.mxu1 %v2720_v42  ;;  %2331 = vmatprep.subr.bf16.mxu0 %v2330_v43  ;;  %v2350_v42 = vpack.c.bf16 %v258_v37, %v254_v36  ;;  %v253_v43 = vld [vmem:[%s5830_s1 + $0x700] sm:$0xff]  ;;  %v298_v36 = vld [vmem:[%s5830_s1 + $0x868] sm:$0xff]  ;;  %v296_v37 = vld [vmem:[%s5830_s1 + $0x858] sm:$0xff] }
  0x62   :  { %2723 = vmatprep.subr.bf16.mxu1 %v2722_v47  ;;  %v259_v47 = vld [vmem:[%s5830_s1 + $0x730] sm:$0xff]  ;;  %v2352_v51 = vpack.c.bf16 %v257_v44, %v253_v43  ;;  %v293_v43 = vld [vmem:[%s5830_s1 + $0x840] sm:$0xff]  ;;  %v330_v23 = vld [vmem:[%s5830_s1 + $0x968] sm:$0xff] }
  0x63   :  { %v297_v44 = vld [vmem:[%s5830_s1 + $0x860] sm:$0xff] }
  0x64   :  { %2333 = vmatpush1.bf16.msra.mxu0 %v2332_v52  ;;  %v2744_v52 = vpack.c.bf16 %v259_v47, %v255_v45  ;;  %v295_v45 = vld [vmem:[%s5830_s1 + $0x850] sm:$0xff]  ;;  %v2762_v47 = vpack.c.bf16 %v300_v38, %v296_v37  ;;  %v338_v37 = vld [vmem:[%s5830_s1 + $0x9a8] sm:$0xff]  ;;  %v336_v38 = vld [vmem:[%s5830_s1 + $0x998] sm:$0xff] }
  0x65   :  { %2725 = vmatpush1.bf16.msra.mxu1 %v2724_v53  ;;  %2335 = vmatprep.subr.bf16.mxu0 %v2334_v54  ;;  %v2354_v53 = vpack.c.bf16 %v266_v26, %v262_v48  ;;  %v261_v54 = vld [vmem:[%s5830_s1 + $0x740] sm:$0xff]  ;;  %v299_v48 = vld [vmem:[%s5830_s1 + $0x870] sm:$0xff]  ;;  %v302_v26 = vld [vmem:[%s5830_s1 + $0x888] sm:$0xff] }
  0x66   :  { %2727 = vmatprep.subr.bf16.mxu1 %v2726_v58  ;;  %v267_v58 = vld [vmem:[%s5830_s1 + $0x770] sm:$0xff]  ;;  %v2356_v0 = vpack.c.bf16 %v265_v55, %v261_v54  ;;  %v2764_v54 = vpack.c.bf16 %v299_v48, %v295_v45  ;;  %v2374_v55 = vpack.c.bf16 %v306_v49, %v302_v26  ;;  %v337_v45 = vld [vmem:[%s5830_s1 + $0x9a0] sm:$0xff]  ;;  %v342_v49 = vld [vmem:[%s5830_s1 + $0x9c8] sm:$0xff] }
  0x67   :  { %v339_v26 = vld [vmem:[%s5830_s1 + $0x9b0] sm:$0xff] }
  0x68   :  { %2337 = vmatpush1.bf16.msra.mxu0 %v2336_v1  ;;  %v2748_v1 = vpack.c.bf16 %v267_v58, %v263_v56  ;;  %v301_v56 = vld [vmem:[%s5830_s1 + $0x880] sm:$0xff]  ;;  %v303_v58 = vld [vmem:[%s5830_s1 + $0x890] sm:$0xff] }
  0x69   :  { %2729 = vmatpush1.bf16.msra.mxu1 %v2728_v2  ;;  %2339 = vmatprep.subr.bf16.mxu0 %v2338_v3  ;;  %v2358_v2 = vpack.c.bf16 %v274_v60, %v270_v59  ;;  %v269_v3 = vld [vmem:[%s5830_s1 + $0x780] sm:$0xff]  ;;  %v310_v60 = vld [vmem:[%s5830_s1 + $0x8c8] sm:$0xff] }
  0x6a   :  { %2731 = vmatprep.subr.bf16.mxu1 %v2730_v7  ;;  %v275_v7 = vld [vmem:[%s5830_s1 + $0x7b0] sm:$0xff]  ;;  %v2360_v13 = vpack.c.bf16 %v273_v4, %v269_v3  ;;  %v2378_v3 = vpack.c.bf16 %v314_v61, %v310_v60  ;;  %v309_v4 = vld [vmem:[%s5830_s1 + $0x8c0] sm:$0xff]  ;;  %v350_v60 = vld [vmem:[%s5830_s1 + $0xa08] sm:$0xff] }
  0x6b   :  { %v354_v61 = vld [vmem:[%s5830_s1 + $0xa28] sm:$0xff] }
  0x6c   :  { %2341 = vmatpush1.bf16.msra.mxu0 %v2340_v14  ;;  %v2752_v14 = vpack.c.bf16 %v275_v7, %v271_v5  ;;  %v313_v5 = vld [vmem:[%s5830_s1 + $0x8e0] sm:$0xff] }
  0x6d   :  { %2733 = vmatpush1.bf16.msra.mxu1 %v2732_v15  ;;  %2343 = vmatprep.subr.bf16.mxu0 %v2342_v16  ;;  %v2362_v15 = vpack.c.bf16 %v282_v9, %v278_v8  ;;  %v277_v16 = vld [vmem:[%s5830_s1 + $0x7c0] sm:$0xff]  ;;  %v315_v8 = vld [vmem:[%s5830_s1 + $0x8f0] sm:$0xff]  ;;  %v318_v9 = vld [vmem:[%s5830_s1 + $0x908] sm:$0xff] }
  0x6e   :  { %2735 = vmatprep.subr.bf16.mxu1 %v2734_v20  ;;  %v283_v20 = vld [vmem:[%s5830_s1 + $0x7f0] sm:$0xff]  ;;  %v2364_v27 = vpack.c.bf16 %v281_v17, %v277_v16  ;;  %v2382_v16 = vpack.c.bf16 %v322_v10, %v318_v9  ;;  %v317_v17 = vld [vmem:[%s5830_s1 + $0x900] sm:$0xff]  ;;  %v358_v9 = vld [vmem:[%s5830_s1 + $0xa48] sm:$0xff] }
  0x6f   :  { %v362_v10 = vld [vmem:[%s5830_s1 + $0xa68] sm:$0xff] }
  0x70   :  { %2345 = vmatpush1.bf16.msra.mxu0 %v2344_v28  ;;  %v2756_v28 = vpack.c.bf16 %v283_v20, %v279_v18  ;;  %v321_v18 = vld [vmem:[%s5830_s1 + $0x920] sm:$0xff] }
  0x71   :  { %2737 = vmatpush1.bf16.msra.mxu1 %v2736_v29  ;;  %2347 = vmatprep.subr.bf16.mxu0 %v2346_v30  ;;  %v2366_v29 = vpack.c.bf16 %v290_v22, %v286_v21  ;;  %v285_v30 = vld [vmem:[%s5830_s1 + $0x800] sm:$0xff]  ;;  %v323_v21 = vld [vmem:[%s5830_s1 + $0x930] sm:$0xff]  ;;  %v326_v22 = vld [vmem:[%s5830_s1 + $0x948] sm:$0xff] }
  0x72   :  { %2739 = vmatprep.subr.bf16.mxu1 %v2738_v34  ;;  %v291_v34 = vld [vmem:[%s5830_s1 + $0x830] sm:$0xff]  ;;  %v2368_v39 = vpack.c.bf16 %v289_v31, %v285_v30  ;;  %v2386_v30 = vpack.c.bf16 %v330_v23, %v326_v22  ;;  %v325_v31 = vld [vmem:[%s5830_s1 + $0x940] sm:$0xff]  ;;  %v366_v22 = vld [vmem:[%s5830_s1 + $0xa88] sm:$0xff] }
  0x73   :  { %v370_v23 = vld [vmem:[%s5830_s1 + $0xaa8] sm:$0xff] }
  0x74   :  { %2349 = vmatpush1.bf16.msra.mxu0 %v2348_v40  ;;  %v4017_v40 = vld [vmem:[%s5829_s0 + $0x8] sm:$0xff] }
  0x75   :  { %2741 = vmatpush1.bf16.msra.mxu1 %v2740_v41  ;;  %2351 = vmatprep.subr.bf16.mxu0 %v2350_v42  ;;  %v2760_v41 = vpack.c.bf16 %v291_v34, %v287_v32  ;;  %v2370_v42 = vpack.c.bf16 %v298_v36, %v294_v35  ;;  %v329_v32 = vld [vmem:[%s5830_s1 + $0x960] sm:$0xff]  ;;  %v331_v35 = vld [vmem:[%s5830_s1 + $0x970] sm:$0xff]  ;;  %v334_v36 = vld [vmem:[%s5830_s1 + $0x988] sm:$0xff] }
  0x76   :  { %2743 = vmatprep.subr.bf16.mxu1 %v2742_v46  ;;  %v4030_v46 = vrot.slane %v4017_v40, %v3464_v12 }
  0x78   :  { %2353 = vmatpush1.bf16.msra.mxu0 %v2352_v51  ;;  %v308_v51 = vld [vmem:[%s5830_s1 + $0x8b8] sm:$0xff] }
  0x79   :  { %2745 = vmatpush1.bf16.msra.mxu1 %v2744_v52  ;;  %2355 = vmatprep.subr.bf16.mxu0 %v2354_v53  ;;  %v871_v52 = vcombine.high %v4030_v46, %v4030_v46  ;;  %v2372_v53 = vpack.c.bf16 %v297_v44, %v293_v43  ;;  %v2766_v59 = vpack.c.bf16 %v308_v51, %v304_v50  ;;  %v333_v44 = vld [vmem:[%s5830_s1 + $0x980] sm:$0xff]  ;;  %v346_v50 = vld [vmem:[%s5830_s1 + $0x9e8] sm:$0xff]  ;;  %v344_v51 = vld [vmem:[%s5830_s1 + $0x9d8] sm:$0xff] }
  0x7a   :  { %2747 = vmatprep.subr.bf16.mxu1 %v2746_v57  ;;  %v305_v57 = vld [vmem:[%s5830_s1 + $0x8a0] sm:$0xff]  ;;  %v2390_v43 = vpack.c.bf16 %v338_v37, %v334_v36  ;;  %v374_v36 = vld [vmem:[%s5830_s1 + $0xac8] sm:$0xff] }
  0x7b   :  { %v378_v37 = vld [vmem:[%s5830_s1 + $0xae8] sm:$0xff] }
  0x7c   :  { %2357 = vmatpush1.bf16.msra.mxu0 %v2356_v0  ;;  %v316_v0 = vld [vmem:[%s5830_s1 + $0x8f8] sm:$0xff] }
  0x7d   :  { %2749 = vmatpush1.bf16.msra.mxu1 %v2748_v1  ;;  %2359 = vmatprep.subr.bf16.mxu0 %v2358_v2  ;;  %v2376_v1 = vpack.c.bf16 %v305_v57, %v301_v56  ;;  %v2770_v7 = vpack.c.bf16 %v316_v0, %v312_v63  ;;  %v341_v56 = vld [vmem:[%s5830_s1 + $0x9c0] sm:$0xff]  ;;  %v352_v63 = vld [vmem:[%s5830_s1 + $0xa18] sm:$0xff] }
  0x7e   :  { %2751 = vmatprep.subr.bf16.mxu1 %v2750_v6  ;;  %v311_v6 = vld [vmem:[%s5830_s1 + $0x8d0] sm:$0xff]  ;;  %v345_v57 = vld [vmem:[%s5830_s1 + $0x9e0] sm:$0xff]  ;;  %v356_v0 = vld [vmem:[%s5830_s1 + $0xa38] sm:$0xff] }
  0x80   :  { %2361 = vmatpush1.bf16.msra.mxu0 %v2360_v13  ;;  %v324_v13 = vld [vmem:[%s5830_s1 + $0x938] sm:$0xff] }
  0x81   :  { %2753 = vmatpush1.bf16.msra.mxu1 %v2752_v14  ;;  %2363 = vmatprep.subr.bf16.mxu0 %v2362_v15  ;;  %v2380_v14 = vpack.c.bf16 %v313_v5, %v309_v4  ;;  %v2772_v15 = vpack.c.bf16 %v315_v8, %v311_v6  ;;  %v2774_v20 = vpack.c.bf16 %v324_v13, %v320_v11  ;;  %v349_v4 = vld [vmem:[%s5830_s1 + $0xa00] sm:$0xff]  ;;  %v351_v6 = vld [vmem:[%s5830_s1 + $0xa10] sm:$0xff]  ;;  %v360_v11 = vld [vmem:[%s5830_s1 + $0xa58] sm:$0xff] }
  0x82   :  { %2755 = vmatprep.subr.bf16.mxu1 %v2754_v19  ;;  %v319_v19 = vld [vmem:[%s5830_s1 + $0x910] sm:$0xff]  ;;  %v353_v5 = vld [vmem:[%s5830_s1 + $0xa20] sm:$0xff]  ;;  %v364_v13 = vld [vmem:[%s5830_s1 + $0xa78] sm:$0xff] }
  0x83   :  { %v355_v8 = vld [vmem:[%s5830_s1 + $0xa30] sm:$0xff] }
  0x84   :  { %2365 = vmatpush1.bf16.msra.mxu0 %v2364_v27  ;;  %v332_v27 = vld [vmem:[%s5830_s1 + $0x978] sm:$0xff] }
  0x85   :  { %2757 = vmatpush1.bf16.msra.mxu1 %v2756_v28  ;;  %2367 = vmatprep.subr.bf16.mxu0 %v2366_v29  ;;  %v2384_v28 = vpack.c.bf16 %v321_v18, %v317_v17  ;;  %v2776_v29 = vpack.c.bf16 %v323_v21, %v319_v19  ;;  %v2778_v34 = vpack.c.bf16 %v332_v27, %v328_v24  ;;  %v357_v17 = vld [vmem:[%s5830_s1 + $0xa40] sm:$0xff]  ;;  %v359_v19 = vld [vmem:[%s5830_s1 + $0xa50] sm:$0xff]  ;;  %v368_v24 = vld [vmem:[%s5830_s1 + $0xa98] sm:$0xff] }
  0x86   :  { %2759 = vmatprep.subr.bf16.mxu1 %v2758_v33  ;;  %v327_v33 = vld [vmem:[%s5830_s1 + $0x950] sm:$0xff]  ;;  %v361_v18 = vld [vmem:[%s5830_s1 + $0xa60] sm:$0xff]  ;;  %v372_v27 = vld [vmem:[%s5830_s1 + $0xab8] sm:$0xff] }
  0x87   :  { %1048 = vmatmul.mubr.f32.vlgmr.msra.gmra.mrb[0].mxu0 %v3618_v25  ;;  %v363_v21 = vld [vmem:[%s5830_s1 + $0xa70] sm:$0xff] }
  0x88   :  { %2369 = vmatpush1.bf16.msra.mxu0 %v2368_v39  ;;  %1545 = vmatmul.mubr.f32.vlgmr.msra.gmra.mrb[0].mxu1 %v3618_v25  ;;  %v307_v25 = vld [vmem:[%s5830_s1 + $0x8b0] sm:$0xff]  ;;  %v340_v39 = vld [vmem:[%s5830_s1 + $0x9b8] sm:$0xff] }
  0x89   :  { %2761 = vmatpush1.bf16.msra.mxu1 %v2760_v41  ;;  %2371 = vmatprep.subr.bf16.mxu0 %v2370_v42  ;;  %v2768_v2 = vpack.c.bf16 %v307_v25, %v303_v58  ;;  %v2388_v41 = vpack.c.bf16 %v329_v32, %v325_v31  ;;  %v2780_v42 = vpack.c.bf16 %v331_v35, %v327_v33  ;;  %v343_v58 = vld [vmem:[%s5830_s1 + $0x9d0] sm:$0xff]  ;;  %v365_v31 = vld [vmem:[%s5830_s1 + $0xa80] sm:$0xff] }
  0x8a   :  { %2763 = vmatprep.subr.bf16.mxu1 %v2762_v47  ;;  %1118 = vmatprep.mubr.f32.mxu0 %v871_v52  ;;  %v335_v47 = vld [vmem:[%s5830_s1 + $0x990] sm:$0xff]  ;;  %v2782_v48 = vpack.c.bf16 %v340_v39, %v336_v38  ;;  %v369_v32 = vld [vmem:[%s5830_s1 + $0xaa0] sm:$0xff]  ;;  %v376_v38 = vld [vmem:[%s5830_s1 + $0xad8] sm:$0xff] }
  0x8b   :  { %1615 = vmatprep.mubr.f32.mxu1 %v871_v52  ;;  %v348_v52 = vld [vmem:[%s5830_s1 + $0x9f8] sm:$0xff]  ;;  %v347_v25 = vld [vmem:[%s5830_s1 + $0x9f0] sm:$0xff] }
  0x8c   :  { %2373 = vmatpush1.bf16.msra.mxu0 %v2372_v53  ;;  %v2392_v53 = vpack.c.bf16 %v337_v45, %v333_v44  ;;  %v367_v33 = vld [vmem:[%s5830_s1 + $0xa90] sm:$0xff]  ;;  %v380_v39 = vld [vmem:[%s5830_s1 + $0xaf8] sm:$0xff]  ;;  %v373_v44 = vld [vmem:[%s5830_s1 + $0xac0] sm:$0xff] }
  0x8d   :  { %2765 = vmatpush1.bf16.msra.mxu1 %v2764_v54  ;;  %2375 = vmatprep.subr.bf16.mxu0 %v2374_v55  ;;  %v2784_v54 = vpack.c.bf16 %v339_v26, %v335_v47  ;;  %v2394_v55 = vpack.c.bf16 %v346_v50, %v342_v49  ;;  %v371_v35 = vld [vmem:[%s5830_s1 + $0xab0] sm:$0xff]  ;;  %v377_v45 = vld [vmem:[%s5830_s1 + $0xae0] sm:$0xff]  ;;  %v382_v49 = vld [vmem:[%s5830_s1 + $0xb08] sm:$0xff] }
  0x8e   :  { %2767 = vmatprep.subr.bf16.mxu1 %v2766_v59  ;;  %v2786_v59 = vpack.c.bf16 %v348_v52, %v344_v51  ;;  %v375_v47 = vld [vmem:[%s5830_s1 + $0xad0] sm:$0xff]  ;;  %v386_v50 = vld [vmem:[%s5830_s1 + $0xb28] sm:$0xff]  ;;  %v384_v51 = vld [vmem:[%s5830_s1 + $0xb18] sm:$0xff] }
  0x8f   :  { %v379_v26 = vld [vmem:[%s5830_s1 + $0xaf0] sm:$0xff]  ;;  %v388_v52 = vld [vmem:[%s5830_s1 + $0xb38] sm:$0xff] }
  0x90   :  { %2377 = vmatpush1.bf16.msra.mxu0 %v2376_v1  ;;  %v2396_v1 = vpack.c.bf16 %v345_v57, %v341_v56  ;;  %v381_v56 = vld [vmem:[%s5830_s1 + $0xb00] sm:$0xff] }
  0x91   :  { %2769 = vmatpush1.bf16.msra.mxu1 %v2768_v2  ;;  %2379 = vmatprep.subr.bf16.mxu0 %v2378_v3  ;;  %v2788_v2 = vpack.c.bf16 %v347_v25, %v343_v58  ;;  %v2398_v3 = vpack.c.bf16 %v354_v61, %v350_v60  ;;  %v385_v57 = vld [vmem:[%s5830_s1 + $0xb20] sm:$0xff]  ;;  %v383_v58 = vld [vmem:[%s5830_s1 + $0xb10] sm:$0xff]  ;;  %v390_v60 = vld [vmem:[%s5830_s1 + $0xb48] sm:$0xff] }
  0x92   :  { %2771 = vmatprep.subr.bf16.mxu1 %v2770_v7  ;;  %v2790_v7 = vpack.c.bf16 %v356_v0, %v352_v63  ;;  %v387_v25 = vld [vmem:[%s5830_s1 + $0xb30] sm:$0xff]  ;;  %v394_v61 = vld [vmem:[%s5830_s1 + $0xb68] sm:$0xff]  ;;  %v392_v63 = vld [vmem:[%s5830_s1 + $0xb58] sm:$0xff] }
  0x93   :  { %v396_v0 = vld [vmem:[%s5830_s1 + $0xb78] sm:$0xff] }
  0x94   :  { %2381 = vmatpush1.bf16.msra.mxu0 %v2380_v14  ;;  %v2400_v14 = vpack.c.bf16 %v353_v5, %v349_v4  ;;  %v389_v4 = vld [vmem:[%s5830_s1 + $0xb40] sm:$0xff] }
  0x95   :  { %2773 = vmatpush1.bf16.msra.mxu1 %v2772_v15  ;;  %2383 = vmatprep.subr.bf16.mxu0 %v2382_v16  ;;  %v2792_v15 = vpack.c.bf16 %v355_v8, %v351_v6  ;;  %v2402_v16 = vpack.c.bf16 %v362_v10, %v358_v9  ;;  %v393_v5 = vld [vmem:[%s5830_s1 + $0xb60] sm:$0xff]  ;;  %v391_v6 = vld [vmem:[%s5830_s1 + $0xb50] sm:$0xff]  ;;  %v398_v9 = vld [vmem:[%s5830_s1 + $0xb88] sm:$0xff] }
  0x96   :  { %2775 = vmatprep.subr.bf16.mxu1 %v2774_v20  ;;  %v2794_v20 = vpack.c.bf16 %v364_v13, %v360_v11  ;;  %v395_v8 = vld [vmem:[%s5830_s1 + $0xb70] sm:$0xff]  ;;  %v402_v10 = vld [vmem:[%s5830_s1 + $0xba8] sm:$0xff]  ;;  %v400_v11 = vld [vmem:[%s5830_s1 + $0xb98] sm:$0xff] }
  0x97   :  { %v404_v13 = vld [vmem:[%s5830_s1 + $0xbb8] sm:$0xff] }
  0x98   :  { %2385 = vmatpush1.bf16.msra.mxu0 %v2384_v28  ;;  %v2404_v28 = vpack.c.bf16 %v361_v18, %v357_v17  ;;  %v397_v17 = vld [vmem:[%s5830_s1 + $0xb80] sm:$0xff] }
  0x99   :  { %2777 = vmatpush1.bf16.msra.mxu1 %v2776_v29  ;;  %2387 = vmatprep.subr.bf16.mxu0 %v2386_v30  ;;  %v2796_v29 = vpack.c.bf16 %v363_v21, %v359_v19  ;;  %v2406_v30 = vpack.c.bf16 %v370_v23, %v366_v22  ;;  %v401_v18 = vld [vmem:[%s5830_s1 + $0xba0] sm:$0xff]  ;;  %v399_v19 = vld [vmem:[%s5830_s1 + $0xb90] sm:$0xff]  ;;  %v406_v22 = vld [vmem:[%s5830_s1 + $0xbc8] sm:$0xff] }
  0x9a   :  { %2779 = vmatprep.subr.bf16.mxu1 %v2778_v34  ;;  %v2798_v34 = vpack.c.bf16 %v372_v27, %v368_v24  ;;  %v403_v21 = vld [vmem:[%s5830_s1 + $0xbb0] sm:$0xff]  ;;  %v410_v23 = vld [vmem:[%s5830_s1 + $0xbe8] sm:$0xff]  ;;  %v408_v24 = vld [vmem:[%s5830_s1 + $0xbd8] sm:$0xff] }
  0x9b   :  { %v412_v27 = vld [vmem:[%s5830_s1 + $0xbf8] sm:$0xff] }
  0x9c   :  { %2389 = vmatpush1.bf16.msra.mxu0 %v2388_v41  ;;  %v2408_v41 = vpack.c.bf16 %v369_v32, %v365_v31  ;;  %v405_v31 = vld [vmem:[%s5830_s1 + $0xbc0] sm:$0xff] }
  0x9d   :  { %2781 = vmatpush1.bf16.msra.mxu1 %v2780_v42  ;;  %2391 = vmatprep.subr.bf16.mxu0 %v2390_v43  ;;  %v2800_v42 = vpack.c.bf16 %v371_v35, %v367_v33  ;;  %v2410_v43 = vpack.c.bf16 %v378_v37, %v374_v36  ;;  %v409_v32 = vld [vmem:[%s5830_s1 + $0xbe0] sm:$0xff]  ;;  %v407_v33 = vld [vmem:[%s5830_s1 + $0xbd0] sm:$0xff]  ;;  %v414_v36 = vld [vmem:[%s5830_s1 + $0xc08] sm:$0xff] }
  0x9e   :  { %2783 = vmatprep.subr.bf16.mxu1 %v2782_v48  ;;  %v2802_v48 = vpack.c.bf16 %v380_v39, %v376_v38  ;;  %v411_v35 = vld [vmem:[%s5830_s1 + $0xbf0] sm:$0xff]  ;;  %v418_v37 = vld [vmem:[%s5830_s1 + $0xc28] sm:$0xff]  ;;  %v856_v38 = vcombine.high %v4017_v40, %v4017_v40  ;;  %v416_v39 = vld [vmem:[%s5830_s1 + $0xc18] sm:$0xff] }
  0x9f   :  { %v417_v40 = vld [vmem:[%s5830_s1 + $0xc20] sm:$0xff] }
  0xa0   :  { %2393 = vmatpush1.bf16.msra.mxu0 %v2392_v53  ;;  %v2412_v53 = vpack.c.bf16 %v377_v45, %v373_v44  ;;  %v2430_v44 = vpack.c.bf16 %v418_v37, %v414_v36  ;;  %v413_v45 = vld [vmem:[%s5830_s1 + $0xc00] sm:$0xff]  ;;  %v451_v36 = vld [vmem:[%s5830_s1 + $0xd30] sm:$0xff]  ;;  %v454_v37 = vld [vmem:[%s5830_s1 + $0xd48] sm:$0xff] }
  0xa1   :  { %2785 = vmatpush1.bf16.msra.mxu1 %v2784_v54  ;;  %2395 = vmatprep.subr.bf16.mxu0 %v2394_v55  ;;  %v2804_v54 = vpack.c.bf16 %v379_v26, %v375_v47  ;;  %v2414_v55 = vpack.c.bf16 %v386_v50, %v382_v49  ;;  %v415_v47 = vld [vmem:[%s5830_s1 + $0xc10] sm:$0xff]  ;;  %v422_v49 = vld [vmem:[%s5830_s1 + $0xc48] sm:$0xff] }
  0xa2   :  { %2787 = vmatprep.subr.bf16.mxu1 %v2786_v59  ;;  %v2806_v59 = vpack.c.bf16 %v388_v52, %v384_v51  ;;  %v419_v26 = vld [vmem:[%s5830_s1 + $0xc30] sm:$0xff]  ;;  %v426_v50 = vld [vmem:[%s5830_s1 + $0xc68] sm:$0xff]  ;;  %v4408_v51 = vrot.slane %v856_v38, %v3464_v12  ;;  %v424_v52 = vld [vmem:[%s5830_s1 + $0xc58] sm:$0xff] }
  0xa3   :  { %v458_v38 = vld [vmem:[%s5830_s1 + $0xd68] sm:$0xff] }
  0xa4   :  { %2397 = vmatpush1.bf16.msra.mxu0 %v2396_v1  ;;  %v2416_v1 = vpack.c.bf16 %v385_v57, %v381_v56  ;;  %v2434_v56 = vpack.c.bf16 %v426_v50, %v422_v49  ;;  %v421_v57 = vld [vmem:[%s5830_s1 + $0xc40] sm:$0xff]  ;;  %v462_v49 = vld [vmem:[%s5830_s1 + $0xd88] sm:$0xff] }
  0xa5   :  { %2789 = vmatpush1.bf16.msra.mxu1 %v2788_v2  ;;  %2399 = vmatprep.subr.bf16.mxu0 %v2398_v3  ;;  %v2808_v2 = vpack.c.bf16 %v387_v25, %v383_v58  ;;  %v2418_v3 = vpack.c.bf16 %v394_v61, %v390_v60  ;;  %v425_v58 = vld [vmem:[%s5830_s1 + $0xc60] sm:$0xff]  ;;  %v427_v60 = vld [vmem:[%s5830_s1 + $0xc70] sm:$0xff]  ;;  %v430_v61 = vld [vmem:[%s5830_s1 + $0xc88] sm:$0xff] }
  0xa6   :  { %2791 = vmatprep.subr.bf16.mxu1 %v2790_v7  ;;  %v2810_v7 = vpack.c.bf16 %v396_v0, %v392_v63  ;;  %v434_v63 = vld [vmem:[%s5830_s1 + $0xca8] sm:$0xff]  ;;  %v872_v0 = vcombine.high %v4408_v51, %v4408_v51 }
  0xa7   :  { %v466_v50 = vld [vmem:[%s5830_s1 + $0xda8] sm:$0xff] }
  0xa8   :  { %2401 = vmatpush1.bf16.msra.mxu0 %v2400_v14  ;;  %v2420_v14 = vpack.c.bf16 %v393_v5, %v389_v4  ;;  %v2438_v5 = vpack.c.bf16 %v434_v63, %v430_v61  ;;  %v470_v61 = vld [vmem:[%s5830_s1 + $0xdc8] sm:$0xff] }
  0xa9   :  { %2793 = vmatpush1.bf16.msra.mxu1 %v2792_v15  ;;  %2403 = vmatprep.subr.bf16.mxu0 %v2402_v16  ;;  %v2812_v15 = vpack.c.bf16 %v395_v8, %v391_v6  ;;  %v2422_v16 = vpack.c.bf16 %v402_v10, %v398_v9  ;;  %v429_v6 = vld [vmem:[%s5830_s1 + $0xc80] sm:$0xff]  ;;  %v431_v8 = vld [vmem:[%s5830_s1 + $0xc90] sm:$0xff]  ;;  %v438_v10 = vld [vmem:[%s5830_s1 + $0xcc8] sm:$0xff] }
  0xaa   :  { %2795 = vmatprep.subr.bf16.mxu1 %v2794_v20  ;;  %v2814_v20 = vpack.c.bf16 %v404_v13, %v400_v11  ;;  %v442_v11 = vld [vmem:[%s5830_s1 + $0xce8] sm:$0xff]  ;;  %v440_v13 = vld [vmem:[%s5830_s1 + $0xcd8] sm:$0xff] }
  0xab   :  { %v474_v63 = vld [vmem:[%s5830_s1 + $0xde8] sm:$0xff] }
  0xac   :  { %2405 = vmatpush1.bf16.msra.mxu0 %v2404_v28  ;;  %v2424_v28 = vpack.c.bf16 %v401_v18, %v397_v17  ;;  %v2442_v17 = vpack.c.bf16 %v442_v11, %v438_v10  ;;  %v437_v18 = vld [vmem:[%s5830_s1 + $0xcc0] sm:$0xff]  ;;  %v482_v10 = vld [vmem:[%s5830_s1 + $0xe28] sm:$0xff]  ;;  %v480_v11 = vld [vmem:[%s5830_s1 + $0xe18] sm:$0xff] }
  0xad   :  { %2797 = vmatpush1.bf16.msra.mxu1 %v2796_v29  ;;  %2407 = vmatprep.subr.bf16.mxu0 %v2406_v30  ;;  %v2816_v29 = vpack.c.bf16 %v403_v21, %v399_v19  ;;  %v2426_v30 = vpack.c.bf16 %v410_v23, %v406_v22  ;;  %v441_v19 = vld [vmem:[%s5830_s1 + $0xce0] sm:$0xff]  ;;  %v443_v22 = vld [vmem:[%s5830_s1 + $0xcf0] sm:$0xff]  ;;  %v446_v23 = vld [vmem:[%s5830_s1 + $0xd08] sm:$0xff] }
  0xae   :  { %2799 = vmatprep.subr.bf16.mxu1 %v2798_v34  ;;  %v2818_v34 = vpack.c.bf16 %v412_v27, %v408_v24  ;;  %v450_v24 = vld [vmem:[%s5830_s1 + $0xd28] sm:$0xff]  ;;  %v448_v27 = vld [vmem:[%s5830_s1 + $0xd18] sm:$0xff] }
  0xb0   :  { %2409 = vmatpush1.bf16.msra.mxu0 %v2408_v41  ;;  %v420_v41 = vld [vmem:[%s5830_s1 + $0xc38] sm:$0xff] }
  0xb1   :  { %2801 = vmatpush1.bf16.msra.mxu1 %v2800_v42  ;;  %2411 = vmatprep.subr.bf16.mxu0 %v2410_v43  ;;  %v2428_v42 = vpack.c.bf16 %v409_v32, %v405_v31  ;;  %v2820_v43 = vpack.c.bf16 %v411_v35, %v407_v33  ;;  %v2446_v31 = vpack.c.bf16 %v450_v24, %v446_v23  ;;  %v445_v32 = vld [vmem:[%s5830_s1 + $0xd00] sm:$0xff]  ;;  %v490_v23 = vld [vmem:[%s5830_s1 + $0xe68] sm:$0xff]  ;;  %v488_v24 = vld [vmem:[%s5830_s1 + $0xe58] sm:$0xff] }
  0xb2   :  { %2803 = vmatprep.subr.bf16.mxu1 %v2802_v48  ;;  %v2822_v48 = vpack.c.bf16 %v420_v41, %v416_v39  ;;  %v449_v33 = vld [vmem:[%s5830_s1 + $0xd20] sm:$0xff]  ;;  %v456_v39 = vld [vmem:[%s5830_s1 + $0xd58] sm:$0xff] }
  0xb3   :  { %v460_v41 = vld [vmem:[%s5830_s1 + $0xd78] sm:$0xff] }
  0xb4   :  { %2413 = vmatpush1.bf16.msra.mxu0 %v2412_v53  ;;  %v428_v53 = vld [vmem:[%s5830_s1 + $0xc78] sm:$0xff] }
  0xb5   :  { %2805 = vmatpush1.bf16.msra.mxu1 %v2804_v54  ;;  %2415 = vmatprep.subr.bf16.mxu0 %v2414_v55  ;;  %v2432_v54 = vpack.c.bf16 %v417_v40, %v413_v45  ;;  %v2824_v55 = vpack.c.bf16 %v419_v26, %v415_v47  ;;  %v2826_v25 = vpack.c.bf16 %v428_v53, %v424_v52  ;;  %v453_v45 = vld [vmem:[%s5830_s1 + $0xd40] sm:$0xff]  ;;  %v455_v47 = vld [vmem:[%s5830_s1 + $0xd50] sm:$0xff]  ;;  %v464_v52 = vld [vmem:[%s5830_s1 + $0xd98] sm:$0xff] }
  0xb6   :  { %2807 = vmatprep.subr.bf16.mxu1 %v2806_v59  ;;  %v423_v59 = vld [vmem:[%s5830_s1 + $0xc50] sm:$0xff]  ;;  %v457_v40 = vld [vmem:[%s5830_s1 + $0xd60] sm:$0xff]  ;;  %v468_v53 = vld [vmem:[%s5830_s1 + $0xdb8] sm:$0xff] }
  0xb7   :  { %v2828_v4 = vpack.c.bf16 %v427_v60, %v423_v59  ;;  %v459_v26 = vld [vmem:[%s5830_s1 + $0xd70] sm:$0xff] }
  0xb8   :  { %2417 = vmatpush1.bf16.msra.mxu0 %v2416_v1  ;;  %v432_v1 = vld [vmem:[%s5830_s1 + $0xc98] sm:$0xff]  ;;  %v463_v59 = vld [vmem:[%s5830_s1 + $0xd90] sm:$0xff] }
  0xb9   :  { %2809 = vmatpush1.bf16.msra.mxu1 %v2808_v2  ;;  %2419 = vmatprep.subr.bf16.mxu0 %v2418_v3  ;;  %v436_v2 = vld [vmem:[%s5830_s1 + $0xcb8] sm:$0xff]  ;;  %v2436_v3 = vpack.c.bf16 %v425_v58, %v421_v57  ;;  %v461_v57 = vld [vmem:[%s5830_s1 + $0xd80] sm:$0xff]  ;;  %v467_v60 = vld [vmem:[%s5830_s1 + $0xdb0] sm:$0xff] }
  0xba   :  { %2811 = vmatprep.subr.bf16.mxu1 %v2810_v7  ;;  %v433_v7 = vld [vmem:[%s5830_s1 + $0xca0] sm:$0xff]  ;;  %v2830_v9 = vpack.c.bf16 %v436_v2, %v432_v1  ;;  %v476_v1 = vld [vmem:[%s5830_s1 + $0xdf8] sm:$0xff] }
  0xbb   :  { %v465_v58 = vld [vmem:[%s5830_s1 + $0xda0] sm:$0xff] }
  0xbc   :  { %2421 = vmatpush1.bf16.msra.mxu0 %v2420_v14  ;;  %v444_v14 = vld [vmem:[%s5830_s1 + $0xcf8] sm:$0xff]  ;;  %v2456_v2 = vpack.c.bf16 %v465_v58, %v461_v57  ;;  %v505_v57 = vld [vmem:[%s5830_s1 + $0xee0] sm:$0xff]  ;;  %v503_v58 = vld [vmem:[%s5830_s1 + $0xed0] sm:$0xff] }
  0xbd   :  { %2813 = vmatpush1.bf16.msra.mxu1 %v2812_v15  ;;  %2423 = vmatprep.subr.bf16.mxu0 %v2422_v16  ;;  %v2440_v15 = vpack.c.bf16 %v433_v7, %v429_v6  ;;  %v2834_v21 = vpack.c.bf16 %v444_v14, %v440_v13  ;;  %v473_v6 = vld [vmem:[%s5830_s1 + $0xde0] sm:$0xff]  ;;  %v471_v7 = vld [vmem:[%s5830_s1 + $0xdd0] sm:$0xff]  ;;  %v484_v13 = vld [vmem:[%s5830_s1 + $0xe38] sm:$0xff] }
  0xbe   :  { %2815 = vmatprep.subr.bf16.mxu1 %v2814_v20  ;;  %v439_v20 = vld [vmem:[%s5830_s1 + $0xcd0] sm:$0xff] }
  0xc0   :  { %2425 = vmatpush1.bf16.msra.mxu0 %v2424_v28  ;;  %v452_v28 = vld [vmem:[%s5830_s1 + $0xd38] sm:$0xff] }
  0xc1   :  { %2817 = vmatpush1.bf16.msra.mxu1 %v2816_v29  ;;  %2427 = vmatprep.subr.bf16.mxu0 %v2426_v30  ;;  %v2444_v29 = vpack.c.bf16 %v441_v19, %v437_v18  ;;  %v2836_v30 = vpack.c.bf16 %v443_v22, %v439_v20  ;;  %v2838_v35 = vpack.c.bf16 %v452_v28, %v448_v27  ;;  %v481_v18 = vld [vmem:[%s5830_s1 + $0xe20] sm:$0xff]  ;;  %v479_v19 = vld [vmem:[%s5830_s1 + $0xe10] sm:$0xff]  ;;  %v486_v22 = vld [vmem:[%s5830_s1 + $0xe48] sm:$0xff] }
  0xc2   :  { %2819 = vmatprep.subr.bf16.mxu1 %v2818_v34  ;;  %v447_v34 = vld [vmem:[%s5830_s1 + $0xd10] sm:$0xff]  ;;  %v2854_v20 = vpack.c.bf16 %v484_v13, %v480_v11  ;;  %v492_v27 = vld [vmem:[%s5830_s1 + $0xe78] sm:$0xff] }
  0xc3   :  { %v524_v11 = vld [vmem:[%s5830_s1 + $0xf78] sm:$0xff] }
  0xc4   :  { %2429 = vmatpush1.bf16.msra.mxu0 %v2428_v42  ;;  %v2448_v42 = vpack.c.bf16 %v449_v33, %v445_v32  ;;  %v489_v32 = vld [vmem:[%s5830_s1 + $0xe60] sm:$0xff]  ;;  %v487_v33 = vld [vmem:[%s5830_s1 + $0xe50] sm:$0xff] }
  0xc5   :  { %2821 = vmatpush1.bf16.msra.mxu1 %v2820_v43  ;;  %2431 = vmatprep.subr.bf16.mxu0 %v2430_v44  ;;  %v2840_v43 = vpack.c.bf16 %v451_v36, %v447_v34  ;;  %v2450_v44 = vpack.c.bf16 %v458_v38, %v454_v37  ;;  %v2858_v34 = vpack.c.bf16 %v492_v27, %v488_v24  ;;  %v494_v36 = vld [vmem:[%s5830_s1 + $0xe88] sm:$0xff]  ;;  %v496_v38 = vld [vmem:[%s5830_s1 + $0xe98] sm:$0xff] }
  0xc6   :  { %2823 = vmatprep.subr.bf16.mxu1 %v2822_v48  ;;  %v2842_v48 = vpack.c.bf16 %v460_v41, %v456_v39  ;;  %v498_v37 = vld [vmem:[%s5830_s1 + $0xea8] sm:$0xff]  ;;  %v500_v39 = vld [vmem:[%s5830_s1 + $0xeb8] sm:$0xff] }
  0xc7   :  { %1119 = vmatmul.mubr.f32.vlgmr.msra.gmra.mrb[0].mxu0 %v4030_v46  ;;  %v532_v24 = vld [vmem:[%s5830_s1 + $0xfb8] sm:$0xff] }
  0xc8   :  { %2433 = vmatpush1.bf16.msra.mxu0 %v2432_v54  ;;  %1616 = vmatmul.mubr.f32.vlgmr.msra.gmra.mrb[0].mxu1 %v4030_v46  ;;  %v435_v46 = vld [vmem:[%s5830_s1 + $0xcb0] sm:$0xff]  ;;  %v2452_v54 = vpack.c.bf16 %v457_v40, %v453_v45  ;;  %v497_v45 = vld [vmem:[%s5830_s1 + $0xea0] sm:$0xff] }
  0xc9   :  { %2825 = vmatpush1.bf16.msra.mxu1 %v2824_v55  ;;  %2435 = vmatprep.subr.bf16.mxu0 %v2434_v56  ;;  %v2832_v16 = vpack.c.bf16 %v435_v46, %v431_v8  ;;  %v2844_v55 = vpack.c.bf16 %v459_v26, %v455_v47  ;;  %v2454_v56 = vpack.c.bf16 %v466_v50, %v462_v49  ;;  %v478_v46 = vld [vmem:[%s5830_s1 + $0xe08] sm:$0xff]  ;;  %v495_v40 = vld [vmem:[%s5830_s1 + $0xe90] sm:$0xff]  ;;  %v504_v50 = vld [vmem:[%s5830_s1 + $0xed8] sm:$0xff] }
  0xca   :  { %2827 = vmatprep.subr.bf16.mxu1 %v2826_v25  ;;  %1189 = vmatprep.mubr.f32.mxu0 %v872_v0  ;;  %v2846_v25 = vpack.c.bf16 %v468_v53, %v464_v52  ;;  %v2862_v47 = vpack.c.bf16 %v500_v39, %v496_v38  ;;  %v502_v26 = vld [vmem:[%s5830_s1 + $0xec8] sm:$0xff]  ;;  %v508_v52 = vld [vmem:[%s5830_s1 + $0xef8] sm:$0xff] }
  0xcb   :  { %1686 = vmatprep.mubr.f32.mxu1 %v872_v0  ;;  %v472_v0 = vld [vmem:[%s5830_s1 + $0xdd8] sm:$0xff]  ;;  %v506_v49 = vld [vmem:[%s5830_s1 + $0xee8] sm:$0xff] }
  0xcc   :  { %2437 = vmatpush1.bf16.msra.mxu0 %v2436_v3  ;;  %v2848_v3 = vpack.c.bf16 %v467_v60, %v463_v59  ;;  %v2850_v8 = vpack.c.bf16 %v476_v1, %v472_v0  ;;  %v2866_v59 = vpack.c.bf16 %v508_v52, %v504_v50  ;;  %v510_v60 = vld [vmem:[%s5830_s1 + $0xf08] sm:$0xff]  ;;  %v516_v0 = vld [vmem:[%s5830_s1 + $0xf38] sm:$0xff]  ;;  %v4783_v52 = vld [vmem:[%s5829_s0 + $0x10] sm:$0xff] }
  0xcd   :  { %2829 = vmatpush1.bf16.msra.mxu1 %v2828_v4  ;;  %2439 = vmatprep.subr.bf16.mxu0 %v2438_v5  ;;  %v2458_v4 = vpack.c.bf16 %v474_v63, %v470_v61  ;;  %v469_v5 = vld [vmem:[%s5830_s1 + $0xdc0] sm:$0xff]  ;;  %v514_v61 = vld [vmem:[%s5830_s1 + $0xf28] sm:$0xff]  ;;  %v512_v63 = vld [vmem:[%s5830_s1 + $0xf18] sm:$0xff] }
  0xce   :  { %2831 = vmatprep.subr.bf16.mxu1 %v2830_v9  ;;  %v475_v9 = vld [vmem:[%s5830_s1 + $0xdf0] sm:$0xff]  ;;  %v2460_v14 = vpack.c.bf16 %v473_v6, %v469_v5  ;;  %v513_v5 = vld [vmem:[%s5830_s1 + $0xf20] sm:$0xff]  ;;  %v540_v38 = vld [vmem:[%s5830_s1 + $0xff8] sm:$0xff] }
  0xcf   :  { %v511_v6 = vld [vmem:[%s5830_s1 + $0xf10] sm:$0xff]  ;;  %v548_v50 = vld [vmem:[%s5830_s1 + $0x1038] sm:$0xff] }
  0xd0   :  { %2441 = vmatpush1.bf16.msra.mxu0 %v2440_v15  ;;  %v2852_v15 = vpack.c.bf16 %v475_v9, %v471_v7  ;;  %v2870_v7 = vpack.c.bf16 %v516_v0, %v512_v63  ;;  %v518_v9 = vld [vmem:[%s5830_s1 + $0xf48] sm:$0xff]  ;;  %v4805_v63 = vrot.slane %v4783_v52, %v3464_v12  ;;  %v552_v0 = vld [vmem:[%s5830_s1 + $0x1058] sm:$0xff] }
  0xd1   :  { %2833 = vmatpush1.bf16.msra.mxu1 %v2832_v16  ;;  %2443 = vmatprep.subr.bf16.mxu0 %v2442_v17  ;;  %v2462_v16 = vpack.c.bf16 %v482_v10, %v478_v46  ;;  %v477_v17 = vld [vmem:[%s5830_s1 + $0xe00] sm:$0xff]  ;;  %v522_v46 = vld [vmem:[%s5830_s1 + $0xf68] sm:$0xff]  ;;  %v520_v10 = vld [vmem:[%s5830_s1 + $0xf58] sm:$0xff] }
  0xd2   :  { %2835 = vmatprep.subr.bf16.mxu1 %v2834_v21  ;;  %v483_v21 = vld [vmem:[%s5830_s1 + $0xe30] sm:$0xff]  ;;  %v2464_v28 = vpack.c.bf16 %v481_v18, %v477_v17  ;;  %v521_v17 = vld [vmem:[%s5830_s1 + $0xf60] sm:$0xff] }
  0xd3   :  { %v519_v18 = vld [vmem:[%s5830_s1 + $0xf50] sm:$0xff] }
  0xd4   :  { %2445 = vmatpush1.bf16.msra.mxu0 %v2444_v29  ;;  %v2856_v29 = vpack.c.bf16 %v483_v21, %v479_v19  ;;  %v2874_v19 = vpack.c.bf16 %v524_v11, %v520_v10  ;;  %v526_v21 = vld [vmem:[%s5830_s1 + $0xf88] sm:$0xff]  ;;  %v888_v11 = vcombine.high %v4805_v63, %v4805_v63 }
  0xd5   :  { %2837 = vmatpush1.bf16.msra.mxu1 %v2836_v30  ;;  %2447 = vmatprep.subr.bf16.mxu0 %v2446_v31  ;;  %v2466_v30 = vpack.c.bf16 %v490_v23, %v486_v22  ;;  %v485_v31 = vld [vmem:[%s5830_s1 + $0xe40] sm:$0xff]  ;;  %v530_v22 = vld [vmem:[%s5830_s1 + $0xfa8] sm:$0xff]  ;;  %v528_v23 = vld [vmem:[%s5830_s1 + $0xf98] sm:$0xff] }
  0xd6   :  { %2839 = vmatprep.subr.bf16.mxu1 %v2838_v35  ;;  %v491_v35 = vld [vmem:[%s5830_s1 + $0xe70] sm:$0xff]  ;;  %v2468_v41 = vpack.c.bf16 %v489_v32, %v485_v31  ;;  %v529_v31 = vld [vmem:[%s5830_s1 + $0xfa0] sm:$0xff]  ;;  %v562_v10 = vld [vmem:[%s5830_s1 + $0x10a8] sm:$0xff] }
  0xd7   :  { %v527_v32 = vld [vmem:[%s5830_s1 + $0xf90] sm:$0xff] }
  0xd8   :  { %2449 = vmatpush1.bf16.msra.mxu0 %v2448_v42  ;;  %v2860_v42 = vpack.c.bf16 %v491_v35, %v487_v33  ;;  %v2878_v33 = vpack.c.bf16 %v532_v24, %v528_v23  ;;  %v534_v35 = vld [vmem:[%s5830_s1 + $0xfc8] sm:$0xff] }
  0xd9   :  { %2841 = vmatpush1.bf16.msra.mxu1 %v2840_v43  ;;  %2451 = vmatprep.subr.bf16.mxu0 %v2450_v44  ;;  %v2470_v43 = vpack.c.bf16 %v498_v37, %v494_v36  ;;  %v493_v44 = vld [vmem:[%s5830_s1 + $0xe80] sm:$0xff]  ;;  %v538_v36 = vld [vmem:[%s5830_s1 + $0xfe8] sm:$0xff]  ;;  %v536_v37 = vld [vmem:[%s5830_s1 + $0xfd8] sm:$0xff] }
  0xda   :  { %2843 = vmatprep.subr.bf16.mxu1 %v2842_v48  ;;  %v499_v48 = vld [vmem:[%s5830_s1 + $0xeb0] sm:$0xff]  ;;  %v2472_v53 = vpack.c.bf16 %v497_v45, %v493_v44  ;;  %v537_v44 = vld [vmem:[%s5830_s1 + $0xfe0] sm:$0xff] }
  0xdb   :  { %v535_v45 = vld [vmem:[%s5830_s1 + $0xfd0] sm:$0xff] }
  0xdc   :  { %2453 = vmatpush1.bf16.msra.mxu0 %v2452_v54  ;;  %v2864_v54 = vpack.c.bf16 %v499_v48, %v495_v40  ;;  %v2882_v40 = vpack.c.bf16 %v540_v38, %v536_v37  ;;  %v542_v48 = vld [vmem:[%s5830_s1 + $0x1008] sm:$0xff] }
  0xdd   :  { %2845 = vmatpush1.bf16.msra.mxu1 %v2844_v55  ;;  %2455 = vmatprep.subr.bf16.mxu0 %v2454_v56  ;;  %v2474_v55 = vpack.c.bf16 %v506_v49, %v502_v26  ;;  %v501_v56 = vld [vmem:[%s5830_s1 + $0xec0] sm:$0xff]  ;;  %v546_v26 = vld [vmem:[%s5830_s1 + $0x1028] sm:$0xff]  ;;  %v544_v49 = vld [vmem:[%s5830_s1 + $0x1018] sm:$0xff] }
  0xde   :  { %2847 = vmatprep.subr.bf16.mxu1 %v2846_v25  ;;  %v507_v25 = vld [vmem:[%s5830_s1 + $0xef0] sm:$0xff]  ;;  %v2476_v1 = vpack.c.bf16 %v505_v57, %v501_v56  ;;  %v541_v56 = vld [vmem:[%s5830_s1 + $0x1000] sm:$0xff] }
  0xdf   :  { %v545_v57 = vld [vmem:[%s5830_s1 + $0x1020] sm:$0xff] }
  0xe0   :  { %2457 = vmatpush1.bf16.msra.mxu0 %v2456_v2  ;;  %v2868_v2 = vpack.c.bf16 %v507_v25, %v503_v58  ;;  %v543_v58 = vld [vmem:[%s5830_s1 + $0x1010] sm:$0xff] }
  0xe1   :  { %2849 = vmatpush1.bf16.msra.mxu1 %v2848_v3  ;;  %2459 = vmatprep.subr.bf16.mxu0 %v2458_v4  ;;  %v2478_v3 = vpack.c.bf16 %v514_v61, %v510_v60  ;;  %v509_v4 = vld [vmem:[%s5830_s1 + $0xf00] sm:$0xff]  ;;  %v547_v25 = vld [vmem:[%s5830_s1 + $0x1030] sm:$0xff]  ;;  %v550_v60 = vld [vmem:[%s5830_s1 + $0x1048] sm:$0xff] }
  0xe2   :  { %2851 = vmatprep.subr.bf16.mxu1 %v2850_v8  ;;  %v515_v8 = vld [vmem:[%s5830_s1 + $0xf30] sm:$0xff]  ;;  %v2480_v13 = vpack.c.bf16 %v513_v5, %v509_v4  ;;  %v554_v61 = vld [vmem:[%s5830_s1 + $0x1068] sm:$0xff]  ;;  %v549_v5 = vld [vmem:[%s5830_s1 + $0x1040] sm:$0xff] }
  0xe3   :  { %v2498_v4 = vpack.c.bf16 %v554_v61, %v550_v60 }
  0xe4   :  { %2461 = vmatpush1.bf16.msra.mxu0 %v2460_v14  ;;  %v2872_v14 = vpack.c.bf16 %v515_v8, %v511_v6  ;;  %v553_v6 = vld [vmem:[%s5830_s1 + $0x1060] sm:$0xff] }
  0xe5   :  { %2853 = vmatpush1.bf16.msra.mxu1 %v2852_v15  ;;  %2463 = vmatprep.subr.bf16.mxu0 %v2462_v16  ;;  %v2482_v15 = vpack.c.bf16 %v522_v46, %v518_v9  ;;  %v517_v16 = vld [vmem:[%s5830_s1 + $0xf40] sm:$0xff]  ;;  %v555_v9 = vld [vmem:[%s5830_s1 + $0x1070] sm:$0xff]  ;;  %v558_v46 = vld [vmem:[%s5830_s1 + $0x1088] sm:$0xff] }
  0xe6   :  { %2855 = vmatprep.subr.bf16.mxu1 %v2854_v20  ;;  %v523_v20 = vld [vmem:[%s5830_s1 + $0xf70] sm:$0xff]  ;;  %v2484_v27 = vpack.c.bf16 %v521_v17, %v517_v16 }
  0xe8   :  { %2465 = vmatpush1.bf16.msra.mxu0 %v2464_v28  ;;  %v2876_v28 = vpack.c.bf16 %v523_v20, %v519_v18 }
  0xe9   :  { %2857 = vmatpush1.bf16.msra.mxu1 %v2856_v29  ;;  %2467 = vmatprep.subr.bf16.mxu0 %v2466_v30  ;;  %v2486_v29 = vpack.c.bf16 %v530_v22, %v526_v21  ;;  %v525_v30 = vld [vmem:[%s5830_s1 + $0xf80] sm:$0xff] }
  0xea   :  { %2859 = vmatprep.subr.bf16.mxu1 %v2858_v34  ;;  %v531_v34 = vld [vmem:[%s5830_s1 + $0xfb0] sm:$0xff]  ;;  %v2488_v39 = vpack.c.bf16 %v529_v31, %v525_v30 }
  0xec   :  { %2469 = vmatpush1.bf16.msra.mxu0 %v2468_v41  ;;  %v2880_v41 = vpack.c.bf16 %v531_v34, %v527_v32 }
  0xed   :  { %2861 = vmatpush1.bf16.msra.mxu1 %v2860_v42  ;;  %2471 = vmatprep.subr.bf16.mxu0 %v2470_v43  ;;  %v2490_v42 = vpack.c.bf16 %v538_v36, %v534_v35  ;;  %v533_v43 = vld [vmem:[%s5830_s1 + $0xfc0] sm:$0xff] }
  0xee   :  { %2863 = vmatprep.subr.bf16.mxu1 %v2862_v47  ;;  %v539_v47 = vld [vmem:[%s5830_s1 + $0xff0] sm:$0xff] }
  0xf0   :  { %2473 = vmatpush1.bf16.msra.mxu0 %v2472_v53  ;;  %v2492_v53 = vpack.c.bf16 %v537_v44, %v533_v43 }
  0xf1   :  { %2865 = vmatpush1.bf16.msra.mxu1 %v2864_v54  ;;  %2475 = vmatprep.subr.bf16.mxu0 %v2474_v55  ;;  %v2884_v54 = vpack.c.bf16 %v539_v47, %v535_v45  ;;  %v2494_v55 = vpack.c.bf16 %v546_v26, %v542_v48 }
  0xf2   :  { %2867 = vmatprep.subr.bf16.mxu1 %v2866_v59  ;;  %v2886_v59 = vpack.c.bf16 %v548_v50, %v544_v49 }
  0xf4   :  { %2477 = vmatpush1.bf16.msra.mxu0 %v2476_v1  ;;  %v556_v1 = vld [vmem:[%s5830_s1 + $0x1078] sm:$0xff] }
  0xf5   :  { %2869 = vmatpush1.bf16.msra.mxu1 %v2868_v2  ;;  %2479 = vmatprep.subr.bf16.mxu0 %v2478_v3  ;;  %v2496_v2 = vpack.c.bf16 %v545_v57, %v541_v56  ;;  %v2888_v3 = vpack.c.bf16 %v547_v25, %v543_v58  ;;  %v2890_v8 = vpack.c.bf16 %v556_v1, %v552_v0 }
  0xf6   :  { %2871 = vmatprep.subr.bf16.mxu1 %v2870_v7  ;;  %v551_v7 = vld [vmem:[%s5830_s1 + $0x1050] sm:$0xff] }
  0xf8   :  { %2481 = vmatpush1.bf16.msra.mxu0 %v2480_v13  ;;  %v560_v13 = vld [vmem:[%s5830_s1 + $0x1098] sm:$0xff] }
  0xf9   :  { %2873 = vmatpush1.bf16.msra.mxu1 %v2872_v14  ;;  %2483 = vmatprep.subr.bf16.mxu0 %v2482_v15  ;;  %v564_v14 = vld [vmem:[%s5830_s1 + $0x10b8] sm:$0xff] }
  0xfa   :  { %2875 = vmatprep.subr.bf16.mxu1 %v2874_v19 }
  0xfc   :  { %2485 = vmatpush1.bf16.msra.mxu0 %v2484_v27 }
  0xfd   :  { %2877 = vmatpush1.bf16.msra.mxu1 %v2876_v28  ;;  %2487 = vmatprep.subr.bf16.mxu0 %v2486_v29 }
  0xfe   :  { %2879 = vmatprep.subr.bf16.mxu1 %v2878_v33 }
 0x100   :  { %2489 = vmatpush1.bf16.msra.mxu0 %v2488_v39 }
 0x101   :  { %2881 = vmatpush1.bf16.msra.mxu1 %v2880_v41  ;;  %2491 = vmatprep.subr.bf16.mxu0 %v2490_v42 }
 0x102   :  { %2883 = vmatprep.subr.bf16.mxu1 %v2882_v40 }
 0x104   :  { %2493 = vmatpush1.bf16.msra.mxu0 %v2492_v53 }
 0x105   :  { %2885 = vmatpush1.bf16.msra.mxu1 %v2884_v54  ;;  %2495 = vmatprep.subr.bf16.mxu0 %v2494_v55 }
 0x106   :  { %2887 = vmatprep.subr.bf16.mxu1 %v2886_v59 }
 0x107   :  { %1190 = vmatmul.mubr.f32.vlgmr.msra.gmra.mrb[0].mxu0 %v4408_v51 }
 0x108   :  { %14 = vsyncpa [#allocation4], 0  ;;  %2497 = vmatpush1.bf16.msra.mxu0 %v2496_v2  ;;  %1687 = vmatmul.mubr.f32.vlgmr.msra.gmra.mrb[0].mxu1 %v4408_v51  ;;  %v2500_v15 = vpack.c.bf16 %v553_v6, %v549_v5  ;;  %v2892_v16 = vpack.c.bf16 %v555_v9, %v551_v7  ;;  %v2502_v17 = vpack.c.bf16 %v562_v10, %v558_v46  ;;  %v557_v18 = vld [vmem:[%s5830_s1 + $0x1080] sm:$0xff]  ;;  %v559_v20 = vld [vmem:[%s5830_s1 + $0x1090] sm:$0xff]  ;;  %vm909_vm0 = vcmask 261120  }
 0x109   :  { %2889 = vmatpush1.bf16.msra.mxu1 %v2888_v3  ;;  %2499 = vmatprep.subr.bf16.mxu0 %v2498_v4  ;;  %v561_v19 = vld [vmem:[%s5830_s1 + $0x10a0] sm:$0xff]  ;;  %v2894_v21 = vpack.c.bf16 %v564_v14, %v560_v13  ;;  %v563_v51 = vld [vmem:[%s5830_s1 + $0x10b0] sm:$0xff]  ;;  %v566_v22 = vld [vmem:[%s5830_s1 + $0x10c8] sm:$0xff] }
 0x10a   :  { %2891 = vmatprep.subr.bf16.mxu1 %v2890_v8  ;;  %v570_v23 = vld [vmem:[%s5830_s1 + $0x10e8] sm:$0xff]  ;;  %1260 = vmatprep.mubr.f32.mxu0 %v888_v11  ;;  %v568_v24 = vld [vmem:[%s5830_s1 + $0x10d8] sm:$0xff]  ;;  %v2504_v28 = vpack.c.bf16 %v561_v19, %v557_v18  ;;  %v2896_v29 = vpack.c.bf16 %v563_v51, %v559_v20  ;;  %v565_v31 = vld [vmem:[%s5830_s1 + $0x10c0] sm:$0xff] }
 0x10b   :  { %v572_v27 = vld [vmem:[%s5830_s1 + $0x10f8] sm:$0xff]  ;;  %1757 = vmatprep.mubr.f32.mxu1 %v888_v11  ;;  %v2506_v30 = vpack.c.bf16 %v570_v23, %v566_v22  ;;  %v569_v32 = vld [vmem:[%s5830_s1 + $0x10e0] sm:$0xff]  ;;  %v567_v33 = vld [vmem:[%s5830_s1 + $0x10d0] sm:$0xff] }
 0x10c   :  { %2501 = vmatpush1.bf16.msra.mxu0 %v2500_v15  ;;  %v2898_v34 = vpack.c.bf16 %v572_v27, %v568_v24  ;;  %v571_v35 = vld [vmem:[%s5830_s1 + $0x10f0] sm:$0xff]  ;;  %v574_v36 = vld [vmem:[%s5830_s1 + $0x1108] sm:$0xff]  ;;  %v576_v38 = vld [vmem:[%s5830_s1 + $0x1118] sm:$0xff]  ;;  %v2508_v41 = vpack.c.bf16 %v569_v32, %v565_v31 }
 0x10d   :  { %2893 = vmatpush1.bf16.msra.mxu1 %v2892_v16  ;;  %2503 = vmatprep.subr.bf16.mxu0 %v2502_v17  ;;  %v578_v37 = vld [vmem:[%s5830_s1 + $0x1128] sm:$0xff]  ;;  %v580_v39 = vld [vmem:[%s5830_s1 + $0x1138] sm:$0xff]  ;;  %v2900_v42 = vpack.c.bf16 %v571_v35, %v567_v33  ;;  %v573_v44 = vld [vmem:[%s5830_s1 + $0x1100] sm:$0xff] }
 0x10e   :  { %2895 = vmatprep.subr.bf16.mxu1 %v2894_v21  ;;  %v2510_v43 = vpack.c.bf16 %v578_v37, %v574_v36  ;;  %v577_v45 = vld [vmem:[%s5830_s1 + $0x1120] sm:$0xff]  ;;  %v575_v40 = vld [vmem:[%s5830_s1 + $0x1110] sm:$0xff]  ;;  %v2902_v47 = vpack.c.bf16 %v580_v39, %v576_v38  ;;  %v582_v26 = vld [vmem:[%s5830_s1 + $0x1148] sm:$0xff] }
 0x10f   :  { %v579_v48 = vld [vmem:[%s5830_s1 + $0x1130] sm:$0xff]  ;;  %v586_v49 = vld [vmem:[%s5830_s1 + $0x1168] sm:$0xff]  ;;  %v584_v50 = vld [vmem:[%s5830_s1 + $0x1158] sm:$0xff]  ;;  %v2512_v54 = vpack.c.bf16 %v577_v45, %v573_v44 }
 0x110   :  { %2505 = vmatpush1.bf16.msra.mxu0 %v2504_v28  ;;  %v588_v53 = vld [vmem:[%s5830_s1 + $0x1178] sm:$0xff]  ;;  %v2904_v55 = vpack.c.bf16 %v579_v48, %v575_v40  ;;  %v2514_v56 = vpack.c.bf16 %v586_v49, %v582_v26  ;;  %v581_v57 = vld [vmem:[%s5830_s1 + $0x1140] sm:$0xff]  ;;  %v583_v59 = vld [vmem:[%s5830_s1 + $0x1150] sm:$0xff] }
 0x111   :  { %2897 = vmatpush1.bf16.msra.mxu1 %v2896_v29  ;;  %2507 = vmatprep.subr.bf16.mxu0 %v2506_v30  ;;  %v585_v58 = vld [vmem:[%s5830_s1 + $0x1160] sm:$0xff]  ;;  %v2906_v25 = vpack.c.bf16 %v588_v53, %v584_v50  ;;  %v587_v60 = vld [vmem:[%s5830_s1 + $0x1170] sm:$0xff]  ;;  %v590_v61 = vld [vmem:[%s5830_s1 + $0x1188] sm:$0xff] }
 0x112   :  { %2899 = vmatprep.subr.bf16.mxu1 %v2898_v34  ;;  %v594_v0 = vld [vmem:[%s5830_s1 + $0x11a8] sm:$0xff]  ;;  %v592_v1 = vld [vmem:[%s5830_s1 + $0x1198] sm:$0xff]  ;;  %v2516_v3 = vpack.c.bf16 %v585_v58, %v581_v57  ;;  %v2908_v4 = vpack.c.bf16 %v587_v60, %v583_v59  ;;  %v589_v6 = vld [vmem:[%s5830_s1 + $0x1180] sm:$0xff] }
 0x113   :  { %v596_v2 = vld [vmem:[%s5830_s1 + $0x11b8] sm:$0xff]  ;;  %v2518_v5 = vpack.c.bf16 %v594_v0, %v590_v61  ;;  %v593_v7 = vld [vmem:[%s5830_s1 + $0x11a0] sm:$0xff]  ;;  %v591_v8 = vld [vmem:[%s5830_s1 + $0x1190] sm:$0xff] }
 0x114   :  { %2509 = vmatpush1.bf16.msra.mxu0 %v2508_v41  ;;  %v2910_v9 = vpack.c.bf16 %v596_v2, %v592_v1  ;;  %v595_v46 = vld [vmem:[%s5830_s1 + $0x11b0] sm:$0xff]  ;;  %v598_v10 = vld [vmem:[%s5830_s1 + $0x11c8] sm:$0xff]  ;;  %v600_v13 = vld [vmem:[%s5830_s1 + $0x11d8] sm:$0xff]  ;;  %v2520_v15 = vpack.c.bf16 %v593_v7, %v589_v6 }
 0x115   :  { %2901 = vmatpush1.bf16.msra.mxu1 %v2900_v42  ;;  %2511 = vmatprep.subr.bf16.mxu0 %v2510_v43  ;;  %v602_v11 = vld [vmem:[%s5830_s1 + $0x11e8] sm:$0xff]  ;;  %v604_v14 = vld [vmem:[%s5830_s1 + $0x11f8] sm:$0xff]  ;;  %v2912_v16 = vpack.c.bf16 %v595_v46, %v591_v8  ;;  %v597_v18 = vld [vmem:[%s5830_s1 + $0x11c0] sm:$0xff] }
 0x116   :  { %2903 = vmatprep.subr.bf16.mxu1 %v2902_v47  ;;  %v2522_v17 = vpack.c.bf16 %v602_v11, %v598_v10  ;;  %v601_v19 = vld [vmem:[%s5830_s1 + $0x11e0] sm:$0xff]  ;;  %v599_v20 = vld [vmem:[%s5830_s1 + $0x11d0] sm:$0xff]  ;;  %v2914_v21 = vpack.c.bf16 %v604_v14, %v600_v13  ;;  %v606_v22 = vld [vmem:[%s5830_s1 + $0x1208] sm:$0xff] }
 0x117   :  { %v603_v51 = vld [vmem:[%s5830_s1 + $0x11f0] sm:$0xff]  ;;  %v610_v23 = vld [vmem:[%s5830_s1 + $0x1228] sm:$0xff]  ;;  %v608_v24 = vld [vmem:[%s5830_s1 + $0x1218] sm:$0xff]  ;;  %v2524_v28 = vpack.c.bf16 %v601_v19, %v597_v18 }
 0x118   :  { %2513 = vmatpush1.bf16.msra.mxu0 %v2512_v54  ;;  %v612_v27 = vld [vmem:[%s5830_s1 + $0x1238] sm:$0xff]  ;;  %v2916_v29 = vpack.c.bf16 %v603_v51, %v599_v20  ;;  %v2526_v30 = vpack.c.bf16 %v610_v23, %v606_v22  ;;  %v605_v31 = vld [vmem:[%s5830_s1 + $0x1200] sm:$0xff]  ;;  %v607_v33 = vld [vmem:[%s5830_s1 + $0x1210] sm:$0xff] }
 0x119   :  { %2905 = vmatpush1.bf16.msra.mxu1 %v2904_v55  ;;  %2515 = vmatprep.subr.bf16.mxu0 %v2514_v56  ;;  %v609_v32 = vld [vmem:[%s5830_s1 + $0x1220] sm:$0xff]  ;;  %v2918_v34 = vpack.c.bf16 %v612_v27, %v608_v24  ;;  %v611_v35 = vld [vmem:[%s5830_s1 + $0x1230] sm:$0xff]  ;;  %v614_v36 = vld [vmem:[%s5830_s1 + $0x1248] sm:$0xff] }
 0x11a   :  { %2907 = vmatprep.subr.bf16.mxu1 %v2906_v25  ;;  %v618_v37 = vld [vmem:[%s5830_s1 + $0x1268] sm:$0xff]  ;;  %v616_v38 = vld [vmem:[%s5830_s1 + $0x1258] sm:$0xff]  ;;  %v2528_v41 = vpack.c.bf16 %v609_v32, %v605_v31  ;;  %v2920_v42 = vpack.c.bf16 %v611_v35, %v607_v33  ;;  %v613_v44 = vld [vmem:[%s5830_s1 + $0x1240] sm:$0xff] }
 0x11b   :  { %v620_v39 = vld [vmem:[%s5830_s1 + $0x1278] sm:$0xff]  ;;  %v2530_v43 = vpack.c.bf16 %v618_v37, %v614_v36  ;;  %v617_v45 = vld [vmem:[%s5830_s1 + $0x1260] sm:$0xff]  ;;  %v615_v40 = vld [vmem:[%s5830_s1 + $0x1250] sm:$0xff] }
 0x11c   :  { %2517 = vmatpush1.bf16.msra.mxu0 %v2516_v3  ;;  %v2922_v47 = vpack.c.bf16 %v620_v39, %v616_v38  ;;  %v619_v48 = vld [vmem:[%s5830_s1 + $0x1270] sm:$0xff]  ;;  %v622_v26 = vld [vmem:[%s5830_s1 + $0x1288] sm:$0xff]  ;;  %v624_v50 = vld [vmem:[%s5830_s1 + $0x1298] sm:$0xff]  ;;  %v2532_v54 = vpack.c.bf16 %v617_v45, %v613_v44 }
 0x11d   :  { %2909 = vmatpush1.bf16.msra.mxu1 %v2908_v4  ;;  %2519 = vmatprep.subr.bf16.mxu0 %v2518_v5  ;;  %v626_v49 = vld [vmem:[%s5830_s1 + $0x12a8] sm:$0xff]  ;;  %v628_v53 = vld [vmem:[%s5830_s1 + $0x12b8] sm:$0xff]  ;;  %v2924_v55 = vpack.c.bf16 %v619_v48, %v615_v40  ;;  %v621_v57 = vld [vmem:[%s5830_s1 + $0x1280] sm:$0xff] }
 0x11e   :  { %2911 = vmatprep.subr.bf16.mxu1 %v2910_v9  ;;  %v2534_v56 = vpack.c.bf16 %v626_v49, %v622_v26  ;;  %v625_v58 = vld [vmem:[%s5830_s1 + $0x12a0] sm:$0xff]  ;;  %v623_v59 = vld [vmem:[%s5830_s1 + $0x1290] sm:$0xff]  ;;  %v2926_v25 = vpack.c.bf16 %v628_v53, %v624_v50  ;;  %v630_v61 = vld [vmem:[%s5830_s1 + $0x12c8] sm:$0xff] }
 0x11f   :  { %v627_v60 = vld [vmem:[%s5830_s1 + $0x12b0] sm:$0xff]  ;;  %v634_v0 = vld [vmem:[%s5830_s1 + $0x12e8] sm:$0xff]  ;;  %v632_v1 = vld [vmem:[%s5830_s1 + $0x12d8] sm:$0xff]  ;;  %v2536_v3 = vpack.c.bf16 %v625_v58, %v621_v57 }
 0x120   :  { %2521 = vmatpush1.bf16.msra.mxu0 %v2520_v15  ;;  %v636_v2 = vld [vmem:[%s5830_s1 + $0x12f8] sm:$0xff]  ;;  %v2928_v4 = vpack.c.bf16 %v627_v60, %v623_v59  ;;  %v2538_v5 = vpack.c.bf16 %v634_v0, %v630_v61  ;;  %v629_v6 = vld [vmem:[%s5830_s1 + $0x12c0] sm:$0xff]  ;;  %v631_v8 = vld [vmem:[%s5830_s1 + $0x12d0] sm:$0xff] }
 0x121   :  { %2913 = vmatpush1.bf16.msra.mxu1 %v2912_v16  ;;  %2523 = vmatprep.subr.bf16.mxu0 %v2522_v17  ;;  %v633_v7 = vld [vmem:[%s5830_s1 + $0x12e0] sm:$0xff]  ;;  %v2930_v9 = vpack.c.bf16 %v636_v2, %v632_v1  ;;  %v635_v46 = vld [vmem:[%s5830_s1 + $0x12f0] sm:$0xff]  ;;  %v638_v10 = vld [vmem:[%s5830_s1 + $0x1308] sm:$0xff]  ;;  %v873_v1 = vcombine.high %v4783_v52, %v4783_v52 }
 0x122   :  { %2915 = vmatprep.subr.bf16.mxu1 %v2914_v21  ;;  %v642_v11 = vld [vmem:[%s5830_s1 + $0x1328] sm:$0xff]  ;;  %v640_v13 = vld [vmem:[%s5830_s1 + $0x1318] sm:$0xff]  ;;  %v2540_v15 = vpack.c.bf16 %v633_v7, %v629_v6  ;;  %v2932_v16 = vpack.c.bf16 %v635_v46, %v631_v8  ;;  %v637_v18 = vld [vmem:[%s5830_s1 + $0x1300] sm:$0xff] }
 0x123   :  { %v644_v14 = vld [vmem:[%s5830_s1 + $0x1338] sm:$0xff]  ;;  %v2542_v17 = vpack.c.bf16 %v642_v11, %v638_v10  ;;  %v641_v19 = vld [vmem:[%s5830_s1 + $0x1320] sm:$0xff]  ;;  %v639_v20 = vld [vmem:[%s5830_s1 + $0x1310] sm:$0xff] }
 0x124   :  { %2525 = vmatpush1.bf16.msra.mxu0 %v2524_v28  ;;  %v2934_v21 = vpack.c.bf16 %v644_v14, %v640_v13  ;;  %v643_v51 = vld [vmem:[%s5830_s1 + $0x1330] sm:$0xff]  ;;  %v646_v22 = vld [vmem:[%s5830_s1 + $0x1348] sm:$0xff]  ;;  %v648_v24 = vld [vmem:[%s5830_s1 + $0x1358] sm:$0xff]  ;;  %v2544_v28 = vpack.c.bf16 %v641_v19, %v637_v18  ;;  %v5198_v13 = vrot.slane %v873_v1, %v3464_v12 }
 0x125   :  { %2917 = vmatpush1.bf16.msra.mxu1 %v2916_v29  ;;  %2527 = vmatprep.subr.bf16.mxu0 %v2526_v30  ;;  %v650_v23 = vld [vmem:[%s5830_s1 + $0x1368] sm:$0xff]  ;;  %v652_v27 = vld [vmem:[%s5830_s1 + $0x1378] sm:$0xff]  ;;  %v2936_v29 = vpack.c.bf16 %v643_v51, %v639_v20  ;;  %v645_v31 = vld [vmem:[%s5830_s1 + $0x1340] sm:$0xff] }
 0x126   :  { %2919 = vmatprep.subr.bf16.mxu1 %v2918_v34  ;;  %v2546_v30 = vpack.c.bf16 %v650_v23, %v646_v22  ;;  %v649_v32 = vld [vmem:[%s5830_s1 + $0x1360] sm:$0xff]  ;;  %v647_v33 = vld [vmem:[%s5830_s1 + $0x1350] sm:$0xff]  ;;  %v2938_v34 = vpack.c.bf16 %v652_v27, %v648_v24  ;;  %v654_v36 = vld [vmem:[%s5830_s1 + $0x1388] sm:$0xff]  ;;  %v889_v27 = vcombine.high %v5198_v13, %v5198_v13 }
 0x127   :  { %v651_v35 = vld [vmem:[%s5830_s1 + $0x1370] sm:$0xff]  ;;  %v658_v37 = vld [vmem:[%s5830_s1 + $0x13a8] sm:$0xff]  ;;  %v656_v38 = vld [vmem:[%s5830_s1 + $0x1398] sm:$0xff] }
 0x128   :  { %2529 = vmatpush1.bf16.msra.mxu0 %v2528_v41  ;;  %v660_v39 = vld [vmem:[%s5830_s1 + $0x13b8] sm:$0xff]  ;;  %v2548_v41 = vpack.c.bf16 %v649_v32, %v645_v31  ;;  %v653_v44 = vld [vmem:[%s5830_s1 + $0x1380] sm:$0xff]  ;;  %v655_v40 = vld [vmem:[%s5830_s1 + $0x1390] sm:$0xff] }
 0x129   :  { %2921 = vmatpush1.bf16.msra.mxu1 %v2920_v42  ;;  %2531 = vmatprep.subr.bf16.mxu0 %v2530_v43  ;;  %v2940_v42 = vpack.c.bf16 %v651_v35, %v647_v33  ;;  %v2550_v43 = vpack.c.bf16 %v658_v37, %v654_v36  ;;  %v657_v45 = vld [vmem:[%s5830_s1 + $0x13a0] sm:$0xff]  ;;  %v659_v48 = vld [vmem:[%s5830_s1 + $0x13b0] sm:$0xff]  ;;  %v662_v26 = vld [vmem:[%s5830_s1 + $0x13c8] sm:$0xff] }
 0x12a   :  { %2923 = vmatprep.subr.bf16.mxu1 %v2922_v47  ;;  %v2942_v47 = vpack.c.bf16 %v660_v39, %v656_v38  ;;  %v666_v49 = vld [vmem:[%s5830_s1 + $0x13e8] sm:$0xff]  ;;  %v664_v50 = vld [vmem:[%s5830_s1 + $0x13d8] sm:$0xff]  ;;  %v661_v57 = vld [vmem:[%s5830_s1 + $0x13c0] sm:$0xff] }
 0x12b   :  { %v668_v53 = vld [vmem:[%s5830_s1 + $0x13f8] sm:$0xff]  ;;  %v665_v58 = vld [vmem:[%s5830_s1 + $0x13e0] sm:$0xff]  ;;  %v663_v59 = vld [vmem:[%s5830_s1 + $0x13d0] sm:$0xff] }
 0x12c   :  { %2533 = vmatpush1.bf16.msra.mxu0 %v2532_v54  ;;  %v2552_v54 = vpack.c.bf16 %v657_v45, %v653_v44  ;;  %v667_v60 = vld [vmem:[%s5830_s1 + $0x13f0] sm:$0xff]  ;;  %v670_v61 = vld [vmem:[%s5830_s1 + $0x1408] sm:$0xff]  ;;  %v672_v2 = vld [vmem:[%s5830_s1 + $0x1418] sm:$0xff] }
 0x12d   :  { %2925 = vmatpush1.bf16.msra.mxu1 %v2924_v55  ;;  %2535 = vmatprep.subr.bf16.mxu0 %v2534_v56  ;;  %v2944_v55 = vpack.c.bf16 %v659_v48, %v655_v40  ;;  %v2554_v56 = vpack.c.bf16 %v666_v49, %v662_v26  ;;  %v674_v0 = vld [vmem:[%s5830_s1 + $0x1428] sm:$0xff]  ;;  %v669_v7 = vld [vmem:[%s5830_s1 + $0x1400] sm:$0xff]  ;;  %v671_v8 = vld [vmem:[%s5830_s1 + $0x1410] sm:$0xff] }
 0x12e   :  { %2927 = vmatprep.subr.bf16.mxu1 %v2926_v25  ;;  %v2946_v25 = vpack.c.bf16 %v668_v53, %v664_v50  ;;  %v2558_v6 = vpack.c.bf16 %v674_v0, %v670_v61  ;;  %v673_v52 = vld [vmem:[%s5830_s1 + $0x1420] sm:$0xff]  ;;  %v675_v46 = vld [vmem:[%s5830_s1 + $0x1430] sm:$0xff]  ;;  %v678_v10 = vld [vmem:[%s5830_s1 + $0x1448] sm:$0xff] }
 0x12f   :  { %v682_v11 = vld [vmem:[%s5830_s1 + $0x1468] sm:$0xff]  ;;  %v680_v14 = vld [vmem:[%s5830_s1 + $0x1458] sm:$0xff]  ;;  %v677_v19 = vld [vmem:[%s5830_s1 + $0x1440] sm:$0xff] }
 0x130   :  { %2537 = vmatpush1.bf16.msra.mxu0 %v2536_v3  ;;  %v676_v3 = vld [vmem:[%s5830_s1 + $0x1438] sm:$0xff]  ;;  %v2562_v18 = vpack.c.bf16 %v682_v11, %v678_v10  ;;  %v681_v20 = vld [vmem:[%s5830_s1 + $0x1460] sm:$0xff]  ;;  %v683_v22 = vld [vmem:[%s5830_s1 + $0x1470] sm:$0xff] }
 0x131   :  { %2929 = vmatpush1.bf16.msra.mxu1 %v2928_v4  ;;  %2539 = vmatprep.subr.bf16.mxu0 %v2538_v5  ;;  %v2556_v4 = vpack.c.bf16 %v665_v58, %v661_v57  ;;  %v2948_v5 = vpack.c.bf16 %v667_v60, %v663_v59  ;;  %v686_v23 = vld [vmem:[%s5830_s1 + $0x1488] sm:$0xff]  ;;  %v685_v33 = vld [vmem:[%s5830_s1 + $0x1480] sm:$0xff]  ;;  %v687_v35 = vld [vmem:[%s5830_s1 + $0x1490] sm:$0xff] }
 0x132   :  { %2931 = vmatprep.subr.bf16.mxu1 %v2930_v9  ;;  %v2950_v9 = vpack.c.bf16 %v676_v3, %v672_v2  ;;  %v690_v24 = vld [vmem:[%s5830_s1 + $0x14a8] sm:$0xff]  ;;  %v696_v39 = vld [vmem:[%s5830_s1 + $0x14d8] sm:$0xff]  ;;  %v693_v45 = vld [vmem:[%s5830_s1 + $0x14c0] sm:$0xff] }
 0x133   :  { %v2566_v32 = vpack.c.bf16 %v690_v24, %v686_v23  ;;  %v694_v37 = vld [vmem:[%s5830_s1 + $0x14c8] sm:$0xff]  ;;  %v697_v40 = vld [vmem:[%s5830_s1 + $0x14e0] sm:$0xff]  ;;  %v699_v26 = vld [vmem:[%s5830_s1 + $0x14f0] sm:$0xff] }
 0x134   :  { %2541 = vmatpush1.bf16.msra.mxu0 %v2540_v15  ;;  %v684_v15 = vld [vmem:[%s5830_s1 + $0x1478] sm:$0xff]  ;;  %v698_v38 = vld [vmem:[%s5830_s1 + $0x14e8] sm:$0xff]  ;;  %v701_v58 = vld [vmem:[%s5830_s1 + $0x1500] sm:$0xff] }
 0x135   :  { %2933 = vmatpush1.bf16.msra.mxu1 %v2932_v16  ;;  %2543 = vmatprep.subr.bf16.mxu0 %v2542_v17  ;;  %v2560_v16 = vpack.c.bf16 %v673_v52, %v669_v7  ;;  %v2952_v17 = vpack.c.bf16 %v675_v46, %v671_v8  ;;  %v2954_v51 = vpack.c.bf16 %v684_v15, %v680_v14  ;;  %v702_v49 = vld [vmem:[%s5830_s1 + $0x1508] sm:$0xff]  ;;  %v704_v53 = vld [vmem:[%s5830_s1 + $0x1518] sm:$0xff]  ;;  %v705_v59 = vld [vmem:[%s5830_s1 + $0x1520] sm:$0xff] }
 0x136   :  { %2935 = vmatprep.subr.bf16.mxu1 %v2934_v21  ;;  %v679_v21 = vld [vmem:[%s5830_s1 + $0x1450] sm:$0xff]  ;;  %v2570_v44 = vpack.c.bf16 %v698_v38, %v694_v37  ;;  %v706_v50 = vld [vmem:[%s5830_s1 + $0x1528] sm:$0xff]  ;;  %v712_v2 = vld [vmem:[%s5830_s1 + $0x1558] sm:$0xff] }
 0x137   :  { %v2956_v31 = vpack.c.bf16 %v683_v22, %v679_v21  ;;  %v2574_v57 = vpack.c.bf16 %v706_v50, %v702_v49  ;;  %v707_v61 = vld [vmem:[%s5830_s1 + $0x1530] sm:$0xff]  ;;  %v710_v0 = vld [vmem:[%s5830_s1 + $0x1548] sm:$0xff]  ;;  %v716_v3 = vld [vmem:[%s5830_s1 + $0x1578] sm:$0xff] }
 0x138   :  { %2545 = vmatpush1.bf16.msra.mxu0 %v2544_v28  ;;  %v688_v28 = vld [vmem:[%s5830_s1 + $0x1498] sm:$0xff]  ;;  %v714_v1 = vld [vmem:[%s5830_s1 + $0x1568] sm:$0xff]  ;;  %v709_v7 = vld [vmem:[%s5830_s1 + $0x1540] sm:$0xff] }
 0x139   :  { %2937 = vmatpush1.bf16.msra.mxu1 %v2936_v29  ;;  %2547 = vmatprep.subr.bf16.mxu0 %v2546_v30  ;;  %v692_v29 = vld [vmem:[%s5830_s1 + $0x14b8] sm:$0xff]  ;;  %v2564_v30 = vpack.c.bf16 %v681_v20, %v677_v19  ;;  %v713_v52 = vld [vmem:[%s5830_s1 + $0x1560] sm:$0xff]  ;;  %v711_v8 = vld [vmem:[%s5830_s1 + $0x1550] sm:$0xff] }
 0x13a   :  { %2939 = vmatprep.subr.bf16.mxu1 %v2938_v34  ;;  %v689_v34 = vld [vmem:[%s5830_s1 + $0x14a0] sm:$0xff]  ;;  %v2958_v36 = vpack.c.bf16 %v692_v29, %v688_v28  ;;  %v715_v46 = vld [vmem:[%s5830_s1 + $0x1570] sm:$0xff]  ;;  %v718_v10 = vld [vmem:[%s5830_s1 + $0x1588] sm:$0xff] }
 0x13b   :  { %v722_v11 = vld [vmem:[%s5830_s1 + $0x15a8] sm:$0xff]  ;;  %v720_v14 = vld [vmem:[%s5830_s1 + $0x1598] sm:$0xff]  ;;  %v717_v19 = vld [vmem:[%s5830_s1 + $0x1580] sm:$0xff] }
 0x13c   :  { %2549 = vmatpush1.bf16.msra.mxu0 %v2548_v41  ;;  %v700_v41 = vld [vmem:[%s5830_s1 + $0x14f8] sm:$0xff]  ;;  %v721_v20 = vld [vmem:[%s5830_s1 + $0x15a0] sm:$0xff]  ;;  %v719_v21 = vld [vmem:[%s5830_s1 + $0x1590] sm:$0xff] }
 0x13d   :  { %2941 = vmatpush1.bf16.msra.mxu1 %v2940_v42  ;;  %2551 = vmatprep.subr.bf16.mxu0 %v2550_v43  ;;  %v2568_v42 = vpack.c.bf16 %v689_v34, %v685_v33  ;;  %v2962_v48 = vpack.c.bf16 %v700_v41, %v696_v39  ;;  %v724_v15 = vld [vmem:[%s5830_s1 + $0x15b8] sm:$0xff]  ;;  %v723_v22 = vld [vmem:[%s5830_s1 + $0x15b0] sm:$0xff]  ;;  %v726_v23 = vld [vmem:[%s5830_s1 + $0x15c8] sm:$0xff]  ;;  %v2584_v29 = vpack.c.bf16 %v721_v20, %v717_v19 }
 0x13e   :  { %2943 = vmatprep.subr.bf16.mxu1 %v2942_v47  ;;  %v695_v47 = vld [vmem:[%s5830_s1 + $0x14d0] sm:$0xff]  ;;  %v730_v24 = vld [vmem:[%s5830_s1 + $0x15e8] sm:$0xff]  ;;  %v732_v28 = vld [vmem:[%s5830_s1 + $0x15f8] sm:$0xff] }
 0x13f   :  { %v729_v33 = vld [vmem:[%s5830_s1 + $0x15e0] sm:$0xff]  ;;  %v727_v34 = vld [vmem:[%s5830_s1 + $0x15d0] sm:$0xff]  ;;  %v738_v37 = vld [vmem:[%s5830_s1 + $0x1628] sm:$0xff] }
 0x140   :  { %2553 = vmatpush1.bf16.msra.mxu0 %v2552_v54  ;;  %v708_v54 = vld [vmem:[%s5830_s1 + $0x1538] sm:$0xff]  ;;  %v746_v49 = vld [vmem:[%s5830_s1 + $0x1668] sm:$0xff]  ;;  %v761_v19 = vld [vmem:[%s5830_s1 + $0x16e0] sm:$0xff] }
 0x141   :  { %2945 = vmatpush1.bf16.msra.mxu1 %v2944_v55  ;;  %2555 = vmatprep.subr.bf16.mxu0 %v2554_v56  ;;  %v2572_v55 = vpack.c.bf16 %v697_v40, %v693_v45  ;;  %v2964_v56 = vpack.c.bf16 %v699_v26, %v695_v47  ;;  %v2966_v60 = vpack.c.bf16 %v708_v54, %v704_v53  ;;  %v736_v38 = vld [vmem:[%s5830_s1 + $0x1618] sm:$0xff]  ;;  %v737_v45 = vld [vmem:[%s5830_s1 + $0x1620] sm:$0xff]  ;;  %v735_v40 = vld [vmem:[%s5830_s1 + $0x1610] sm:$0xff] }
 0x142   :  { %2947 = vmatprep.subr.bf16.mxu1 %v2946_v25  ;;  %v703_v25 = vld [vmem:[%s5830_s1 + $0x1510] sm:$0xff]  ;;  %v740_v39 = vld [vmem:[%s5830_s1 + $0x1638] sm:$0xff]  ;;  %v742_v26 = vld [vmem:[%s5830_s1 + $0x1648] sm:$0xff] }
 0x143   :  { %v2982_v47 = vpack.c.bf16 %v740_v39, %v736_v38  ;;  %v744_v50 = vld [vmem:[%s5830_s1 + $0x1658] sm:$0xff]  ;;  %v759_v20 = vld [vmem:[%s5830_s1 + $0x16d0] sm:$0xff] }
 0x144   :  { %2557 = vmatpush1.bf16.msra.mxu0 %v2556_v4  ;;  %v2576_v4 = vpack.c.bf16 %v705_v59, %v701_v58  ;;  %v748_v53 = vld [vmem:[%s5830_s1 + $0x1678] sm:$0xff]  ;;  %v745_v58 = vld [vmem:[%s5830_s1 + $0x1660] sm:$0xff]  ;;  %v743_v59 = vld [vmem:[%s5830_s1 + $0x1650] sm:$0xff] }
 0x145   :  { %2949 = vmatpush1.bf16.msra.mxu1 %v2948_v5  ;;  %2559 = vmatprep.subr.bf16.mxu0 %v2558_v6  ;;  %v2968_v5 = vpack.c.bf16 %v707_v61, %v703_v25  ;;  %v2578_v6 = vpack.c.bf16 %v714_v1, %v710_v0  ;;  %v2986_v25 = vpack.c.bf16 %v748_v53, %v744_v50  ;;  %v750_v61 = vld [vmem:[%s5830_s1 + $0x1688] sm:$0xff]  ;;  %v752_v1 = vld [vmem:[%s5830_s1 + $0x1698] sm:$0xff] }
 0x146   :  { %2951 = vmatprep.subr.bf16.mxu1 %v2950_v9  ;;  %v2970_v9 = vpack.c.bf16 %v716_v3, %v712_v2  ;;  %v754_v0 = vld [vmem:[%s5830_s1 + $0x16a8] sm:$0xff]  ;;  %v756_v2 = vld [vmem:[%s5830_s1 + $0x16b8] sm:$0xff] }
 0x147   :  { %1261 = vmatmul.mubr.f32.vlgmr.msra.gmra.mrb[0].mxu0 %v4805_v63  ;;  %v780_v38 = vld [vmem:[%s5830_s1 + $0x1778] sm:$0xff] }
 0x148   :  { %2561 = vmatpush1.bf16.msra.mxu0 %v2560_v16  ;;  %1758 = vmatmul.mubr.f32.vlgmr.msra.gmra.mrb[0].mxu1 %v4805_v63  ;;  %v691_v63 = vld [vmem:[%s5830_s1 + $0x14b0] sm:$0xff]  ;;  %v2580_v16 = vpack.c.bf16 %v713_v52, %v709_v7  ;;  %v753_v7 = vld [vmem:[%s5830_s1 + $0x16a0] sm:$0xff]  ;;  %v788_v50 = vld [vmem:[%s5830_s1 + $0x17b8] sm:$0xff] }
 0x149   :  { %2953 = vmatpush1.bf16.msra.mxu1 %v2952_v17  ;;  %2563 = vmatprep.subr.bf16.mxu0 %v2562_v18  ;;  %v2960_v43 = vpack.c.bf16 %v691_v63, %v687_v35  ;;  %v2972_v17 = vpack.c.bf16 %v715_v46, %v711_v8  ;;  %v2582_v18 = vpack.c.bf16 %v722_v11, %v718_v10  ;;  %v734_v63 = vld [vmem:[%s5830_s1 + $0x1608] sm:$0xff]  ;;  %v751_v52 = vld [vmem:[%s5830_s1 + $0x1690] sm:$0xff]  ;;  %v760_v11 = vld [vmem:[%s5830_s1 + $0x16d8] sm:$0xff] }
 0x14a   :  { %2955 = vmatprep.subr.bf16.mxu1 %v2954_v51  ;;  %1331 = vmatprep.mubr.f32.mxu0 %v889_v27  ;;  %v2974_v51 = vpack.c.bf16 %v724_v15, %v720_v14  ;;  %v2990_v8 = vpack.c.bf16 %v756_v2, %v752_v1  ;;  %v758_v46 = vld [vmem:[%s5830_s1 + $0x16c8] sm:$0xff]  ;;  %v764_v14 = vld [vmem:[%s5830_s1 + $0x16f8] sm:$0xff] }
 0x14b   :  { %1828 = vmatprep.mubr.f32.mxu1 %v889_v27  ;;  %v728_v27 = vld [vmem:[%s5830_s1 + $0x15d8] sm:$0xff]  ;;  %v762_v10 = vld [vmem:[%s5830_s1 + $0x16e8] sm:$0xff] }
 0x14c   :  { %2565 = vmatpush1.bf16.msra.mxu0 %v2564_v30  ;;  %v2976_v30 = vpack.c.bf16 %v723_v22, %v719_v21  ;;  %v2978_v35 = vpack.c.bf16 %v732_v28, %v728_v27  ;;  %v2994_v21 = vpack.c.bf16 %v764_v14, %v760_v11  ;;  %v766_v22 = vld [vmem:[%s5830_s1 + $0x1708] sm:$0xff]  ;;  %v772_v27 = vld [vmem:[%s5830_s1 + $0x1738] sm:$0xff] }
 0x14d   :  { %2957 = vmatpush1.bf16.msra.mxu1 %v2956_v31  ;;  %2567 = vmatprep.subr.bf16.mxu0 %v2566_v32  ;;  %v2586_v31 = vpack.c.bf16 %v730_v24, %v726_v23  ;;  %v725_v32 = vld [vmem:[%s5830_s1 + $0x15c0] sm:$0xff]  ;;  %v770_v23 = vld [vmem:[%s5830_s1 + $0x1728] sm:$0xff]  ;;  %v768_v24 = vld [vmem:[%s5830_s1 + $0x1718] sm:$0xff] }
 0x14e   :  { %2959 = vmatprep.subr.bf16.mxu1 %v2958_v36  ;;  %v731_v36 = vld [vmem:[%s5830_s1 + $0x15f0] sm:$0xff]  ;;  %v2588_v41 = vpack.c.bf16 %v729_v33, %v725_v32  ;;  %v769_v32 = vld [vmem:[%s5830_s1 + $0x1720] sm:$0xff]  ;;  %v796_v1 = vld [vmem:[%s5830_s1 + $0x17f8] sm:$0xff] }
 0x14f   :  { %v767_v33 = vld [vmem:[%s5830_s1 + $0x1710] sm:$0xff]  ;;  %v804_v11 = vld [vmem:[%s5830_s1 + $0x1838] sm:$0xff] }
 0x150   :  { %2569 = vmatpush1.bf16.msra.mxu0 %v2568_v42  ;;  %v2980_v42 = vpack.c.bf16 %v731_v36, %v727_v34  ;;  %v2998_v34 = vpack.c.bf16 %v772_v27, %v768_v24  ;;  %v774_v36 = vld [vmem:[%s5830_s1 + $0x1748] sm:$0xff]  ;;  %v812_v24 = vld [vmem:[%s5830_s1 + $0x1878] sm:$0xff] }
 0x151   :  { %2961 = vmatpush1.bf16.msra.mxu1 %v2960_v43  ;;  %2571 = vmatprep.subr.bf16.mxu0 %v2570_v44  ;;  %v2590_v43 = vpack.c.bf16 %v738_v37, %v734_v63  ;;  %v733_v44 = vld [vmem:[%s5830_s1 + $0x1600] sm:$0xff]  ;;  %v778_v63 = vld [vmem:[%s5830_s1 + $0x1768] sm:$0xff]  ;;  %v776_v37 = vld [vmem:[%s5830_s1 + $0x1758] sm:$0xff] }
 0x152   :  { %2963 = vmatprep.subr.bf16.mxu1 %v2962_v48  ;;  %v739_v48 = vld [vmem:[%s5830_s1 + $0x1630] sm:$0xff]  ;;  %v2592_v54 = vpack.c.bf16 %v737_v45, %v733_v44  ;;  %v777_v44 = vld [vmem:[%s5830_s1 + $0x1760] sm:$0xff] }
 0x153   :  { %v775_v45 = vld [vmem:[%s5830_s1 + $0x1750] sm:$0xff] }
 0x154   :  { %2573 = vmatpush1.bf16.msra.mxu0 %v2572_v55  ;;  %v2984_v55 = vpack.c.bf16 %v739_v48, %v735_v40  ;;  %v3002_v40 = vpack.c.bf16 %v780_v38, %v776_v37  ;;  %v782_v48 = vld [vmem:[%s5830_s1 + $0x1788] sm:$0xff] }
 0x155   :  { %2965 = vmatpush1.bf16.msra.mxu1 %v2964_v56  ;;  %2575 = vmatprep.subr.bf16.mxu0 %v2574_v57  ;;  %v2594_v56 = vpack.c.bf16 %v746_v49, %v742_v26  ;;  %v741_v57 = vld [vmem:[%s5830_s1 + $0x1640] sm:$0xff]  ;;  %v786_v26 = vld [vmem:[%s5830_s1 + $0x17a8] sm:$0xff]  ;;  %v784_v49 = vld [vmem:[%s5830_s1 + $0x1798] sm:$0xff] }
 0x156   :  { %2967 = vmatprep.subr.bf16.mxu1 %v2966_v60  ;;  %v747_v60 = vld [vmem:[%s5830_s1 + $0x1670] sm:$0xff]  ;;  %v2596_v3 = vpack.c.bf16 %v745_v58, %v741_v57  ;;  %v785_v57 = vld [vmem:[%s5830_s1 + $0x17a0] sm:$0xff]  ;;  %v1982_v37 = vld [vmem:[%s5832_s3 + $0x188] sm:$0xff] }
 0x157   :  { %v783_v58 = vld [vmem:[%s5830_s1 + $0x1790] sm:$0xff] }
 0x158   :  { %2577 = vmatpush1.bf16.msra.mxu0 %v2576_v4  ;;  %v2988_v4 = vpack.c.bf16 %v747_v60, %v743_v59  ;;  %v3006_v59 = vpack.c.bf16 %v788_v50, %v784_v49  ;;  %v790_v60 = vld [vmem:[%s5830_s1 + $0x17c8] sm:$0xff]  ;;  %v1984_v49 = vld [vmem:[%s5832_s3 + $0x198] sm:$0xff] }
 0x159   :  { %2969 = vmatpush1.bf16.msra.mxu1 %v2968_v5  ;;  %2579 = vmatprep.subr.bf16.mxu0 %v2578_v6  ;;  %v2598_v5 = vpack.c.bf16 %v754_v0, %v750_v61  ;;  %v749_v6 = vld [vmem:[%s5830_s1 + $0x1680] sm:$0xff]  ;;  %v794_v61 = vld [vmem:[%s5830_s1 + $0x17e8] sm:$0xff]  ;;  %v792_v0 = vld [vmem:[%s5830_s1 + $0x17d8] sm:$0xff] }
 0x15a   :  { %2971 = vmatprep.subr.bf16.mxu1 %v2970_v9  ;;  %v755_v9 = vld [vmem:[%s5830_s1 + $0x16b0] sm:$0xff]  ;;  %v2600_v15 = vpack.c.bf16 %v753_v7, %v749_v6  ;;  %v793_v6 = vld [vmem:[%s5830_s1 + $0x17e0] sm:$0xff]  ;;  %v2164_v50 = vld.sshfl [vmem:[%s5829_s0 + $0x18] sm:$0x3 pattern:$0x76325410] }
 0x15b   :  { %v791_v7 = vld [vmem:[%s5830_s1 + $0x17d0] sm:$0xff] }
 0x15c   :  { %2581 = vmatpush1.bf16.msra.mxu0 %v2580_v16  ;;  %v2992_v16 = vpack.c.bf16 %v755_v9, %v751_v52  ;;  %v3010_v52 = vpack.c.bf16 %v796_v1, %v792_v0  ;;  %v798_v9 = vld [vmem:[%s5830_s1 + $0x1808] sm:$0xff]  ;;  %v1985_v0 = vld [vmem:[%s5832_s3 + $0x1a0] sm:$0xff] }
 0x15d   :  { %2973 = vmatpush1.bf16.msra.mxu1 %v2972_v17  ;;  %2583 = vmatprep.subr.bf16.mxu0 %v2582_v18  ;;  %v2602_v17 = vpack.c.bf16 %v762_v10, %v758_v46  ;;  %v757_v18 = vld [vmem:[%s5830_s1 + $0x16c0] sm:$0xff]  ;;  %v802_v46 = vld [vmem:[%s5830_s1 + $0x1828] sm:$0xff]  ;;  %v800_v10 = vld [vmem:[%s5830_s1 + $0x1818] sm:$0xff] }
 0x15e   :  { %2975 = vmatprep.subr.bf16.mxu1 %v2974_v51  ;;  %v763_v51 = vld [vmem:[%s5830_s1 + $0x16f0] sm:$0xff]  ;;  %v2604_v28 = vpack.c.bf16 %v761_v19, %v757_v18  ;;  %v801_v18 = vld [vmem:[%s5830_s1 + $0x1820] sm:$0xff]  ;;  %v1986_v1 = vld [vmem:[%s5832_s3 + $0x1a8] sm:$0xff] }
 0x15f   :  { %v799_v19 = vld [vmem:[%s5830_s1 + $0x1810] sm:$0xff] }
 0x160   :  { %2585 = vmatpush1.bf16.msra.mxu0 %v2584_v29  ;;  %v2996_v29 = vpack.c.bf16 %v763_v51, %v759_v20  ;;  %v3014_v20 = vpack.c.bf16 %v804_v11, %v800_v10  ;;  %v806_v51 = vld [vmem:[%s5830_s1 + $0x1848] sm:$0xff]  ;;  %v1987_v10 = vld [vmem:[%s5832_s3 + $0x1b0] sm:$0xff]  ;;  %v1988_v11 = vld [vmem:[%s5832_s3 + $0x1b8] sm:$0xff] }
 0x161   :  { %2977 = vmatpush1.bf16.msra.mxu1 %v2976_v30  ;;  %2587 = vmatprep.subr.bf16.mxu0 %v2586_v31  ;;  %v2606_v30 = vpack.c.bf16 %v770_v23, %v766_v22  ;;  %v765_v31 = vld [vmem:[%s5830_s1 + $0x1700] sm:$0xff]  ;;  %v810_v22 = vld [vmem:[%s5830_s1 + $0x1868] sm:$0xff]  ;;  %v808_v23 = vld [vmem:[%s5830_s1 + $0x1858] sm:$0xff] }
 0x162   :  { %2979 = vmatprep.subr.bf16.mxu1 %v2978_v35  ;;  %v771_v35 = vld [vmem:[%s5830_s1 + $0x1730] sm:$0xff]  ;;  %v2608_v39 = vpack.c.bf16 %v769_v32, %v765_v31  ;;  %v809_v31 = vld [vmem:[%s5830_s1 + $0x1860] sm:$0xff] }
 0x163   :  { %v807_v32 = vld [vmem:[%s5830_s1 + $0x1850] sm:$0xff] }
 0x164   :  { %2589 = vmatpush1.bf16.msra.mxu0 %v2588_v41  ;;  %v3000_v41 = vpack.c.bf16 %v771_v35, %v767_v33  ;;  %v3018_v33 = vpack.c.bf16 %v812_v24, %v808_v23  ;;  %v1949_v35 = vld [vmem:[%s5832_s3 + $0x80] sm:$0xff]  ;;  %v1990_v24 = vld [vmem:[%s5832_s3 + $0x1c8] sm:$0xff] }
 0x165   :  { %2981 = vmatpush1.bf16.msra.mxu1 %v2980_v42  ;;  %2591 = vmatprep.subr.bf16.mxu0 %v2590_v43  ;;  %v2610_v42 = vpack.c.bf16 %v778_v63, %v774_v36  ;;  %v773_v43 = vld [vmem:[%s5830_s1 + $0x1740] sm:$0xff]  ;;  %v1950_v36 = vld [vmem:[%s5832_s3 + $0x88] sm:$0xff] }
 0x166   :  { %2983 = vmatprep.subr.bf16.mxu1 %v2982_v47  ;;  %v779_v47 = vld [vmem:[%s5830_s1 + $0x1770] sm:$0xff]  ;;  %v2612_v53 = vpack.c.bf16 %v777_v44, %v773_v43  ;;  %v1981_v63 = vld [vmem:[%s5832_s3 + $0x180] sm:$0xff]  ;;  %v1934_v43 = vld [vmem:[%s5832_s3 + $0x8] sm:$0xff] }
 0x167   :  { %v1965_v44 = vld [vmem:[%s5832_s3 + $0x100] sm:$0xff] }
 0x168   :  { %2593 = vmatpush1.bf16.msra.mxu0 %v2592_v54  ;;  %v3004_v54 = vpack.c.bf16 %v779_v47, %v775_v45  ;;  %v3054_v45 = vpack.c.bf16 %v1982_v37, %v1981_v63  ;;  %v1951_v47 = vld [vmem:[%s5832_s3 + $0x90] sm:$0xff]  ;;  %v1989_v23 = vld [vmem:[%s5832_s3 + $0x1c0] sm:$0xff]  ;;  %v1992_v37 = vld [vmem:[%s5832_s3 + $0x1d8] sm:$0xff] }
 0x169   :  { %2985 = vmatpush1.bf16.msra.mxu1 %v2984_v55  ;;  %2595 = vmatprep.subr.bf16.mxu0 %v2594_v56  ;;  %v2614_v55 = vpack.c.bf16 %v786_v26, %v782_v48  ;;  %v781_v56 = vld [vmem:[%s5830_s1 + $0x1780] sm:$0xff]  ;;  %v1952_v48 = vld [vmem:[%s5832_s3 + $0x98] sm:$0xff]  ;;  %v1983_v26 = vld [vmem:[%s5832_s3 + $0x190] sm:$0xff] }
 0x16a   :  { %2987 = vmatprep.subr.bf16.mxu1 %v2986_v25  ;;  %v787_v25 = vld [vmem:[%s5830_s1 + $0x17b0] sm:$0xff]  ;;  %v2616_v2 = vpack.c.bf16 %v785_v57, %v781_v56  ;;  %v1936_v57 = vld [vmem:[%s5832_s3 + $0x18] sm:$0xff] }
 0x16b   :  { %v1935_v56 = vld [vmem:[%s5832_s3 + $0x10] sm:$0xff] }
 0x16c   :  { %2597 = vmatpush1.bf16.msra.mxu0 %v2596_v3  ;;  %v3008_v3 = vpack.c.bf16 %v787_v25, %v783_v58  ;;  %v1967_v58 = vld [vmem:[%s5832_s3 + $0x110] sm:$0xff]  ;;  %v1968_v25 = vld [vmem:[%s5832_s3 + $0x118] sm:$0xff] }
 0x16d   :  { %2989 = vmatpush1.bf16.msra.mxu1 %v2988_v4  ;;  %2599 = vmatprep.subr.bf16.mxu0 %v2598_v5  ;;  %v2618_v4 = vpack.c.bf16 %v794_v61, %v790_v60  ;;  %v789_v5 = vld [vmem:[%s5830_s1 + $0x17c0] sm:$0xff]  ;;  %v1954_v61 = vld [vmem:[%s5832_s3 + $0xa8] sm:$0xff]  ;;  %v1991_v63 = vld [vmem:[%s5832_s3 + $0x1d0] sm:$0xff] }
 0x16e   :  { %2991 = vmatprep.subr.bf16.mxu1 %v2990_v8  ;;  %v795_v8 = vld [vmem:[%s5830_s1 + $0x17f0] sm:$0xff]  ;;  %v2620_v14 = vpack.c.bf16 %v793_v6, %v789_v5  ;;  %v1953_v60 = vld [vmem:[%s5832_s3 + $0xa0] sm:$0xff]  ;;  %v1938_v6 = vld [vmem:[%s5832_s3 + $0x28] sm:$0xff] }
 0x16f   :  { %v1937_v5 = vld [vmem:[%s5832_s3 + $0x20] sm:$0xff] }
 0x170   :  { %2601 = vmatpush1.bf16.msra.mxu0 %v2600_v15  ;;  %v3012_v15 = vpack.c.bf16 %v795_v8, %v791_v7  ;;  %v1969_v7 = vld [vmem:[%s5832_s3 + $0x120] sm:$0xff]  ;;  %v1970_v8 = vld [vmem:[%s5832_s3 + $0x128] sm:$0xff] }
 0x171   :  { %2993 = vmatpush1.bf16.msra.mxu1 %v2992_v16  ;;  %2603 = vmatprep.subr.bf16.mxu0 %v2602_v17  ;;  %v2622_v16 = vpack.c.bf16 %v802_v46, %v798_v9  ;;  %v797_v17 = vld [vmem:[%s5830_s1 + $0x1800] sm:$0xff]  ;;  %v1955_v9 = vld [vmem:[%s5832_s3 + $0xb0] sm:$0xff]  ;;  %v1956_v46 = vld [vmem:[%s5832_s3 + $0xb8] sm:$0xff] }
 0x172   :  { %2995 = vmatprep.subr.bf16.mxu1 %v2994_v21  ;;  %v803_v21 = vld [vmem:[%s5830_s1 + $0x1830] sm:$0xff]  ;;  %v2624_v27 = vpack.c.bf16 %v801_v18, %v797_v17  ;;  %v1940_v18 = vld [vmem:[%s5832_s3 + $0x38] sm:$0xff] }
 0x173   :  { %v1939_v17 = vld [vmem:[%s5832_s3 + $0x30] sm:$0xff] }
 0x174   :  { %2605 = vmatpush1.bf16.msra.mxu0 %v2604_v28  ;;  %v3016_v28 = vpack.c.bf16 %v803_v21, %v799_v19  ;;  %v1971_v19 = vld [vmem:[%s5832_s3 + $0x130] sm:$0xff]  ;;  %v1972_v21 = vld [vmem:[%s5832_s3 + $0x138] sm:$0xff] }
 0x175   :  { %2997 = vmatpush1.bf16.msra.mxu1 %v2996_v29  ;;  %2607 = vmatprep.subr.bf16.mxu0 %v2606_v30  ;;  %v2626_v29 = vpack.c.bf16 %v810_v22, %v806_v51  ;;  %v805_v30 = vld [vmem:[%s5830_s1 + $0x1840] sm:$0xff]  ;;  %v1958_v22 = vld [vmem:[%s5832_s3 + $0xc8] sm:$0xff] }
 0x176   :  { %2999 = vmatprep.subr.bf16.mxu1 %v2998_v34  ;;  %v811_v34 = vld [vmem:[%s5830_s1 + $0x1870] sm:$0xff]  ;;  %v2628_v38 = vpack.c.bf16 %v809_v31, %v805_v30  ;;  %v1957_v51 = vld [vmem:[%s5832_s3 + $0xc0] sm:$0xff]  ;;  %v1942_v31 = vld [vmem:[%s5832_s3 + $0x48] sm:$0xff] }
 0x177   :  { %v1941_v30 = vld [vmem:[%s5832_s3 + $0x40] sm:$0xff] }
 0x178   :  { %2609 = vmatpush1.bf16.msra.mxu0 %v2608_v39  ;;  %v3020_v39 = vpack.c.bf16 %v811_v34, %v807_v32  ;;  %v1973_v32 = vld [vmem:[%s5832_s3 + $0x140] sm:$0xff]  ;;  %v1974_v34 = vld [vmem:[%s5832_s3 + $0x148] sm:$0xff] }
 0x179   :  { %3001 = vmatpush1.bf16.msra.mxu1 %v3000_v41  ;;  %2611 = vmatprep.subr.bf16.mxu0 %v2610_v42  ;;  %v3022_v41 = vpack.c.bf16 %v1950_v36, %v1949_v35  ;;  %v1933_v42 = vld [vmem:[%s5832_s3] sm:$0xff]  ;;  %v1959_v35 = vld [vmem:[%s5832_s3 + $0xd0] sm:$0xff]  ;;  %v1960_v36 = vld [vmem:[%s5832_s3 + $0xd8] sm:$0xff] }
 0x17a   :  { %3003 = vmatprep.subr.bf16.mxu1 %v3002_v40  ;;  %v1966_v40 = vld [vmem:[%s5832_s3 + $0x108] sm:$0xff] }
 0x17c   :  { %2613 = vmatpush1.bf16.msra.mxu0 %v2612_v53  ;;  %v3024_v53 = vpack.c.bf16 %v1934_v43, %v1933_v42  ;;  %v1943_v42 = vld [vmem:[%s5832_s3 + $0x50] sm:$0xff]  ;;  %v1944_v43 = vld [vmem:[%s5832_s3 + $0x58] sm:$0xff] }
 0x17d   :  { %3005 = vmatpush1.bf16.msra.mxu1 %v3004_v54  ;;  %2615 = vmatprep.subr.bf16.mxu0 %v2614_v55  ;;  %v3056_v54 = vpack.c.bf16 %v1966_v40, %v1965_v44  ;;  %v3026_v55 = vpack.c.bf16 %v1952_v48, %v1951_v47  ;;  %v1975_v44 = vld [vmem:[%s5832_s3 + $0x150] sm:$0xff]  ;;  %v1961_v40 = vld [vmem:[%s5832_s3 + $0xe0] sm:$0xff]  ;;  %v1962_v47 = vld [vmem:[%s5832_s3 + $0xe8] sm:$0xff] }
 0x17e   :  { %3007 = vmatprep.subr.bf16.mxu1 %v3006_v59  ;;  %v3058_v59 = vpack.c.bf16 %v1984_v49, %v1983_v26  ;;  %v1993_v48 = vld [vmem:[%s5832_s3 + $0x1e0] sm:$0xff]  ;;  %v1994_v26 = vld [vmem:[%s5832_s3 + $0x1e8] sm:$0xff]  ;;  %v3044_v49 = vpack.c.bf16 %v1944_v43, %v1943_v42 }
 0x180   :  { %2617 = vmatpush1.bf16.msra.mxu0 %v2616_v2  ;;  %v3028_v2 = vpack.c.bf16 %v1936_v57, %v1935_v56  ;;  %v1946_v56 = vld [vmem:[%s5832_s3 + $0x68] sm:$0xff]  ;;  %v1977_v57 = vld [vmem:[%s5832_s3 + $0x160] sm:$0xff] }
 0x181   :  { %3009 = vmatpush1.bf16.msra.mxu1 %v3008_v3  ;;  %2619 = vmatprep.subr.bf16.mxu0 %v2618_v4  ;;  %v3060_v3 = vpack.c.bf16 %v1968_v25, %v1967_v58  ;;  %v3030_v4 = vpack.c.bf16 %v1954_v61, %v1953_v60  ;;  %v1963_v60 = vld [vmem:[%s5832_s3 + $0xf0] sm:$0xff]  ;;  %v1964_v61 = vld [vmem:[%s5832_s3 + $0xf8] sm:$0xff] }
 0x182   :  { %3011 = vmatprep.subr.bf16.mxu1 %v3010_v52  ;;  %v3062_v52 = vpack.c.bf16 %v1986_v1, %v1985_v0  ;;  %v1995_v0 = vld [vmem:[%s5832_s3 + $0x1f0] sm:$0xff]  ;;  %v3050_v1 = vpack.c.bf16 %v1964_v61, %v1963_v60 }
 0x184   :  { %2621 = vmatpush1.bf16.msra.mxu0 %v2620_v14  ;;  %v3032_v14 = vpack.c.bf16 %v1938_v6, %v1937_v5 }
 0x185   :  { %3013 = vmatpush1.bf16.msra.mxu1 %v3012_v15  ;;  %2623 = vmatprep.subr.bf16.mxu0 %v2622_v16  ;;  %v3064_v15 = vpack.c.bf16 %v1970_v8, %v1969_v7  ;;  %v3034_v16 = vpack.c.bf16 %v1956_v46, %v1955_v9  ;;  %v1979_v7 = vld [vmem:[%s5832_s3 + $0x170] sm:$0xff]  ;;  %v817_v9 = vsub.s32 0, %v3437_v62  ;;  %v813_v46 = vld [vmem:[%s5831_s2] sm:$0xf]  ;;  %s3146_s2 = smov [#allocation3]  }
 0x186   :  { %3015 = vmatprep.subr.bf16.mxu1 %v3014_v20  ;;  %v3066_v20 = vpack.c.bf16 %v1988_v11, %v1987_v10  ;;  %v825_v10 = vsub.s32 2, %v3437_v62  ;;  %v821_v11 = vsub.s32 1, %v3437_v62 }
 0x187   :  { %1332 = vmatmul.mubr.f32.vlgmr.msra.gmra.mrb[0].mxu0 %v5198_v13 }
 0x188   :  { %1829 = vmatmul.mubr.f32.vlgmr.msra.gmra.mrb[0].mxu1 %v5198_v13  ;;  %2625 = vmatpush1.bf16.msra.mxu0 %v2624_v27  ;;  %v3145_v13 = vmov 0.0   ;;  %v3036_v27 = vpack.c.bf16 %v1940_v18, %v1939_v17  ;;  %v822_v17 = vrot.slane %v813_v46, %v821_v11 }
 0x189   :  { %3017 = vmatpush1.bf16.msra.mxu1 %v3016_v28  ;;  %2627 = vmatprep.subr.bf16.mxu0 %v2626_v29  ;;  %v3068_v28 = vpack.c.bf16 %v1972_v21, %v1971_v19  ;;  %v3038_v29 = vpack.c.bf16 %v1958_v22, %v1957_v51 }
 0x18a   :  { %3019 = vmatprep.subr.bf16.mxu1 %v3018_v33  ;;  %1402 = vmatprep.mubr.f32.mxu0 %v3145_v13  ;;  %v3070_v33 = vpack.c.bf16 %v1990_v24, %v1989_v23 }
 0x18b   :  { %1899 = vmatprep.mubr.f32.mxu1 %v3145_v13  ;;  %v3074_v13 = vpack.c.bf16 %v1992_v37, %v1991_v63 }
 0x18c   :  { %2629 = vmatpush1.bf16.msra.mxu0 %v2628_v38  ;;  %v3040_v38 = vpack.c.bf16 %v1942_v31, %v1941_v30 }
 0x18d   :  { %3021 = vmatpush1.bf16.msra.mxu1 %v3020_v39  ;;  %3023 = vmatprep.subr.bf16.mxu0 %v3022_v41  ;;  %v3072_v39 = vpack.c.bf16 %v1974_v34, %v1973_v32  ;;  %v3042_v41 = vpack.c.bf16 %v1960_v36, %v1959_v35 }
 0x18e   :  { %3055 = vmatprep.subr.bf16.mxu1 %v3054_v45  ;;  %v1976_v45 = vld [vmem:[%s5832_s3 + $0x158] sm:$0xff] }
 0x18f   :  { %2165 = vmatmul.mubr.msk.f32.vlgmr.msra.gmra.mrb[0].mxu0 %vm909_vm0, %v2164_v50 }
 0x190   :  { %2166 = vmatmul.mubr.msk.f32.vlgmr.msra.gmra.mrb[0].mxu1 %vm909_vm0, %v2164_v50  ;;  %3025 = vmatpush3.bf16.msra.mxu0 %v3024_v53  ;;  %v3076_v50 = vpack.c.bf16 %v1976_v45, %v1975_v44  ;;  %v3046_v53 = vpack.c.bf16 %v1962_v47, %v1961_v40 }
 0x191   :  { %3057 = vmatpush3.bf16.msra.mxu1 %v3056_v54  ;;  %3027 = vmatprep.subr.bf16.mxu0 %v3026_v55  ;;  %v3078_v54 = vpack.c.bf16 %v1994_v26, %v1993_v48  ;;  %v1945_v55 = vld [vmem:[%s5832_s3 + $0x60] sm:$0xff] }
 0x192   :  { %3059 = vmatprep.subr.bf16.mxu1 %v3058_v59  ;;  %v3048_v58 = vpack.c.bf16 %v1946_v56, %v1945_v55  ;;  %v1978_v59 = vld [vmem:[%s5832_s3 + $0x168] sm:$0xff] }
 0x193   :  { %v3080_v25 = vpack.c.bf16 %v1978_v59, %v1977_v57 }
 0x194   :  { %3029 = vmatpush3.bf16.msra.mxu0 %v3028_v2  ;;  %v1996_v2 = vld [vmem:[%s5832_s3 + $0x1f8] sm:$0xff] }
 0x195   :  { %3061 = vmatpush3.bf16.msra.mxu1 %v3060_v3  ;;  %3031 = vmatprep.subr.bf16.mxu0 %v3030_v4  ;;  %v1947_v3 = vld [vmem:[%s5832_s3 + $0x70] sm:$0xff]  ;;  %v1948_v4 = vld [vmem:[%s5832_s3 + $0x78] sm:$0xff]  ;;  %v3082_v5 = vpack.c.bf16 %v1996_v2, %v1995_v0 }
 0x196   :  { %3063 = vmatprep.subr.bf16.mxu1 %v3062_v52  ;;  %v3052_v6 = vpack.c.bf16 %v1948_v4, %v1947_v3  ;;  %v1980_v52 = vld [vmem:[%s5832_s3 + $0x178] sm:$0xff]  ;;  %s2152_s3 = sshll.u32 %s3146_s2, 4  ;;  %s2153_s3 = int_to_ptr.vmem [resolvable:$true] %s2152_s3 }
 0x197   :  { %v3084_v8 = vpack.c.bf16 %v1980_v52, %v1979_v7  ;;  %s3120_s20 = scalar_lea.vmem %s2153_s3, 128  ;;  %p3125_p1 = scmp.lt.s32.totalorder %s2153_s3, %s2153_s3 }
 0x198   :  { %3033 = vmatpush3.bf16.msra.mxu0 %v3032_v14  ;;  %v829_v14 = vsub.s32 3, %v3437_v62  ;;  %p3121_p0 = scmp.ne.s32.totalorder %s2153_s3, %s3120_s20  ;;  %p3126_p2 = scmp.lt.s32.totalorder %s3120_s20, %s3120_s20 }
 0x199   :  { %3065 = vmatpush3.bf16.msra.mxu1 %v3064_v15  ;;  %3035 = vmatprep.subr.bf16.mxu0 %v3034_v16  ;;  %v818_v15 = vrot.slane %v813_v46, %v817_v9  ;;  %v826_v16 = vrot.slane %v813_v46, %v825_v10 }
 0x19a   :  { %3067 = vmatprep.subr.bf16.mxu1 %v3066_v20  ;;  %v830_v18 = vrot.slane %v813_v46, %v829_v14  ;;  %p3127_p3 = por %p3126_p2, %p3125_p1 }
 0x19c   :  { %3037 = vmatpush3.bf16.msra.mxu0 %v3036_v27  ;;  %p3128_p4 = pnand %p3127_p3, %p3121_p0 }
 0x19d   :  { %3069 = vmatpush3.bf16.msra.mxu1 %v3068_v28  ;;  %3039 = vmatprep.subr.bf16.mxu0 %v3038_v29 }
 0x19e   :  { %3071 = vmatprep.subr.bf16.mxu1 %v3070_v33 }
 0x1a0   :  { %3041 = vmatpush3.bf16.msra.mxu0 %v3040_v38 }
 0x1a1   :  { %3073 = vmatpush3.bf16.msra.mxu1 %v3072_v39  ;;  %3043 = vmatprep.subr.bf16.mxu0 %v3042_v41 }
 0x1a2   :  { %3075 = vmatprep.subr.bf16.mxu1 %v3074_v13 }
 0x1a4   :  { %3045 = vmatpush3.bf16.msra.mxu0 %v3044_v49 }
 0x1a5   :  { %3077 = vmatpush3.bf16.msra.mxu1 %v3076_v50  ;;  %3047 = vmatprep.subr.bf16.mxu0 %v3046_v53 }
 0x1a6   :  { %3079 = vmatprep.subr.bf16.mxu1 %v3078_v54 }
 0x1a8   :  { %3049 = vmatpush3.bf16.msra.mxu0 %v3048_v58 }
 0x1a9   :  { %3081 = vmatpush3.bf16.msra.mxu1 %v3080_v25  ;;  %3051 = vmatprep.subr.bf16.mxu0 %v3050_v1 }
 0x1aa   :  { %3083 = vmatprep.subr.bf16.mxu1 %v3082_v5 }
 0x1ac   :  { %3053 = vmatpush3.bf16.msra.mxu0 %v3052_v6 }
 0x1ad   :  { %3085 = vmatpush3.bf16.msra.mxu1 %v3084_v8 }
 0x262   :  { %v1404_v19 = vpop.f32.mrb[0].mxu0 }
 0x263   :  { %v3086_v20 = vadd.f32 %v1404_v19, %v818_v15  ;;  %v1901_v21 = vpop.f32.mrb[0].mxu1  ;;  %v1406_v51 = vpop.f32.mrb[1].mxu0 }
 0x264   :  { %v3088_v22 = vadd.f32 %v1901_v21, %v826_v16  ;;  %v3087_v23 = vadd.f32 %v1406_v51, %v822_v17  ;;  %v1903_v24 = vpop.f32.mrb[1].mxu1 }
 0x265   :  { %v1906_v27 = vmax.f32 %v3086_v20, 0.0  ;;  %v3089_v28 = vadd.f32 %v1903_v24, %v830_v18 }
 0x266   :  { %v1908_v29 = vmax.f32 %v3088_v22, 0.0  ;;  %v1907_v30 = vmax.f32 %v3087_v23, 0.0 }
 0x267   :  { %v1909_v31 = vmax.f32 %v3089_v28, 0.0 }
 0x268   :  { %v1914_v32 = vcombine.low %v1906_v27, %v1907_v30  ;;  %2068 = vmatprep.mubr.f32.mxu0 %v1907_v30 }
 0x269   :  { %v1915_v33 = vcombine.low %v1908_v29, %v1909_v31  ;;  %2138 = vmatprep.mubr.f32.mxu1 %v1909_v31  ;;  %2069 = vmatmul.mubr.f32.vlgmr.msra.gmra.mrb[2].mxu0 %v1906_v27 }
 0x26a   :  { %2139 = vmatmul.mubr.f32.vlgmr.msra.gmra.mrb[2].mxu1 %v1908_v29  ;;  %v1922_v62 = vrot.slane %v1914_v32, %v3464_v12 }
 0x26b   :  { %v1929_v34 = vrot.slane %v1915_v33, %v3464_v12 }
 0x26d   :  { %v1930_v35 = vcombine.low %v1922_v62, %v1929_v34 }
 0x26f   :  { %1932 = vst [vmem:[#allocation3] sm:$0xff] %v1930_v35 }
 0x270   :  { %3131 = shalt.err (!%p3128_p4)
}
 0x271   :  { %s3132_s23 = scalar_lea.hbm %s5834_s5, 128 }
 0x272   :  { %p3133_p5 = scmp.ne.s32.totalorder %s5834_s5, %s3132_s23  ;;  %p3136_p6 = scmp.lt.u32.totalorder %s3132_s23, %s5834_s5 }
 0x274   :  { %p3138_p7 = pnand %p3136_p6, %p3133_p5 }
 0x276   :  { %3141 = shalt.err (!%p3138_p7)
}
 0x277   :  { %2155 = dma.vmem_to_hbm [thread:$0]  %s2153_s3, 128, %s5834_s5, [#allocation4]   ;;  %v2167_v63 = vld [vmem:[#allocation2] ss:$0 sm:$0xff]  ;;  %vm2144_vm1 = vcmask 1024  }
 0x33c   :  { %v2200_v12 = vpop.f32.mrb[2].mxu0 }
 0x33d   :  { %v2235_v36 = vpop.f32.mrb[2].mxu1  ;;  %v2201_v37 = vpop.f32.mrb[3].mxu0 }
 0x33e   :  { %v2202_v38 = vadd.f32 %v2201_v37, %v2200_v12  ;;  %v2236_v39 = vpop.f32.mrb[3].mxu1 }
 0x33f   :  { %v2237_v41 = vadd.f32 %v2236_v39, %v2235_v36 }
 0x340   :  { %v2071_v42 = vadd.f32 %v2202_v38, %v2167_v63 }
 0x342   :  { %v2141_v43 = vadd.f32 %v2237_v41, %v2071_v42 }
 0x344   :  { %2145 = vst.msk [vmem:[%s5835_s6] sm:$0x3] %vm2144_vm1, %v2141_v43 }
 0x345   :  { %3142 = dma.done.wait [#allocation4], 128  }
 0x346   :  { %3143 = vsyncadd [#allocation4], 4294967168 }
 0x347   :  { %2163 = vsyncpa [#allocation4], 1 }

</bundles_post_ra>
